<compile_context>
chip_gen: v5e
topology: v5e:2x2
jax: 0.10.0
libtpu: 0.0.40
codegen_flags: <defaults>
</compile_context>

<pallas_src>
import jax
import jax.numpy as jnp
import numpy as np
from jax import lax
from jax.experimental import pallas as pl
from jax.experimental.pallas import tpu as pltpu

# bf16 EUP transcendentals are ~2x faster on v6e/v7x; on v5e (no bf16 EUP/VPU) set to jnp.float32.
_TRANS_DTYPE = jnp.bfloat16
_PAD_LOGIT = -1.0e4   # sigmoid -> 0, softplus -> 0 (after clamp): padded points contribute nothing


def _ceil_to(x, m):
    return -(-int(x) // int(m)) * int(m)


def _matcher_cost_kernel(cw_ref, plab_ref, pmask_ref, tmask_ref, onehot_ref, out_ref,
                         acc_mask_ref, acc_dice_ref, sp_sum_ref, sig_sum_ref, tgt_sum_ref):
    """Grid = (batch, q-tile, N-tile).  Accumulates over N-tiles, finalizes on the last one.

    cw_ref       : SMEM (3,)                  f32  -- [w_class, w_mask / n_points, w_dice]
    plab_ref     : VMEM (1, tile_q, C)        f32  -- class logits               (k-invariant)
    pmask_ref    : VMEM (1, tile_q, tile_n)   bf16 -- mask logits   (N-tile)
    tmask_ref    : VMEM (1, T,      tile_n)   bf16 -- gt masks 0/1  (N-tile)
    onehot_ref   : VMEM (1, T,      C)        f32  -- one-hot gt labels          (k-invariant)
    out_ref      : VMEM (1, T,      tile_q)   f32  -- transposed cost matrix C^T (resident in k)
    acc_mask_ref : VMEM (T, tile_q)           f32  -- sum_k  tgt_k @ x_k^T
    acc_dice_ref : VMEM (T, tile_q)           f32  -- sum_k  tgt_k @ sigmoid(x_k)^T
    sp_sum_ref   : VMEM (1, tile_q)           f32  -- sum_N  softplus(x)
    sig_sum_ref  : VMEM (1, tile_q)           f32  -- sum_N  sigmoid(x)
    tgt_sum_ref  : VMEM (T, 1)                f32  -- sum_N  tgt
    """
    # Scalar reads hoisted to the top (keep sld's off any wait path).
    w_class = cw_ref[0]
    w_mask_n = cw_ref[1]        # already divided by n_points in the wrapper
    w_dice = cw_ref[2]

    k = pl.program_id(2)
    n_k = pl.num_programs(2)

    dn = (((1,), (1,)), ((), ()))   # contract the shared last axis: 'nc,mc->nm'

    @pl.when(k == 0)
    def _init_and_class():
        acc_mask_ref[...] = jnp.zeros_like(acc_mask_ref)
        acc_dice_ref[...] = jnp.zeros_like(acc_dice_ref)
        sp_sum_ref[...] = jnp.zeros_like(sp_sum_ref)
        sig_sum_ref[...] = jnp.zeros_like(sig_sum_ref)
        tgt_sum_ref[...] = jnp.zeros_like(tgt_sum_ref)

        # --- cost_class^T = -(onehot @ softmax(logits)^T), done on the first k-step so the
        #     softmax/matmul overlap the DMAs of the later point tiles (out_ref is resident). ---
        logits = plab_ref[0]                                           # (tile_q, C) f32
        onehot = onehot_ref[0]                                         # (T, C)      f32
        m = jnp.max(logits, axis=-1, keepdims=True)
        e = jnp.exp(logits - m)
        probs = e / jnp.sum(e, axis=-1, keepdims=True)                 # (tile_q, C)
        cost_class_t = -lax.dot_general(onehot, probs, dn,
                                        preferred_element_type=jnp.float32)   # (T, tile_q)
        out_ref[0] = w_class * cost_class_t

    x = pmask_ref[0]            # (tile_q, tile_n) bf16 mask logits
    tgt = tmask_ref[0]          # (T,      tile_n) bf16 float 0/1

    # One sigmoid + one log per element; softplus(x) = max(x - log(max(sigmoid(x), tiny)), 0).
    xt = x.astype(_TRANS_DTYPE)
    s = jax.nn.sigmoid(xt)                                             # EUP
    log_s = jnp.log(jnp.maximum(s, jnp.asarray(1e-37, _TRANS_DTYPE)))  # EUP
    softplus_x = jnp.maximum(xt - log_s, jnp.asarray(0.0, _TRANS_DTYPE))

    # Row-sum accumulators (f32).
    sp_sum_ref[...] += jnp.sum(softplus_x.astype(jnp.float32), axis=-1)[None, :]   # (1, tile_q)
    sig_sum_ref[...] += jnp.sum(s.astype(jnp.float32), axis=-1)[None, :]            # (1, tile_q)
    tgt_sum_ref[...] += jnp.sum(tgt.astype(jnp.float32), axis=-1, keepdims=True)    # (T, 1)

    # Contraction over the shared last (point) axis; outputs are (T, tile_q) -> queries on lanes.
    s_mm = s.astype(x.dtype)    # MXU takes bf16 natively; accumulate in f32
    acc_mask_ref[...] += lax.dot_general(tgt, x, dn, preferred_element_type=jnp.float32)
    acc_dice_ref[...] += lax.dot_general(tgt, s_mm, dn, preferred_element_type=jnp.float32)

    @pl.when(k == n_k - 1)
    def _finalize():
        # --- cost_mask^T * n_points = rowsum(softplus(x)) - tgt @ x^T ---
        cost_mask_t_unnorm = sp_sum_ref[...] - acc_mask_ref[...]       # (T, tile_q)
        # --- cost_dice^T ---
        denom = sig_sum_ref[...] + tgt_sum_ref[...] + 1.0              # (T, tile_q)
        cost_dice_t = 1.0 - (2.0 * acc_dice_ref[...] + 1.0) / denom
        out_ref[0] += w_mask_n * cost_mask_t_unnorm + w_dice * cost_dice_t


def hungarian_cost_matrices_t(cost_weight, pred_labels, pred_masks, tgt_masks, tgt_onehot,
                              tile_n=None, tile_q=None, vmem_budget_bytes=24 * 1024 * 1024):
    """Returns TRANSPOSED per-batch cost matrices C^T of shape (B, T, n_q).

    Same cost values as the torch HungarianMatcher forward (which builds C of shape (n_q, T));
    the transpose is emitted on purpose (lane-dense output) — linear_sum_assignment on the host
    simply swaps the returned row/col index arrays.
    """
    B, n_q, C = pred_labels.shape
    _, _, N = pred_masks.shape
    _, T, _ = tgt_masks.shape

    # --- query tiling (parallel axis; lets v7x's 2 TensorCores split work) ---
    if tile_q is None:
        tile_q = next((t for t in (256, 128) if n_q % t == 0), n_q)
    assert n_q % tile_q == 0, "tile_q must divide n_q"

    # --- point tiling derived from a VMEM budget (double-buffered bf16 pmask+tmask dominate) ---
    if tile_n is None:
        per_point_bytes = 2 * (tile_q + T) * 2          # 2 buffers x (tile_q + T) rows x bf16
        tile_n = (vmem_budget_bytes // per_point_bytes) // 128 * 128
        tile_n = int(max(128, min(tile_n, 8192)))
    assert tile_n % 128 == 0, "tile_n must be a multiple of 128"
    tile_n = min(tile_n, _ceil_to(N, 128))
    n_pad = _ceil_to(N, tile_n)
    n_k = n_pad // tile_n

    # --- bf16 HBM streams; pad the point axis so it always pipelines (padded points are inert) ---
    pm = pred_masks.astype(jnp.bfloat16)
    tm = tgt_masks.astype(jnp.bfloat16)
    if n_pad != N:
        pad = n_pad - N
        pm = jnp.pad(pm, ((0, 0), (0, 0), (0, pad)), constant_values=_PAD_LOGIT)
        tm = jnp.pad(tm, ((0, 0), (0, 0), (0, pad)), constant_values=0.0)

    # Fold 1/n_points (the REAL, un-padded N) into the mask weight once, outside the kernel.
    cw = (jnp.asarray(cost_weight, dtype=jnp.float32)
          * jnp.asarray([1.0, 1.0 / float(N), 1.0], dtype=jnp.float32))

    c_t = pl.pallas_call(
        _matcher_cost_kernel,
        out_shape=jax.ShapeDtypeStruct((B, T, n_q), jnp.float32),
        grid=(B, n_q // tile_q, n_k),
        in_specs=[
            pl.BlockSpec(memory_space=pltpu.MemorySpace.SMEM),               # cost weights (3,)
            pl.BlockSpec((1, tile_q, C), lambda b, q, k: (b, q, 0)),         # class logits
            pl.BlockSpec((1, tile_q, tile_n), lambda b, q, k: (b, q, k)),    # mask logits (N-tile)
            pl.BlockSpec((1, T, tile_n), lambda b, q, k: (b, 0, k)),         # gt masks    (N-tile)
            pl.BlockSpec((1, T, C), lambda b, q, k: (b, 0, 0)),              # gt one-hot
        ],
        out_specs=pl.BlockSpec((1, T, tile_q), lambda b, q, k: (b, 0, q)),   # resident across k
        scratch_shapes=[
            pltpu.VMEM((T, tile_q), jnp.float32),   # acc_mask
            pltpu.VMEM((T, tile_q), jnp.float32),   # acc_dice
            pltpu.VMEM((1, tile_q), jnp.float32),   # softplus row-sums
            pltpu.VMEM((1, tile_q), jnp.float32),   # sigmoid row-sums
            pltpu.VMEM((T, 1), jnp.float32),        # target row-sums
        ],
        compiler_params=pltpu.CompilerParams(
            dimension_semantics=("parallel", "parallel", "arbitrary"),
            vmem_limit_bytes=48 * 1024 * 1024),      # > default scoped limits, headroom on v7x
    )(cw, pred_labels.astype(jnp.float32), pm, tm, tgt_onehot.astype(jnp.float32))

    return c_t


def _reference_cost(cost_weight, pred_labels, pred_masks, tgt_masks, tgt_onehot):
    """Plain-JAX reproduction of the PyTorch forward (per batch), shape (B, n_q, T)."""
    outs = []
    for b in range(pred_labels.shape[0]):
        probs = jax.nn.softmax(pred_labels[b], axis=-1)
        cost_class = -(probs @ tgt_onehot[b].T)
        x, tgt = pred_masks[b], tgt_masks[b]
        n_points = x.shape[-1]
        pos = jax.nn.softplus(-x)
        neg = jax.nn.softplus(x)
        cost_mask = (pos @ tgt.T + neg @ (1.0 - tgt).T) / n_points
        sig = jax.nn.sigmoid(x)
        cost_dice = 1.0 - (2.0 * (sig @ tgt.T) + 1.0) / (
            sig.sum(-1)[:, None] + tgt.sum(-1)[None, :] + 1.0)
        outs.append(cost_weight[0] * cost_class
                    + cost_weight[1] * cost_mask
                    + cost_weight[2] * cost_dice)
    return jnp.stack(outs, axis=0)


if __name__ == "__main__":
    key = jax.random.PRNGKey(0)
    # Small but representative: n_q on lanes (128); N=250 is NOT a multiple of 128, so the
    # padding + 2-tile accumulation paths are both exercised (tile_n=128 -> n_pad=256, n_k=2).
    B, n_q, num_classes, N, T = 2, 128, 19, 250, 8

    k1, k2, k3, k4 = jax.random.split(key, 4)
    pred_labels = jax.random.normal(k1, (B, n_q, num_classes), dtype=jnp.float32)
    pred_masks = jax.random.normal(k2, (B, n_q, N), dtype=jnp.float32) * 3.0
    tgt_masks = (jax.random.uniform(k3, (B, T, N)) > 0.5).astype(jnp.float32)
    tgt_idx = jax.random.randint(k4, (B, T), 0, num_classes)
    tgt_onehot = jax.nn.one_hot(tgt_idx, num_classes, dtype=jnp.float32)

    # deterministic "parameter" init: the registered cost_weight buffer
    cost_weight = jnp.asarray([0.5, 1.0, 1.0], dtype=jnp.float32)

    C_t = hungarian_cost_matrices_t(cost_weight, pred_labels, pred_masks, tgt_masks, tgt_onehot,
                                    tile_n=128)
    C_t = jax.block_until_ready(C_t)

    # Reference on the SAME bf16-quantized mask logits (tgt masks are exact 0/1 in bf16).
    pm_ref = pred_masks.astype(jnp.bfloat16).astype(jnp.float32)
    C_ref = _reference_cost(cost_weight, pred_labels, pm_ref, tgt_masks, tgt_onehot)

    np.testing.assert_allclose(np.asarray(C_t), np.asarray(C_ref).swapaxes(1, 2),
                               rtol=2e-2, atol=2e-2)
    assert np.isfinite(np.asarray(C_t)).all()

    print("KERNEL_OK")
</pallas_src>

<mosaic_0001>
module attributes {stable_mosaic.version = 11 : i64} {
  func.func @_matcher_cost_kernel(%arg0: i32, %arg1: i32, %arg2: i32, %arg3: memref<3xf32, #tpu.memory_space<smem>>, %arg4: memref<1x128x19xf32, #tpu.memory_space<vmem>>, %arg5: memref<1x128x128xbf16, #tpu.memory_space<vmem>>, %arg6: memref<1x8x128xbf16, #tpu.memory_space<vmem>>, %arg7: memref<1x8x19xf32, #tpu.memory_space<vmem>>, %arg8: memref<1x8x128xf32, #tpu.memory_space<vmem>>, %arg9: memref<8x128xf32, #tpu.memory_space<vmem>>, %arg10: memref<8x128xf32, #tpu.memory_space<vmem>>, %arg11: memref<1x128xf32, #tpu.memory_space<vmem>>, %arg12: memref<1x128xf32, #tpu.memory_space<vmem>>, %arg13: memref<8x1xf32, #tpu.memory_space<vmem>>) attributes {dimension_semantics = [#tpu.dimension_semantics<parallel>, #tpu.dimension_semantics<parallel>, #tpu.dimension_semantics<arbitrary>], iteration_bounds = array<i64: 2, 1, 2>, scalar_prefetch = 0 : i64, scratch_operands = 5 : i64, tpu.core_type = #tpu.core_type<tc>, window_params = [{transform_indices = @transform_0, window_bounds = array<i64: 3>}, {transform_indices = @transform_1, window_bounds = array<i64: 1, 128, 19>}, {transform_indices = @transform_2, window_bounds = array<i64: 1, 128, 128>}, {transform_indices = @transform_3, window_bounds = array<i64: 1, 8, 128>}, {transform_indices = @transform_4, window_bounds = array<i64: 1, 8, 19>}, {transform_indices = @transform_5, window_bounds = array<i64: 1, 8, 128>}]} {
    %c0 = arith.constant 0 : index
    %0 = memref.load %arg3[%c0] : memref<3xf32, #tpu.memory_space<smem>>
    %c1 = arith.constant 1 : index
    %1 = memref.load %arg3[%c1] : memref<3xf32, #tpu.memory_space<smem>>
    %c2 = arith.constant 2 : index
    %2 = memref.load %arg3[%c2] : memref<3xf32, #tpu.memory_space<smem>>
    %c0_i32 = arith.constant 0 : i32
    %3 = arith.cmpi eq, %arg2, %c0_i32 : i32
    %4 = arith.extui %3 : i1 to i32
    %c0_i32_0 = arith.constant 0 : i32
    %5 = arith.cmpi ne, %4, %c0_i32_0 : i32
    scf.if %5 {
      %cst_35 = arith.constant 0.000000e+00 : f32
      %50 = vector.broadcast %cst_35 : f32 to vector<8x128xf32>
      %c0_36 = arith.constant 0 : index
      %c0_37 = arith.constant 0 : index
      %51 = vector.load %arg9[%c0_36, %c0_37] : memref<8x128xf32, #tpu.memory_space<vmem>>, vector<8x128xf32>
      tpu.vector_store %arg9[%c0_36, %c0_37], %50 {strides = array<i32>} : memref<8x128xf32, #tpu.memory_space<vmem>>, vector<8x128xf32>,
      %cst_38 = arith.constant 0.000000e+00 : f32
      %52 = vector.broadcast %cst_38 : f32 to vector<8x128xf32>
      %c0_39 = arith.constant 0 : index
      %c0_40 = arith.constant 0 : index
      %53 = vector.load %arg10[%c0_39, %c0_40] : memref<8x128xf32, #tpu.memory_space<vmem>>, vector<8x128xf32>
      tpu.vector_store %arg10[%c0_39, %c0_40], %52 {strides = array<i32>} : memref<8x128xf32, #tpu.memory_space<vmem>>, vector<8x128xf32>,
      %cst_41 = arith.constant 0.000000e+00 : f32
      %54 = vector.broadcast %cst_41 : f32 to vector<1x128xf32>
      %c0_42 = arith.constant 0 : index
      %c0_43 = arith.constant 0 : index
      %55 = vector.load %arg11[%c0_42, %c0_43] : memref<1x128xf32, #tpu.memory_space<vmem>>, vector<1x128xf32>
      tpu.vector_store %arg11[%c0_42, %c0_43], %54 {strides = array<i32>} : memref<1x128xf32, #tpu.memory_space<vmem>>, vector<1x128xf32>,
      %cst_44 = arith.constant 0.000000e+00 : f32
      %56 = vector.broadcast %cst_44 : f32 to vector<1x128xf32>
      %c0_45 = arith.constant 0 : index
      %c0_46 = arith.constant 0 : index
      %57 = vector.load %arg12[%c0_45, %c0_46] : memref<1x128xf32, #tpu.memory_space<vmem>>, vector<1x128xf32>
      tpu.vector_store %arg12[%c0_45, %c0_46], %56 {strides = array<i32>} : memref<1x128xf32, #tpu.memory_space<vmem>>, vector<1x128xf32>,
      %cst_47 = arith.constant 0.000000e+00 : f32
      %58 = vector.broadcast %cst_47 : f32 to vector<8x1xf32>
      %c0_48 = arith.constant 0 : index
      %c0_49 = arith.constant 0 : index
      %59 = vector.load %arg13[%c0_48, %c0_49] : memref<8x1xf32, #tpu.memory_space<vmem>>, vector<8x1xf32>
      tpu.vector_store %arg13[%c0_48, %c0_49], %58 {strides = array<i32>} : memref<8x1xf32, #tpu.memory_space<vmem>>, vector<8x1xf32>,
      %c0_50 = arith.constant 0 : index
      %c0_51 = arith.constant 0 : index
      %c0_52 = arith.constant 0 : index
      %60 = vector.load %arg4[%c0_50, %c0_51, %c0_52] : memref<1x128x19xf32, #tpu.memory_space<vmem>>, vector<1x128x19xf32>
      %61 = vector.shape_cast %60 : vector<1x128x19xf32> to vector<128x19xf32>
      %c0_53 = arith.constant 0 : index
      %c0_54 = arith.constant 0 : index
      %c0_55 = arith.constant 0 : index
      %62 = vector.load %arg7[%c0_53, %c0_54, %c0_55] : memref<1x8x19xf32, #tpu.memory_space<vmem>>, vector<1x8x19xf32>
      %63 = vector.shape_cast %62 : vector<1x8x19xf32> to vector<8x19xf32>
      %cst_56 = arith.constant dense<0xFF800000> : vector<128xf32>
      %64 = vector.multi_reduction <maximumf>, %61, %cst_56 [1] : vector<128x19xf32> to vector<128xf32>
      %65 = vector.shape_cast %64 : vector<128xf32> to vector<128x1xf32>
      %66 = vector.broadcast %65 : vector<128x1xf32> to vector<128x19xf32>
      %67 = arith.subf %61, %66 : vector<128x19xf32>
      %68 = math.exp %67 : vector<128x19xf32>
      %cst_57 = arith.constant dense<0.000000e+00> : vector<128xf32>
      %69 = vector.multi_reduction <add>, %68, %cst_57 [1] : vector<128x19xf32> to vector<128xf32>
      %70 = vector.shape_cast %69 : vector<128xf32> to vector<128x1xf32>
      %71 = vector.broadcast %70 : vector<128x1xf32> to vector<128x19xf32>
      %72 = arith.divf %68, %71 : vector<128x19xf32>
      %cst_58 = arith.constant dense<0.000000e+00> : vector<8x128xf32>
      %73 = tpu.matmul %63, %72, %cst_58 {dimension_numbers = #tpu.dot_dimension_numbers<[1], [1], [0], [0], [0, 0, 1, 0], [], []>} : vector<8x19xf32>, vector<128x19xf32>, vector<8x128xf32> -> vector<8x128xf32>
      %cst_59 = arith.constant 0.000000e+00 : f32
      %74 = vector.broadcast %cst_59 : f32 to vector<8x128xf32>
      %75 = arith.subf %74, %73 : vector<8x128xf32>
      %76 = vector.broadcast %0 : f32 to vector<8x128xf32>
      %77 = arith.mulf %76, %75 : vector<8x128xf32>
      %c0_60 = arith.constant 0 : index
      %c0_61 = arith.constant 0 : index
      %c0_62 = arith.constant 0 : index
      %78 = vector.load %arg8[%c0_60, %c0_61, %c0_62] : memref<1x8x128xf32, #tpu.memory_space<vmem>>, vector<1x8x128xf32>
      %79 = vector.shape_cast %78 : vector<1x8x128xf32> to vector<8x128xf32>
      %80 = vector.shape_cast %77 : vector<8x128xf32> to vector<1x8x128xf32>
      tpu.vector_store %arg8[%c0_60, %c0_61, %c0_62], %80 {strides = array<i32>} : memref<1x8x128xf32, #tpu.memory_space<vmem>>, vector<1x8x128xf32>,
    } else {
    }
    %c0_1 = arith.constant 0 : index
    %c0_2 = arith.constant 0 : index
    %c0_3 = arith.constant 0 : index
    %6 = vector.load %arg5[%c0_1, %c0_2, %c0_3] : memref<1x128x128xbf16, #tpu.memory_space<vmem>>, vector<1x128x128xbf16>
    %7 = vector.shape_cast %6 : vector<1x128x128xbf16> to vector<128x128xbf16>
    %c0_4 = arith.constant 0 : index
    %c0_5 = arith.constant 0 : index
    %c0_6 = arith.constant 0 : index
    %8 = vector.load %arg6[%c0_4, %c0_5, %c0_6] : memref<1x8x128xbf16, #tpu.memory_space<vmem>>, vector<1x8x128xbf16>
    %9 = vector.shape_cast %8 : vector<1x8x128xbf16> to vector<8x128xbf16>
    %10 = arith.negf %7 : vector<128x128xbf16>
    %11 = math.exp %10 : vector<128x128xbf16>
    %cst = arith.constant 1.000000e+00 : bf16
    %12 = vector.broadcast %cst : bf16 to vector<128x128xbf16>
    %13 = arith.addf %12, %11 : vector<128x128xbf16>
    %14 = arith.divf %12, %13 : vector<128x128xbf16>
    %cst_7 = arith.constant 9.991700e-38 : bf16
    %15 = vector.broadcast %cst_7 : bf16 to vector<128x128xbf16>
    %16 = arith.maximumf %14, %15 : vector<128x128xbf16>
    %17 = math.log %16 : vector<128x128xbf16>
    %18 = arith.subf %7, %17 : vector<128x128xbf16>
    %cst_8 = arith.constant 0.000000e+00 : bf16
    %19 = vector.broadcast %cst_8 : bf16 to vector<128x128xbf16>
    %20 = arith.maximumf %18, %19 : vector<128x128xbf16>
    %c0_9 = arith.constant 0 : index
    %c0_10 = arith.constant 0 : index
    %21 = vector.load %arg11[%c0_9, %c0_10] : memref<1x128xf32, #tpu.memory_space<vmem>>, vector<1x128xf32>
    %22 = arith.extf %20 : vector<128x128xbf16> to vector<128x128xf32>
    %cst_11 = arith.constant dense<0.000000e+00> : vector<128xf32>
    %23 = vector.multi_reduction <add>, %22, %cst_11 [1] : vector<128x128xf32> to vector<128xf32>
    %24 = vector.shape_cast %23 : vector<128xf32> to vector<1x128xf32>
    %25 = arith.addf %21, %24 : vector<1x128xf32>
    %c0_12 = arith.constant 0 : index
    %c0_13 = arith.constant 0 : index
    %26 = vector.load %arg11[%c0_12, %c0_13] : memref<1x128xf32, #tpu.memory_space<vmem>>, vector<1x128xf32>
    tpu.vector_store %arg11[%c0_12, %c0_13], %25 {strides = array<i32>} : memref<1x128xf32, #tpu.memory_space<vmem>>, vector<1x128xf32>,
    %c0_14 = arith.constant 0 : index
    %c0_15 = arith.constant 0 : index
    %27 = vector.load %arg12[%c0_14, %c0_15] : memref<1x128xf32, #tpu.memory_space<vmem>>, vector<1x128xf32>
    %28 = arith.extf %14 : vector<128x128xbf16> to vector<128x128xf32>
    %cst_16 = arith.constant dense<0.000000e+00> : vector<128xf32>
    %29 = vector.multi_reduction <add>, %28, %cst_16 [1] : vector<128x128xf32> to vector<128xf32>
    %30 = vector.shape_cast %29 : vector<128xf32> to vector<1x128xf32>
    %31 = arith.addf %27, %30 : vector<1x128xf32>
    %c0_17 = arith.constant 0 : index
    %c0_18 = arith.constant 0 : index
    %32 = vector.load %arg12[%c0_17, %c0_18] : memref<1x128xf32, #tpu.memory_space<vmem>>, vector<1x128xf32>
    tpu.vector_store %arg12[%c0_17, %c0_18], %31 {strides = array<i32>} : memref<1x128xf32, #tpu.memory_space<vmem>>, vector<1x128xf32>,
    %c0_19 = arith.constant 0 : index
    %c0_20 = arith.constant 0 : index
    %33 = vector.load %arg13[%c0_19, %c0_20] : memref<8x1xf32, #tpu.memory_space<vmem>>, vector<8x1xf32>
    %34 = arith.extf %9 : vector<8x128xbf16> to vector<8x128xf32>
    %cst_21 = arith.constant dense<0.000000e+00> : vector<8xf32>
    %35 = vector.multi_reduction <add>, %34, %cst_21 [1] : vector<8x128xf32> to vector<8xf32>
    %36 = vector.shape_cast %35 : vector<8xf32> to vector<8x1xf32>
    %37 = arith.addf %33, %36 : vector<8x1xf32>
    %c0_22 = arith.constant 0 : index
    %c0_23 = arith.constant 0 : index
    %38 = vector.load %arg13[%c0_22, %c0_23] : memref<8x1xf32, #tpu.memory_space<vmem>>, vector<8x1xf32>
    tpu.vector_store %arg13[%c0_22, %c0_23], %37 {strides = array<i32>} : memref<8x1xf32, #tpu.memory_space<vmem>>, vector<8x1xf32>,
    %c0_24 = arith.constant 0 : index
    %c0_25 = arith.constant 0 : index
    %39 = vector.load %arg9[%c0_24, %c0_25] : memref<8x128xf32, #tpu.memory_space<vmem>>, vector<8x128xf32>
    %cst_26 = arith.constant dense<0.000000e+00> : vector<8x128xf32>
    %40 = tpu.matmul %9, %7, %cst_26 {dimension_numbers = #tpu.dot_dimension_numbers<[1], [1], [0], [0], [0, 0, 1, 0], [], []>} : vector<8x128xbf16>, vector<128x128xbf16>, vector<8x128xf32> -> vector<8x128xf32>
    %41 = arith.addf %39, %40 : vector<8x128xf32>
    %c0_27 = arith.constant 0 : index
    %c0_28 = arith.constant 0 : index
    %42 = vector.load %arg9[%c0_27, %c0_28] : memref<8x128xf32, #tpu.memory_space<vmem>>, vector<8x128xf32>
    tpu.vector_store %arg9[%c0_27, %c0_28], %41 {strides = array<i32>} : memref<8x128xf32, #tpu.memory_space<vmem>>, vector<8x128xf32>,
    %c0_29 = arith.constant 0 : index
    %c0_30 = arith.constant 0 : index
    %43 = vector.load %arg10[%c0_29, %c0_30] : memref<8x128xf32, #tpu.memory_space<vmem>>, vector<8x128xf32>
    %cst_31 = arith.constant dense<0.000000e+00> : vector<8x128xf32>
    %44 = tpu.matmul %9, %14, %cst_31 {dimension_numbers = #tpu.dot_dimension_numbers<[1], [1], [0], [0], [0, 0, 1, 0], [], []>} : vector<8x128xbf16>, vector<128x128xbf16>, vector<8x128xf32> -> vector<8x128xf32>
    %45 = arith.addf %43, %44 : vector<8x128xf32>
    %c0_32 = arith.constant 0 : index
    %c0_33 = arith.constant 0 : index
    %46 = vector.load %arg10[%c0_32, %c0_33] : memref<8x128xf32, #tpu.memory_space<vmem>>, vector<8x128xf32>
    tpu.vector_store %arg10[%c0_32, %c0_33], %45 {strides = array<i32>} : memref<8x128xf32, #tpu.memory_space<vmem>>, vector<8x128xf32>,
    %c1_i32 = arith.constant 1 : i32
    %47 = arith.cmpi eq, %arg2, %c1_i32 : i32
    %48 = arith.extui %47 : i1 to i32
    %c0_i32_34 = arith.constant 0 : i32
    %49 = arith.cmpi ne, %48, %c0_i32_34 : i32
    scf.if %49 {
      %c0_35 = arith.constant 0 : index
      %c0_36 = arith.constant 0 : index
      %50 = vector.load %arg11[%c0_35, %c0_36] : memref<1x128xf32, #tpu.memory_space<vmem>>, vector<1x128xf32>
      %c0_37 = arith.constant 0 : index
      %c0_38 = arith.constant 0 : index
      %51 = vector.load %arg9[%c0_37, %c0_38] : memref<8x128xf32, #tpu.memory_space<vmem>>, vector<8x128xf32>
      %52 = vector.broadcast %50 : vector<1x128xf32> to vector<8x128xf32>
      %53 = arith.subf %52, %51 : vector<8x128xf32>
      %c0_39 = arith.constant 0 : index
      %c0_40 = arith.constant 0 : index
      %54 = vector.load %arg12[%c0_39, %c0_40] : memref<1x128xf32, #tpu.memory_space<vmem>>, vector<1x128xf32>
      %c0_41 = arith.constant 0 : index
      %c0_42 = arith.constant 0 : index
      %55 = vector.load %arg13[%c0_41, %c0_42] : memref<8x1xf32, #tpu.memory_space<vmem>>, vector<8x1xf32>
      %56 = vector.broadcast %54 : vector<1x128xf32> to vector<8x128xf32>
      %57 = vector.broadcast %55 : vector<8x1xf32> to vector<8x128xf32>
      %58 = arith.addf %56, %57 : vector<8x128xf32>
      %cst_43 = arith.constant 1.000000e+00 : f32
      %59 = vector.broadcast %cst_43 : f32 to vector<8x128xf32>
      %60 = arith.addf %58, %59 : vector<8x128xf32>
      %c0_44 = arith.constant 0 : index
      %c0_45 = arith.constant 0 : index
      %61 = vector.load %arg10[%c0_44, %c0_45] : memref<8x128xf32, #tpu.memory_space<vmem>>, vector<8x128xf32>
      %cst_46 = arith.constant 2.000000e+00 : f32
      %62 = vector.broadcast %cst_46 : f32 to vector<8x128xf32>
      %63 = arith.mulf %62, %61 : vector<8x128xf32>
      %cst_47 = arith.constant 1.000000e+00 : f32
      %64 = vector.broadcast %cst_47 : f32 to vector<8x128xf32>
      %65 = arith.addf %63, %64 : vector<8x128xf32>
      %66 = arith.divf %65, %60 : vector<8x128xf32>
      %cst_48 = arith.constant 1.000000e+00 : f32
      %67 = vector.broadcast %cst_48 : f32 to vector<8x128xf32>
      %68 = arith.subf %67, %66 : vector<8x128xf32>
      %c0_49 = arith.constant 0 : index
      %c0_50 = arith.constant 0 : index
      %c0_51 = arith.constant 0 : index
      %69 = vector.load %arg8[%c0_49, %c0_50, %c0_51] : memref<1x8x128xf32, #tpu.memory_space<vmem>>, vector<1x8x128xf32>
      %70 = vector.shape_cast %69 : vector<1x8x128xf32> to vector<8x128xf32>
      %71 = vector.broadcast %1 : f32 to vector<8x128xf32>
      %72 = arith.mulf %71, %53 : vector<8x128xf32>
      %73 = vector.broadcast %2 : f32 to vector<8x128xf32>
      %74 = arith.mulf %73, %68 : vector<8x128xf32>
      %75 = arith.addf %72, %74 : vector<8x128xf32>
      %76 = arith.addf %70, %75 : vector<8x128xf32>
      %c0_52 = arith.constant 0 : index
      %c0_53 = arith.constant 0 : index
      %c0_54 = arith.constant 0 : index
      %77 = vector.load %arg8[%c0_52, %c0_53, %c0_54] : memref<1x8x128xf32, #tpu.memory_space<vmem>>, vector<1x8x128xf32>
      %78 = vector.shape_cast %77 : vector<1x8x128xf32> to vector<8x128xf32>
      %79 = vector.shape_cast %76 : vector<8x128xf32> to vector<1x8x128xf32>
      tpu.vector_store %arg8[%c0_52, %c0_53, %c0_54], %79 {strides = array<i32>} : memref<1x8x128xf32, #tpu.memory_space<vmem>>, vector<1x8x128xf32>,
    } else {
    }
    return
  }
  func.func @transform_0(%arg0: i32, %arg1: i32, %arg2: i32) -> i32 {
    %c0_i32 = arith.constant 0 : i32
    %c0_i32_0 = arith.constant 0 : i32
    return %c0_i32 : i32
  }
  func.func @transform_1(%arg0: i32, %arg1: i32, %arg2: i32) -> (i32, i32, i32) {
    %c0_i32 = arith.constant 0 : i32
    %c0_i32_0 = arith.constant 0 : i32
    return %arg0, %arg1, %c0_i32 : i32, i32, i32
  }
  func.func @transform_2(%arg0: i32, %arg1: i32, %arg2: i32) -> (i32, i32, i32) {
    %c0_i32 = arith.constant 0 : i32
    return %arg0, %arg1, %arg2 : i32, i32, i32
  }
  func.func @transform_3(%arg0: i32, %arg1: i32, %arg2: i32) -> (i32, i32, i32) {
    %c0_i32 = arith.constant 0 : i32
    %c0_i32_0 = arith.constant 0 : i32
    return %arg0, %c0_i32, %arg2 : i32, i32, i32
  }
  func.func @transform_4(%arg0: i32, %arg1: i32, %arg2: i32) -> (i32, i32, i32) {
    %c0_i32 = arith.constant 0 : i32
    %c0_i32_0 = arith.constant 0 : i32
    %c0_i32_1 = arith.constant 0 : i32
    return %arg0, %c0_i32, %c0_i32_0 : i32, i32, i32
  }
  func.func @transform_5(%arg0: i32, %arg1: i32, %arg2: i32) -> (i32, i32, i32) {
    %c0_i32 = arith.constant 0 : i32
    %c0_i32_0 = arith.constant 0 : i32
    return %arg0, %c0_i32, %arg1 : i32, i32, i32
  }
}

</mosaic_0001>

<bundles_post_ra>
// kernel: tpu_custom_call.1
= control target key start
LH: loop header
LB: loop body
LE: loop exit
PB: predicated region body
PF: predicated region fallthrough
CT: control target
= control target key end

     0   :  { %s4370_s0 = inlined_call_operand.vmem [shape: f32[3], index: 0, kind: input, shape index: {}]   ;;  %s4371_s1 = inlined_call_operand.vmem [shape: f32[2,128,19], index: 1, kind: input, shape index: {}]   ;;  %s4372_s2 = inlined_call_operand.vmem [shape: bf16[2,128,256], index: 2, kind: input, shape index: {}]   ;;  %s4373_s3 = inlined_call_operand.vmem [shape: bf16[2,8,256], index: 3, kind: input, shape index: {}]   ;;  %s4374_s4 = inlined_call_operand.vmem [shape: f32[2,8,19], index: 4, kind: input, shape index: {}]   ;;  %s4375_s5 = inlined_call_operand.hbm [shape: f32[2,8,128], index: 5, kind: output, shape index: {}]  }
   0x1   :  { %4384 = sst [smem:[#allocation23_spill]] %s4370_s0 }
   0x2   :  { %4385 = sst [smem:[#allocation24_spill]] %s4372_s2 }
   0x3   :  { %10 = vsyncpa [#allocation9], 0 }
   0x4   :  { %11 = vsyncpa [#allocation8], 0 }
   0x5   :  { %13 = vsyncpa [#allocation8 + $0x1], 0  ;;  %s3185_s18 = smov 0   ;;  %s3187_s19 = smov 0  }
   0x6   :  { %s3189_s20 = smov 0   ;;  %s3191_s21 = smov 0  }
   0x7   :  { %s3193_s22 = smov 0   ;;  %s3195_s23 = smov 0  }
   0x8   :  { %s3197_s24 = smov 0   ;;  %s3199_s25 = smov 0  }
   0x9   :  { %s3201_s26 = smov 0   ;;  %s3203_s27 = smov 0  }
   0xa LB: > { %4386 = sst [smem:[#allocation14_spill]] %s3120_s20  ;;  %s2634_s28 = sadd.s32 4294967295, %s3148_s27   ;;  %s3148_s27 = sphi %s3203_s27, %s19_s27   ;;  %s3144_s26 = sphi %s3201_s26, %s4445_s26   ;;  %s3140_s25 = sphi %s3199_s25, %s4444_s25   ;;  %s3136_s24 = sphi %s3197_s24, %s4443_s24   ;;  %s3132_s23 = sphi %s3195_s23, %s4442_s23   ;;  %s3128_s22 = sphi %s3193_s22, %s4441_s22   ;;  %s3124_s21 = sphi %s3191_s21, %s4440_s21   ;;  %s3120_s20 = sphi %s3189_s20, %s4439_s20   ;;  %s3116_s19 = sphi %s3187_s19, %s4447_s19   ;;  %s3112_s18 = sphi %s3185_s18, %s4446_s18  }
   0xb   : > { %4387 = sst [smem:[#allocation15_spill]] %s3128_s22  ;;  %s2635_s29 = sadd.s32 4294967294, %s3148_s27  }
   0xc   : > { %4388 = sst [smem:[#allocation16_spill]] %s3140_s25  ;;  %s31_s30 = sadd.s32 1, %s3140_s25 }
   0xd   : > { %4389 = sst [smem:[#allocation17_spill]] %s3144_s26  ;;  %s38_s6 = sadd.s32 1, %s3144_s26 }
   0xe   : > { %p32_p0 = scmp.ge.s32.totalorder %s31_s30, 2  ;;  %s98_s7 = sadd.s32 1, %s3128_s22 }
   0xf   : > { %p105_p1 = scmp.ne.s32.totalorder %s3128_s22, %s3124_s21  ;;  %p106_p2 = scmp.eq.s32.totalorder %s3148_s27, 0 }
  0x10   : > { %s4449_s30 = smov (%p32_p0, %s31_s30), 0  ;;  %s4451_s6 = smov (!%p32_p0, %s38_s6), %s3144_s26 }
  0x11   : > { %4390 = sst [smem:[#allocation18_spill]] %s4449_s30  ;;  %s94_s8 = ssub.s32 %s3140_s25, %s4449_s30 }
  0x12   : > { %p3248_p3 = por %p106_p2, %p105_p1  ;;  %p40_p4 = scmp.ge.s32.totalorder %s4451_s6, 2 }
  0x13   : > { %s180_s10 = sadd.s32 1, %s3120_s20  ;;  %p190_p5 = scmp.ne.s32.totalorder %s3120_s20, %s3116_s19 }
  0x14   : > { %p191_p6 = scmp.eq.s32.totalorder %s2634_s28, 3  ;;  %s4453_s6 = smov (%p40_p4, %s4451_s6), 0 }
  0x15   : > { %4392 = sst [smem:[#allocation19_spill]] %s4453_s6  ;;  %p196_p8 = scmp.ne.s32.totalorder %s3116_s19, %s3112_s18 }
  0x16   : > { %p3257_p7 = por %p191_p6, %p190_p5  ;;  %s91_s12 = ssub.s32 %s3144_s26, %s4453_s6 }
  0x17   : > { %p197_p9 = scmp.eq.s32.totalorder %s2635_s29, 3  ;;  %s95_s13 = sor.u32 %s94_s8, %s91_s12 }
  0x18   : > { %p178_p10 = scmp.eq.s32.totalorder %s91_s12, 0  ;;  %p96_p11 = scmp.eq.s32.totalorder %s95_s13, 0 }
  0x19   : > { %p3265_p12 = por %p197_p9, %p196_p8  ;;  %p2636_p13 = scmp.ge.s32.totalorder %s3148_s27, 1 }
  0x1a   : > { %s3270_s15 = scalar_select %p178_p10, %s3120_s20, %s180_s10  }
  0x1b   : > { %s4394_s14 = scalar_select %p3265_p12, 1, 0 }
  0x1c   : > { %4396 = sst [smem:[#allocation21_spill]] %s3270_s15  ;;  %p204_p0 = scmp.lt.s32.totalorder %s3148_s27, 5 }
  0x1d   : > { %4395 = sst [smem:[#allocation20_spill]] %s4394_s14  ;;  %p3277_p1 = scmp.eq.s32.totalorder %s2634_s28, 0 }
  0x1e   : > { %s3273_s16 = scalar_select %p96_p11, %s3128_s22, %s98_s7  }
  0x1f   : > { %p3281_p2 = pnand %p2636_p13, %p204_p0  ;;  %s4400_s0 = sld [smem:[#allocation23_spill]] }
  0x20   : > { %4397 = sst [smem:[#allocation22_spill]] %s3273_s16  ;;  %s3150_s7 = smov [#allocation7]  }
  0x21   : > { %p2723_p4 = pneg %p3281_p2  ;;  %p2638_p6 = scmp.ge.s32.totalorder %s3148_s27, 4 }
  0x23   : > { %p2724_p5 = pnand %p3277_p1, %p2723_p4  ;;  %223 = sbr.rel (%p2638_p6) target bundleno = 66 (0x42), region = 20 }
  0x25   : > { %s216_s13 = sshll.u32 %s4400_s0, 4  ;;  %s217_s13 = int_to_ptr.vmem [resolvable:$true] %s216_s13 }
  0x26   : > { %2726 = dma.vmem_to_smem (!%p2724_p5), %s217_s13, 16, %s3150_s7, [#allocation9]  }
  0x28   : > { %239 = sbr.rel (!%p3248_p3) target bundleno = 66 (0x42), region = 28  ;;  %s241_s28 = sand.u32 (%p3248_p3), 1, %s3128_s22  }
  0x29   : > { %s2640_s10 = sshll.u32 (%p3248_p3), %s3144_s26, 5  ;;  %s2639_s8 = sshll.u32 (%p3248_p3), %s241_s28, 6 }
  0x2a   : > { %s248_s12 = sadd.s32 (%p3248_p3), %s3140_s25, %s2640_s10  ;;  %s4401_s2 = sld [smem:[#allocation24_spill]] (%p3248_p3) }
  0x2b   : > { %s2641_s0 = sshll.u32 (%p3248_p3), %s248_s12, 2  ;;  %s243_s9 = scalar_lea.vmem (%p3248_p3), [#allocation10], %s2639_s8 }
  0x30   : > { %s3301_s16 = scalar_lea.vmem %s4401_s2, %s2641_s0 }
  0x31   : > { %v267_v0 = vld [vmem:[%s3301_s16] sm:$0xf]  ;;  %v269_v1 = vld [vmem:[%s3301_s16 + $0x8] sm:$0xf]  ;;  %v271_v2 = vld [vmem:[%s3301_s16 + $0x10] sm:$0xf] }
  0x32   : > { %268 = vst [vmem:[%s243_s9] sm:$0xf] %v267_v0  ;;  %v273_v3 = vld [vmem:[%s3301_s16 + $0x18] sm:$0xf]  ;;  %v275_v4 = vld [vmem:[%s3301_s16 + $0x20] sm:$0xf] }
  0x33   : > { %270 = vst [vmem:[%s243_s9 + $0x4] sm:$0xf] %v269_v1  ;;  %v277_v5 = vld [vmem:[%s3301_s16 + $0x28] sm:$0xf]  ;;  %v279_v6 = vld [vmem:[%s3301_s16 + $0x30] sm:$0xf] }
  0x34   : > { %272 = vst [vmem:[%s243_s9 + $0x8] sm:$0xf] %v271_v2  ;;  %v281_v7 = vld [vmem:[%s3301_s16 + $0x38] sm:$0xf]  ;;  %v283_v8 = vld [vmem:[%s3301_s16 + $0x40] sm:$0xf] }
  0x35   : > { %274 = vst [vmem:[%s243_s9 + $0xc] sm:$0xf] %v273_v3  ;;  %v285_v9 = vld [vmem:[%s3301_s16 + $0x48] sm:$0xf]  ;;  %v287_v10 = vld [vmem:[%s3301_s16 + $0x50] sm:$0xf] }
  0x36   : > { %276 = vst [vmem:[%s243_s9 + $0x10] sm:$0xf] %v275_v4  ;;  %v289_v11 = vld [vmem:[%s3301_s16 + $0x58] sm:$0xf]  ;;  %v291_v12 = vld [vmem:[%s3301_s16 + $0x60] sm:$0xf] }
  0x37   : > { %278 = vst [vmem:[%s243_s9 + $0x14] sm:$0xf] %v277_v5  ;;  %v293_v13 = vld [vmem:[%s3301_s16 + $0x68] sm:$0xf]  ;;  %v295_v14 = vld [vmem:[%s3301_s16 + $0x70] sm:$0xf] }
  0x38   : > { %280 = vst [vmem:[%s243_s9 + $0x18] sm:$0xf] %v279_v6  ;;  %v297_v15 = vld [vmem:[%s3301_s16 + $0x78] sm:$0xf] }
  0x39   : > { %282 = vst [vmem:[%s243_s9 + $0x1c] sm:$0xf] %v281_v7 }
  0x3a   : > { %284 = vst [vmem:[%s243_s9 + $0x20] sm:$0xf] %v283_v8 }
  0x3b   : > { %286 = vst [vmem:[%s243_s9 + $0x24] sm:$0xf] %v285_v9 }
  0x3c   : > { %288 = vst [vmem:[%s243_s9 + $0x28] sm:$0xf] %v287_v10 }
  0x3d   : > { %290 = vst [vmem:[%s243_s9 + $0x2c] sm:$0xf] %v289_v11 }
  0x3e   : > { %292 = vst [vmem:[%s243_s9 + $0x30] sm:$0xf] %v291_v12 }
  0x3f   : > { %294 = vst [vmem:[%s243_s9 + $0x34] sm:$0xf] %v293_v13 }
  0x40   : > { %296 = vst [vmem:[%s243_s9 + $0x38] sm:$0xf] %v295_v14 }
  0x41   : > { %298 = vst [vmem:[%s243_s9 + $0x3c] sm:$0xf] %v297_v15 }
  0x42 PF: > { %375 = sbr.rel (%p3281_p2) target bundleno = 1596 (0x63c), region = 77 }
  0x47   : > { %3103 = dma.done.wait (%p3277_p1), [#allocation9], 16  }
  0x48   : > { %3105 = vsyncadd (%p3277_p1), [#allocation9], 4294967280  ;;  %s383_s0 = sand.u32 1, %s3124_s21  }
  0x49   : > { %s2644_s30 = sshll.u32 %s383_s0, 6 }
  0x4a   : > { %s3326_s6 = scalar_lea.vmem [#allocation10], %s2644_s30 }
  0x4b   : > { %389 = sfence }
  0x4c   : > { %s4380_s16 = sand.u32 1, %s3116_s19   ;;  %p433_p3 = scmp.lt.s32.totalorder %s3136_s24, 1 }
  0x4d   : > { %s2645_s29 = sshll.u32 %s4380_s16, 3  ;;  %p445_p8 = scmp.lt.s32.totalorder %s3132_s23, 1 }
  0x4e   : > { %s3333_s13 = sld [smem:[#allocation7]]  ;;  %s3356_s10 = scalar_lea.vmem [#allocation11], %s2645_s29 }
  0x4f   : > { %s434_s17 = scalar_select %p433_p3, %s3136_s24, 1 }
  0x50   : > { %s446_s7 = scalar_select %p445_p8, %s3132_s23, 1 }
  0x51   : > { %s2708_s21 = sshll.u32 %s434_s17, 7  ;;  %s2648_s28 = sshll.u32 %s434_s17, 1 }
  0x52   : > { %s3340_s12 = scalar_lea.vmem %s4371_s1, %s2708_s21  ;;  %s448_s9 = sadd.s32 %s2648_s28, %s446_s7 }
  0x53   : > { %s2649_s0 = sshll.u32 %s448_s9, 2  ;;  %s2650_s30 = sshll.u32 %s434_s17, 3 }
  0x54   : > { %s3345_s25 = scalar_lea.vmem %s4373_s3, %s2649_s0  ;;  %s3350_s15 = scalar_lea.vmem %s4374_s4, %s2650_s30 }
  0x55   : > { %s3352_s20 = sld [smem:[#allocation7 + $0x1]]  ;;  %p2653_p9 = scmp.ne.s32.totalorder %s3132_s23, 0 }
  0x56   : > { %s3354_s14 = sld [smem:[#allocation7 + $0x2]] }
  0x57   : > { %462 = sbr.rel (%p2653_p9) target bundleno = 627 (0x273), region = 89 }
  0x5c   : > { %v484_v16 = vld [vmem:[%s3340_s12 + $0x78] sm:$0xff]  ;;  %vm486_vm0 = vcmask 154624   ;;  %v482_v17 = vld [vmem:[%s3340_s12 + $0x68] sm:$0xff]  ;;  %v483_v22 = vld [vmem:[%s3340_s12 + $0x70] sm:$0xff]  ;;  %vm467_vm1 = vcmask 7168  }
  0x5d   : > { %v480_v18 = vld [vmem:[%s3340_s12 + $0x58] sm:$0xff]  ;;  %v532_v19 = vsel %vm486_vm0, %v484_v16, -inf  ;;  %v526_v20 = vsel %vm486_vm0, %v482_v17, -inf  ;;  %v481_v23 = vld [vmem:[%s3340_s12 + $0x60] sm:$0xff]  ;;  %v479_v24 = vld [vmem:[%s3340_s12 + $0x50] sm:$0xff]  ;;  %v529_v25 = vsel %vm486_vm0, %v483_v22, -inf }
  0x5e   : > { %v520_v21 = vsel %vm486_vm0, %v480_v18, -inf  ;;  %533 = vmax.xlane.f32.xlu0 %v532_v19  ;;  %527 = vmax.xlane.f32.xlu1 %v526_v20  ;;  %v523_v26 = vsel %vm486_vm0, %v481_v23, -inf  ;;  %v517_v27 = vsel %vm486_vm0, %v479_v24, -inf  ;;  %v3372_v28 = vld [vmem:[%s3340_s12 + $0x48] sm:$0xff]  ;;  %v3375_v29 = vld [vmem:[%s3340_s12 + $0x40] sm:$0xff]  ;;  %v3378_v30 = vld [vmem:[%s3340_s12 + $0x38] sm:$0xff] }
  0x5f   : > { %521 = vmax.xlane.f32.xlu2 %v520_v21  ;;  %v514_v31 = vsel %vm486_vm0, %v3372_v28, -inf  ;;  %v511_v32 = vsel %vm486_vm0, %v3375_v29, -inf  ;;  %v508_v33 = vsel %vm486_vm0, %v3378_v30, -inf  ;;  %v3387_v34 = vld [vmem:[%s3340_s12 + $0x30] sm:$0xff]  ;;  %v3390_v35 = vld [vmem:[%s3340_s12 + $0x28] sm:$0xff]  ;;  %v3393_v36 = vld [vmem:[%s3340_s12 + $0x20] sm:$0xff] }
  0x60   : > { %v505_v37 = vsel %vm486_vm0, %v3387_v34, -inf  ;;  %v502_v38 = vsel %vm486_vm0, %v3390_v35, -inf  ;;  %v499_v39 = vsel %vm486_vm0, %v3393_v36, -inf  ;;  %v3402_v40 = vld [vmem:[%s3340_s12 + $0x18] sm:$0xff]  ;;  %v3405_v41 = vld [vmem:[%s3340_s12 + $0x10] sm:$0xff]  ;;  %v3412_v44 = vld [vmem:[%s3340_s12 + $0x8] sm:$0xff] }
  0x61   : > { %v496_v42 = vsel %vm486_vm0, %v3402_v40, -inf  ;;  %v493_v43 = vsel %vm486_vm0, %v3405_v41, -inf  ;;  %v490_v45 = vsel %vm486_vm0, %v3412_v44, -inf  ;;  %v3425_v4 = vld [vmem:[%s3340_s12] sm:$0xff] }
  0x62   : > { %v487_v11 = vsel %vm486_vm0, %v3425_v4, -inf }
  0x66   : > { %530 = vmax.xlane.f32.xlu0 %v529_v25  ;;  %524 = vmax.xlane.f32.xlu1 %v523_v26 }
  0x67   : > { %518 = vmax.xlane.f32.xlu2 %v517_v27 }
  0x6e   : > { %515 = vmax.xlane.f32.xlu0 %v514_v31  ;;  %512 = vmax.xlane.f32.xlu1 %v511_v32 }
  0x6f   : > { %509 = vmax.xlane.f32.xlu2 %v508_v33 }
  0x76   : > { %506 = vmax.xlane.f32.xlu0 %v505_v37  ;;  %503 = vmax.xlane.f32.xlu1 %v502_v38 }
  0x77   : > { %500 = vmax.xlane.f32.xlu2 %v499_v39 }
  0x7e   : > { %497 = vmax.xlane.f32.xlu0 %v496_v42  ;;  %494 = vmax.xlane.f32.xlu1 %v493_v43 }
  0x86   : > { %491 = vmax.xlane.f32.xlu0 %v490_v45 }
  0xd1   : > { %v534_v46 = vpop.xlane.xlu0 %533  ;;  %v528_v47 = vpop.xlane.xlu1 %527 }
  0xd2   : > { %v550_v48 = vsub.f32 %v484_v16, %v534_v46  ;;  %v548_v49 = vsub.f32 %v482_v17, %v528_v47  ;;  %v522_v50 = vpop.xlane.xlu2 %521 }
  0xd3   : > { %v546_v53 = vsub.f32 %v480_v18, %v522_v50 }
  0xd4   : > { %v581_v51 = vmul.f32 1.442695, %v550_v48  ;;  %v577_v52 = vmul.f32 1.442695, %v548_v49 }
  0xd5   : > { %v573_v63 = vmul.f32 1.442695, %v546_v53 }
  0xd6   : > { %2819 = vpow2.f32 %v581_v51 }
  0xd7   : > { %2821 = vpow2.f32 %v577_v52 }
  0xd9   : > { %v531_v54 = vpop.xlane.xlu0 %530  ;;  %v525_v55 = vpop.xlane.xlu1 %524 }
  0xda   : > { %v549_v56 = vsub.f32 %v483_v22, %v531_v54  ;;  %v519_v57 = vpop.xlane.xlu2 %518  ;;  %v547_v58 = vsub.f32 %v481_v23, %v525_v55 }
  0xdb   : > { %v545_v59 = vsub.f32 %v479_v24, %v519_v57 }
  0xdc   : > { %v3416_v60 = vpop.eup %2819  ;;  %v579_v61 = vmul.f32 1.442695, %v549_v56  ;;  %v575_v3 = vmul.f32 1.442695, %v547_v58 }
  0xdd   : > { %v3418_v62 = vpop.eup %2821  ;;  %v571_v0 = vmul.f32 1.442695, %v545_v59  ;;  %v628_v1 = vsel %vm486_vm0, %v3416_v60, 0.0  ;;  %v3151_v59 = vmov 0.0  }
  0xde   : > { %2823 = vpow2.f32 %v579_v61  ;;  %629 = vadd.xlane.f32.xlu2 %v628_v1  ;;  %v622_v2 = vsel %vm486_vm0, %v3418_v62, 0.0  ;;  %463 = vst [vmem:[#allocation2] sm:$0xff] %v3151_v59 }
  0xdf   : > { %2825 = vpow2.f32 %v571_v0  ;;  %623 = vadd.xlane.f32.xlu0 %v622_v2  ;;  %464 = vst [vmem:[#allocation3] sm:$0xff] %v3151_v59 }
  0xe0   : > { %2827 = vpow2.f32 %v573_v63  ;;  %465 = vst [vmem:[#allocation4] sm:$0x1] %v3151_v59 }
  0xe1   : > { %v516_v5 = vpop.xlane.xlu0 %515  ;;  %v513_v6 = vpop.xlane.xlu1 %512  ;;  %2829 = vpow2.f32 %v575_v3  ;;  %466 = vst [vmem:[#allocation5] sm:$0x1] %v3151_v59 }
  0xe2   : > { %v544_v7 = vsub.f32 %v3372_v28, %v516_v5  ;;  %v510_v8 = vpop.xlane.xlu2 %509  ;;  %v543_v9 = vsub.f32 %v3375_v29, %v513_v6  ;;  %468 = vst.msk [vmem:[#allocation6] sm:$0xff] %vm467_vm1, %v3151_v59 }
  0xe3   : > { %v542_v10 = vsub.f32 %v3378_v30, %v510_v8 }
  0xe4   : > { %v3432_v12 = vpop.eup %2823  ;;  %v569_v14 = vmul.f32 1.442695, %v544_v7  ;;  %v567_v18 = vmul.f32 1.442695, %v543_v9 }
  0xe5   : > { %v3434_v13 = vpop.eup %2825  ;;  %v565_v15 = vmul.f32 1.442695, %v542_v10  ;;  %v625_v16 = vsel %vm486_vm0, %v3432_v12, 0.0 }
  0xe6   : > { %626 = vadd.xlane.f32.xlu1 %v625_v16  ;;  %v613_v17 = vsel %vm486_vm0, %v3434_v13, 0.0  ;;  %488 = vmax.xlane.f32.xlu2 %v487_v11  ;;  %v3440_v19 = vpop.eup %2827 }
  0xe7   : > { %2831 = vpow2.f32 %v565_v15  ;;  %614 = vadd.xlane.f32.xlu0 %v613_v17  ;;  %v3442_v20 = vpop.eup %2829  ;;  %v616_v28 = vsel %vm486_vm0, %v3440_v19, 0.0 }
  0xe8   : > { %2833 = vpow2.f32 %v569_v14  ;;  %v619_v27 = vsel %vm486_vm0, %v3442_v20, 0.0 }
  0xe9   : > { %v507_v21 = vpop.xlane.xlu0 %506  ;;  %v504_v22 = vpop.xlane.xlu1 %503  ;;  %2835 = vpow2.f32 %v567_v18 }
  0xea   : > { %v541_v23 = vsub.f32 %v3387_v34, %v507_v21  ;;  %v501_v24 = vpop.xlane.xlu2 %500  ;;  %v540_v25 = vsub.f32 %v3390_v35, %v504_v22 }
  0xeb   : > { %v539_v26 = vsub.f32 %v3393_v36, %v501_v24 }
  0xec   : > { %v563_v30 = vmul.f32 1.442695, %v541_v23  ;;  %v561_v33 = vmul.f32 1.442695, %v540_v25 }
  0xed   : > { %v3451_v29 = vpop.eup %2831  ;;  %v559_v31 = vmul.f32 1.442695, %v539_v26 }
  0xee   : > { %620 = vadd.xlane.f32.xlu1 %v619_v27  ;;  %v604_v32 = vsel %vm486_vm0, %v3451_v29, 0.0  ;;  %617 = vadd.xlane.f32.xlu2 %v616_v28  ;;  %v3455_v34 = vpop.eup %2833 }
  0xef   : > { %2837 = vpow2.f32 %v559_v31  ;;  %605 = vadd.xlane.f32.xlu0 %v604_v32  ;;  %v3457_v35 = vpop.eup %2835  ;;  %v610_v39 = vsel %vm486_vm0, %v3455_v34, 0.0 }
  0xf0   : > { %2839 = vpow2.f32 %v563_v30  ;;  %v607_v42 = vsel %vm486_vm0, %v3457_v35, 0.0 }
  0xf1   : > { %v498_v36 = vpop.xlane.xlu0 %497  ;;  %v495_v37 = vpop.xlane.xlu1 %494  ;;  %2841 = vpow2.f32 %v561_v33 }
  0xf2   : > { %v538_v38 = vsub.f32 %v3402_v40, %v498_v36  ;;  %v537_v43 = vsub.f32 %v3405_v41, %v495_v37 }
  0xf4   : > { %v557_v46 = vmul.f32 1.442695, %v538_v38  ;;  %v555_v40 = vmul.f32 1.442695, %v537_v43 }
  0xf5   : > { %v3465_v45 = vpop.eup %2837 }
  0xf6   : > { %611 = vadd.xlane.f32.xlu1 %v610_v39  ;;  %v595_v47 = vsel %vm486_vm0, %v3465_v45, 0.0  ;;  %608 = vadd.xlane.f32.xlu2 %v607_v42  ;;  %v3469_v48 = vpop.eup %2839  ;;  %2843 = vpow2.f32 %v557_v46 }
  0xf7   : > { %596 = vadd.xlane.f32.xlu0 %v595_v47  ;;  %v3471_v49 = vpop.eup %2841  ;;  %2845 = vpow2.f32 %v555_v40  ;;  %v601_v41 = vsel %vm486_vm0, %v3469_v48, 0.0 }
  0xf8   : > { %v598_v52 = vsel %vm486_vm0, %v3471_v49, 0.0 }
  0xf9   : > { %v492_v50 = vpop.xlane.xlu0 %491 }
  0xfa   : > { %v536_v51 = vsub.f32 %v3412_v44, %v492_v50 }
  0xfc   : > { %v553_v53 = vmul.f32 1.442695, %v536_v51  ;;  %v3478_v54 = vpop.eup %2843 }
  0xfd   : > { %v3480_v55 = vpop.eup %2845  ;;  %v592_v56 = vsel %vm486_vm0, %v3478_v54, 0.0 }
  0xfe   : > { %2847 = vpow2.f32 %v553_v53  ;;  %602 = vadd.xlane.f32.xlu1 %v601_v41  ;;  %599 = vadd.xlane.f32.xlu2 %v598_v52  ;;  %v589_v44 = vsel %vm486_vm0, %v3480_v55, 0.0 }
 0x104   : > { %v3484_v57 = vpop.eup %2847 }
 0x105   : > { %v586_v58 = vsel %vm486_vm0, %v3484_v57, 0.0 }
 0x106   : > { %593 = vadd.xlane.f32.xlu1 %v592_v56  ;;  %587 = vadd.xlane.f32.xlu0 %v586_v58 }
 0x107   : > { %590 = vadd.xlane.f32.xlu2 %v589_v44 }
 0x151   : > { %v630_v61 = vpop.xlane.xlu2 %629 }
 0x152   : > { %2849 = vrcp.f32 %v630_v61  ;;  %v3490_v63 = vpop.xlane.xlu0 %623  ;;  %v867_v15 = vand.u32 2147483648, %v630_v61  ;;  %vm861_vm3 = vweird.f32 %v630_v61  ;;  %v865_v17 = vand.u32 2147483647, %v630_v61 }
 0x153   : > { %2851 = vrcp.f32 %v3490_v63  ;;  %v837_v24 = vand.u32 2147483648, %v3490_v63  ;;  %v835_v27 = vand.u32 2147483647, %v3490_v63  ;;  %vm831_vm8 = vweird.f32 %v3490_v63 }
 0x154   : > { %v868_v26 = vor.u32 1.1754944e-38, %v867_v15  ;;  %vm866_vm6 = vcmp.eq.f32.partialorder %v865_v17, 8.507059e+37 }
 0x155   : > { %v838_v47 = vor.u32 1.1754944e-38, %v837_v24  ;;  %vm3547_vm11 = vcmp.eq.f32.partialorder %v835_v27, 8.507059e+37 }
 0x158   : > { %v2850_v0 = vpop.eup %2849 }
 0x159   : > { %v857_v1 = vmul.f32 %v2850_v0, %v630_v61  ;;  %v627_v2 = vpop.xlane.xlu1 %626  ;;  %v489_v3 = vpop.xlane.xlu2 %488  ;;  %vm862_vm2 = vweird.f32 %v2850_v0 }
 0x15a   : > { %v3493_v5 = vpop.eup %2851  ;;  %2853 = vrcp.f32 %v627_v2  ;;  %v3495_v7 = vpop.xlane.xlu0 %614  ;;  %v535_v8 = vsub.f32 %v3425_v4, %v489_v3  ;;  %vm863_vm4 = vmor %vm861_vm3, %vm862_vm2  ;;  %vm846_vm5 = vweird.f32 %v627_v2  ;;  %v852_v36 = vand.u32 2147483648, %v627_v2 }
 0x15b   : > { %v858_v6 = vsub.f32 1.0, %v857_v1  ;;  %v827_v10 = vmul.f32 %v3493_v5, %v3490_v63  ;;  %2855 = vrcp.f32 %v3495_v7  ;;  %v850_v39 = vand.u32 2147483647, %v627_v2 }
 0x15c   : > { %v551_v11 = vmul.f32 1.442695, %v535_v8  ;;  %vm832_vm9 = vweird.f32 %v3493_v5  ;;  %v853_v44 = vor.u32 1.1754944e-38, %v852_v36  ;;  %vm786_vm1 = vweird.f32 %v3495_v7 }
 0x15d   : > { %v859_v9 = vmul.f32 %v2850_v0, %v858_v6  ;;  %v828_v18 = vsub.f32 1.0, %v827_v10  ;;  %vm3555_vm13 = vcmp.eq.f32.partialorder %v850_v39, 8.507059e+37  ;;  %vm3563_vm14 = vmor %vm831_vm8, %vm832_vm9  ;;  %v792_v10 = vand.u32 2147483648, %v3495_v7 }
 0x15e   : > { %2857 = vpow2.f32 %v551_v11  ;;  %v790_v39 = vand.u32 2147483647, %v3495_v7 }
 0x15f   : > { %v860_v14 = vadd.f32 %v2850_v0, %v859_v9  ;;  %v829_v30 = vmul.f32 %v3493_v5, %v828_v18  ;;  %v793_v59 = vor.u32 1.1754944e-38, %v792_v10 }
 0x160   : > { %v3501_v16 = vpop.eup %2853 }
 0x161   : > { %v842_v21 = vmul.f32 %v3501_v16, %v627_v2  ;;  %v3504_v22 = vpop.xlane.xlu1 %620  ;;  %v3506_v4 = vpop.xlane.xlu2 %617  ;;  %v864_v23 = vsel %vm863_vm4, %v2850_v0, %v860_v14  ;;  %vm847_vm7 = vweird.f32 %v3501_v16  ;;  %v830_v52 = vadd.f32 %v3493_v5, %v829_v30 }
 0x162   : > { %2859 = vrcp.f32 %v3504_v22  ;;  %v3512_v28 = vpop.eup %2855  ;;  %v869_v32 = vsel %vm866_vm6, %v868_v26, %v864_v23  ;;  %v3519_v37 = vpop.xlane.xlu0 %605  ;;  %vm3535_vm10 = vmor %vm846_vm5, %vm847_vm7  ;;  %vm816_vm12 = vweird.f32 %v3504_v22  ;;  %v822_v3 = vand.u32 2147483648, %v3504_v22 }
 0x163   : > { %v843_v25 = vsub.f32 1.0, %v842_v21  ;;  %2861 = vrcp.f32 %v3506_v4  ;;  %v870_v38 = vmul.f32 %v3416_v60, %v869_v32  ;;  %v782_v40 = vmul.f32 %v3512_v28, %v3495_v7 }
 0x164   : > { %v3517_v33 = vpop.eup %2857  ;;  %2863 = vrcp.f32 %v3519_v37  ;;  %v834_v8 = vsel %vm3563_vm14, %v3493_v5, %v830_v52  ;;  %v820_v9 = vand.u32 2147483647, %v3504_v22  ;;  %vm801_vm2 = vweird.f32 %v3506_v4 }
 0x165   : > { %v844_v31 = vmul.f32 %v3501_v16, %v843_v25  ;;  %v583_v42 = vsel %vm486_vm0, %v3517_v33, 0.0  ;;  %2654 = vmatpush.xpose.msk.msra.mxu0 %vm486_vm0, %v870_v38  ;;  %v783_v2 = vsub.f32 1.0, %v782_v40  ;;  %v807_v11 = vand.u32 2147483648, %v3506_v4 }
 0x166   : > { %584 = vadd.xlane.f32.xlu1 %v583_v42  ;;  %v823_v24 = vor.u32 1.1754944e-38, %v822_v3  ;;  %v805_v25 = vand.u32 2147483647, %v3506_v4  ;;  %vm821_vm5 = vcmp.eq.f32.partialorder %v820_v9, 8.507059e+37  ;;  %vm787_vm7 = vweird.f32 %v3512_v28 }
 0x167   : > { %v845_v43 = vadd.f32 %v3501_v16, %v844_v31  ;;  %v784_v23 = vmul.f32 %v3512_v28, %v783_v2  ;;  %v808_v36 = vor.u32 1.1754944e-38, %v807_v11  ;;  %vm3647_vm9 = vmor %vm786_vm1, %vm787_vm7 }
 0x168   : > { %v3527_v46 = vpop.eup %2859  ;;  %vm806_vm8 = vcmp.eq.f32.partialorder %v805_v25, 8.507059e+37 }
 0x169   : > { %v812_v50 = vmul.f32 %v3527_v46, %v3504_v22  ;;  %v3542_v51 = vpop.xlane.xlu1 %611  ;;  %v3544_v41 = vpop.xlane.xlu2 %608  ;;  %v849_v1 = vsel %vm3535_vm10, %v3501_v16, %v845_v43  ;;  %vm817_vm15 = vweird.f32 %v3527_v46  ;;  %v839_v22 = vsel %vm3547_vm11, %v838_v47, %v834_v8 }
 0x16a   : > { %v3551_v56 = vpop.eup %2861  ;;  %2865 = vrcp.f32 %v3542_v51  ;;  %v854_v14 = vsel %vm3555_vm13, %v853_v44, %v849_v1  ;;  %vm3588_vm3 = vmor %vm816_vm12, %vm817_vm15  ;;  %v785_v60 = vadd.f32 %v3512_v28, %v784_v23  ;;  %v777_v58 = vand.u32 2147483648, %v3542_v51 }
 0x16b   : > { %v813_v61 = vsub.f32 1.0, %v812_v50  ;;  %v797_v0 = vmul.f32 %v3551_v56, %v3506_v4  ;;  %2867 = vrcp.f32 %v3544_v41  ;;  %v3592_v16 = vpop.eup %2863  ;;  %v855_v17 = vmul.f32 %v3432_v12, %v854_v14  ;;  %v3634_v4 = vpop.xlane.xlu0 %596 }
 0x16c   : > { %vm802_vm4 = vweird.f32 %v3551_v56  ;;  %v737_v47 = vmul.f32 %v3592_v16, %v3519_v37  ;;  %vm771_vm10 = vweird.f32 %v3542_v51  ;;  %v789_v7 = vsel %vm3647_vm9, %v3512_v28, %v785_v60 }
 0x16d   : > { %v814_v63 = vmul.f32 %v3527_v46, %v813_v61  ;;  %v798_v6 = vsub.f32 1.0, %v797_v0  ;;  %2655 = vmatpush.xpose.msk.msra.mxu0 %vm486_vm0, %v855_v17  ;;  %vm3622_vm6 = vmor %vm801_vm2, %vm802_vm4  ;;  %vm3660_vm12 = vcmp.eq.f32.partialorder %v790_v39, 8.507059e+37  ;;  %v775_v8 = vand.u32 2147483647, %v3542_v51 }
 0x16e   : > { %v778_v28 = vor.u32 1.1754944e-38, %v777_v58  ;;  %vm756_vm13 = vweird.f32 %v3544_v41  ;;  %v762_v10 = vand.u32 2147483648, %v3544_v41  ;;  %v760_v17 = vand.u32 2147483647, %v3544_v41 }
 0x16f   : > { %v799_v5 = vmul.f32 %v3551_v56, %v798_v6  ;;  %v815_v18 = vadd.f32 %v3527_v46, %v814_v63  ;;  %vm776_vm1 = vcmp.eq.f32.partialorder %v775_v8, 8.507059e+37  ;;  %vm741_vm2 = vweird.f32 %v3519_v37 }
 0x170   : > { %v3598_v21 = vpop.eup %2865  ;;  %vm742_vm4 = vweird.f32 %v3592_v16  ;;  %v702_v9 = vand.u32 2147483648, %v3634_v4 }
 0x171   : > { %v767_v26 = vmul.f32 %v3598_v21, %v3542_v51  ;;  %v3607_v12 = vpop.xlane.xlu1 %602  ;;  %v3609_v27 = vpop.xlane.xlu2 %599  ;;  %v819_v30 = vsel %vm3588_vm3, %v3527_v46, %v815_v18  ;;  %v800_v31 = vadd.f32 %v3551_v56, %v799_v5  ;;  %v840_v46 = vmul.f32 %v3418_v62, %v839_v22  ;;  %vm3733_vm7 = vmor %vm741_vm2, %vm742_vm4 }
 0x172   : > { %v3615_v32 = vpop.eup %2867  ;;  %2869 = vrcp.f32 %v3607_v12  ;;  %v824_v40 = vsel %vm821_vm5, %v823_v24, %v819_v30  ;;  %vm772_vm11 = vweird.f32 %v3598_v21  ;;  %v794_v51 = vsel %vm3660_vm12, %v793_v59, %v789_v7 }
 0x173   : > { %v768_v42 = vsub.f32 1.0, %v767_v26  ;;  %v752_v43 = vmul.f32 %v3615_v32, %v3544_v41  ;;  %2871 = vrcp.f32 %v3609_v27  ;;  %2656 = vmatpush.xpose.msk.msra.mxu0 %vm486_vm0, %v840_v46  ;;  %v825_v53 = vmul.f32 %v3442_v20, %v824_v40  ;;  %vm3679_vm14 = vmor %vm771_vm10, %vm772_vm11 }
 0x174   : > { %v804_v62 = vsel %vm3622_vm6, %v3551_v56, %v800_v31  ;;  %2873 = vrcp.f32 %v3634_v4  ;;  %v738_v56 = vsub.f32 1.0, %v737_v47  ;;  %vm757_vm15 = vweird.f32 %v3615_v32 }
 0x175   : > { %v769_v50 = vmul.f32 %v3598_v21, %v768_v42  ;;  %v753_v52 = vsub.f32 1.0, %v752_v43  ;;  %v809_v61 = vsel %vm806_vm8, %v808_v36, %v804_v62  ;;  %v747_v22 = vand.u32 2147483648, %v3519_v37  ;;  %vm3706_vm3 = vmor %vm756_vm13, %vm757_vm15 }
 0x176   : > { %v810_v11 = vmul.f32 %v3440_v19, %v809_v61  ;;  %v739_v14 = vmul.f32 %v3592_v16, %v738_v56  ;;  %v763_v26 = vor.u32 1.1754944e-38, %v762_v10  ;;  %v795_v30 = vmul.f32 %v3434_v13, %v794_v51 }
 0x177   : > { %v754_v2 = vmul.f32 %v3615_v32, %v753_v52  ;;  %2657 = vmatpush.xpose.msk.msra.mxu0 %vm486_vm0, %v825_v53  ;;  %v770_v6 = vadd.f32 %v3598_v21, %v769_v50  ;;  %vm3717_vm5 = vcmp.eq.f32.partialorder %v760_v17, 8.507059e+37  ;;  %v745_v46 = vand.u32 2147483647, %v3519_v37 }
 0x178   : > { %v3655_v20 = vpop.eup %2869  ;;  %v740_v43 = vadd.f32 %v3592_v16, %v739_v14  ;;  %v748_v47 = vor.u32 1.1754944e-38, %v747_v22  ;;  %vm726_vm6 = vweird.f32 %v3607_v12  ;;  %v732_v60 = vand.u32 2147483648, %v3607_v12 }
 0x179   : > { %v3664_v1 = vpop.eup %2871  ;;  %v722_v3 = vmul.f32 %v3655_v20, %v3607_v12  ;;  %v3670_v63 = vpop.xlane.xlu1 %593  ;;  %v774_v19 = vsel %vm3679_vm14, %v3598_v21, %v770_v6  ;;  %v755_v24 = vadd.f32 %v3615_v32, %v754_v2  ;;  %vm727_vm8 = vweird.f32 %v3655_v20 }
 0x17a   : > { %2875 = vrcp.f32 %v3670_v63  ;;  %v707_v15 = vmul.f32 %v3664_v1, %v3609_v27  ;;  %v3690_v5 = vpop.xlane.xlu2 %590  ;;  %v3695_v18 = vpop.eup %2873  ;;  %v779_v38 = vsel %vm776_vm1, %v778_v28, %v774_v19  ;;  %v744_v44 = vsel %vm3733_vm7, %v3592_v16, %v740_v43  ;;  %vm3757_vm11 = vmor %vm726_vm6, %vm727_vm8 }
 0x17b   : > { %v723_v23 = vsub.f32 1.0, %v722_v3  ;;  %2658 = vmatpush.xpose.msk.msra.mxu0 %vm486_vm0, %v810_v11  ;;  %2877 = vrcp.f32 %v3690_v5  ;;  %v692_v21 = vmul.f32 %v3695_v18, %v3634_v4  ;;  %v3715_v36 = vpop.xlane.xlu0 %587  ;;  %v759_v13 = vsel %vm3706_vm3, %v3615_v32, %v755_v24 }
 0x17c   : > { %v708_v31 = vsub.f32 1.0, %v707_v15  ;;  %2879 = vrcp.f32 %v3715_v36  ;;  %v780_v50 = vmul.f32 %v3455_v34, %v779_v38  ;;  %v764_v37 = vsel %vm3717_vm5, %v763_v26, %v759_v13 }
 0x17d   : > { %v724_v42 = vmul.f32 %v3655_v20, %v723_v23  ;;  %v693_v32 = vsub.f32 1.0, %v692_v21  ;;  %vm746_vm9 = vcmp.eq.f32.partialorder %v745_v46, 8.507059e+37  ;;  %v730_v58 = vand.u32 2147483647, %v3607_v12 }
 0x17e   : > { %v709_v52 = vmul.f32 %v3664_v1, %v708_v31  ;;  %vm711_vm10 = vweird.f32 %v3609_v27  ;;  %v733_v56 = vor.u32 1.1754944e-38, %v732_v60  ;;  %v717_v61 = vand.u32 2147483648, %v3609_v27 }
 0x17f   : > { %2659 = vmatpush.xpose.msk.msra.mxu0 %vm486_vm0, %v795_v30  ;;  %v725_v34 = vadd.f32 %v3655_v20, %v724_v42  ;;  %v765_v7 = vmul.f32 %v3457_v35, %v764_v37  ;;  %vm712_vm12 = vweird.f32 %v3664_v1  ;;  %v694_v16 = vmul.f32 %v3695_v18, %v693_v32 }
 0x180   : > { %v3721_v39 = vpop.eup %2875  ;;  %v749_v3 = vsel %vm746_vm9, %v748_v47, %v744_v44  ;;  %vm731_vm13 = vcmp.eq.f32.partialorder %v730_v58, 8.507059e+37  ;;  %v710_v35 = vadd.f32 %v3664_v1, %v709_v52  ;;  %v715_v8 = vand.u32 2147483647, %v3609_v27  ;;  %vm3778_vm15 = vmor %vm711_vm10, %vm712_vm12 }
 0x181   : > { %v677_v53 = vmul.f32 %v3721_v39, %v3670_v63  ;;  %v3746_v62 = vpop.eup %2877  ;;  %v729_v12 = vsel %vm3757_vm11, %v3655_v20, %v725_v34  ;;  %vm696_vm14 = vweird.f32 %v3634_v4  ;;  %v718_v10 = vor.u32 1.1754944e-38, %v717_v61 }
 0x182   : > { %v662_v2 = vmul.f32 %v3746_v62, %v3690_v5  ;;  %v3767_v6 = vpop.eup %2879  ;;  %v750_v11 = vmul.f32 %v3451_v29, %v749_v3  ;;  %vm697_vm1 = vweird.f32 %v3695_v18  ;;  %v734_v51 = vsel %vm731_vm13, %v733_v56, %v729_v12 }
 0x183   : > { %2660 = vmatpush.xpose.msk.msra.mxu0 %vm486_vm0, %v780_v50  ;;  %v678_v0 = vsub.f32 1.0, %v677_v53  ;;  %v647_v14 = vmul.f32 %v3767_v6, %v3715_v36  ;;  %v714_v27 = vsel %vm3778_vm15, %v3664_v1, %v710_v35  ;;  %vm716_vm2 = vcmp.eq.f32.partialorder %v715_v8, 8.507059e+37  ;;  %vm3796_vm3 = vmor %vm696_vm14, %vm697_vm1 }
 0x184   : > { %v663_v15 = vsub.f32 1.0, %v662_v2  ;;  %v695_v17 = vadd.f32 %v3695_v18, %v694_v16  ;;  %v700_v29 = vand.u32 2147483647, %v3634_v4  ;;  %v703_v19 = vor.u32 1.1754944e-38, %v702_v9  ;;  %v485_v2 = vld [vmem:[%s3350_s15] sm:$0xff] }
 0x185   : > { %v679_v20 = vmul.f32 %v3721_v39, %v678_v0  ;;  %vm681_vm4 = vweird.f32 %v3670_v63  ;;  %v735_v24 = vmul.f32 %v3469_v48, %v734_v51  ;;  %vm682_vm5 = vweird.f32 %v3721_v39 }
 0x186   : > { %v687_v1 = vand.u32 2147483648, %v3670_v63  ;;  %v648_v22 = vsub.f32 1.0, %v647_v14  ;;  %v664_v25 = vmul.f32 %v3746_v62, %v663_v15  ;;  %v719_v26 = vsel %vm716_vm2, %v718_v10, %v714_v27  ;;  %vm3811_vm7 = vmor %vm681_vm4, %vm682_vm5 }
 0x187   : > { %2661 = vmatpush.xpose.msk.msra.mxu0 %vm486_vm0, %v765_v7  ;;  %v699_v4 = vsel %vm3796_vm3, %v3695_v18, %v695_v17  ;;  %vm701_vm6 = vcmp.eq.f32.partialorder %v700_v29, 8.507059e+37  ;;  %v680_v30 = vadd.f32 %v3721_v39, %v679_v20  ;;  %v685_v21 = vand.u32 2147483647, %v3670_v63 }
 0x188   : > { %vm666_vm8 = vweird.f32 %v3690_v5  ;;  %vm667_vm9 = vweird.f32 %v3746_v62  ;;  %v720_v31 = vmul.f32 %v3471_v49, %v719_v26  ;;  %v688_v38 = vor.u32 1.1754944e-38, %v687_v1 }
 0x189   : > { %v670_v41 = vand.u32 2147483647, %v3690_v5  ;;  %v672_v18 = vand.u32 2147483648, %v3690_v5  ;;  %v704_v42 = vsel %vm701_vm6, %v703_v19, %v699_v4  ;;  %v649_v13 = vmul.f32 %v3767_v6, %v648_v22  ;;  %vm3826_vm11 = vmor %vm666_vm8, %vm667_vm9 }
 0x18a   : > { %v665_v63 = vadd.f32 %v3746_v62, %v664_v25  ;;  %v684_v43 = vsel %vm3811_vm7, %v3721_v39, %v680_v30  ;;  %vm686_vm10 = vcmp.eq.f32.partialorder %v685_v21, 8.507059e+37  ;;  %vm651_vm12 = vweird.f32 %v3715_v36 }
 0x18b   : > { %2662 = vmatpush.xpose.msk.msra.mxu0 %vm486_vm0, %v750_v11  ;;  %vm652_vm13 = vweird.f32 %v3767_v6  ;;  %v705_v49 = vmul.f32 %v3465_v45, %v704_v42  ;;  %v657_v5 = vand.u32 2147483648, %v3715_v36  ;;  %v673_v47 = vor.u32 1.1754944e-38, %v672_v18 }
 0x18c   : > { %v689_v40 = vsel %vm686_vm10, %v688_v38, %v684_v43  ;;  %v650_v60 = vadd.f32 %v3767_v6, %v649_v13  ;;  %v655_v50 = vand.u32 2147483647, %v3715_v36  ;;  %vm671_vm14 = vcmp.eq.f32.partialorder %v670_v41, 8.507059e+37  ;;  %vm653_vm15 = vmor %vm651_vm12, %vm652_vm13 }
 0x18d   : > { %v669_v39 = vsel %vm3826_vm11, %v3746_v62, %v665_v63  ;;  %v690_v32 = vmul.f32 %v3478_v54, %v689_v40  ;;  %v658_v52 = vor.u32 1.1754944e-38, %v657_v5 }
 0x18e   : > { %v674_v45 = vsel %vm671_vm14, %v673_v47, %v669_v39  ;;  %vm656_vm1 = vcmp.eq.f32.partialorder %v655_v50, 8.507059e+37  ;;  %v654_v53 = vsel %vm653_vm15, %v3767_v6, %v650_v60  ;;  %v943_v6 = vstv %s3333_s13 }
 0x18f   : > { %2663 = vmatpush.xpose.msk.msra.mxu0 %vm486_vm0, %v735_v24  ;;  %v675_v37 = vmul.f32 %v3480_v55, %v674_v45  ;;  %v659_v36 = vsel %vm656_vm1, %v658_v52, %v654_v53 }
 0x190   : > { %v660_v44 = vmul.f32 %v3484_v57, %v659_v36 }
 0x193   : > { %2664 = vmatpush.xpose.msk.msra.mxu0 %vm486_vm0, %v720_v31 }
 0x197   : > { %2665 = vmatpush.xpose.msk.msra.mxu0 %vm486_vm0, %v705_v49 }
 0x19b   : > { %2666 = vmatpush.xpose.msk.msra.mxu0 %vm486_vm0, %v690_v32 }
 0x19f   : > { %2667 = vmatpush.xpose.msk.msra.mxu0 %vm486_vm0, %v675_v37 }
 0x1a3   : > { %2668 = vmatpush.xpose.msk.msra.mxu0 %vm486_vm0, %v660_v44 }
 0x1d9   : > { %v585_v62 = vpop.xlane.xlu1 %584 }
 0x1da   : > { %2881 = vrcp.f32 %v585_v62  ;;  %v642_v59 = vand.u32 2147483648, %v585_v62  ;;  %v640_v61 = vand.u32 2147483647, %v585_v62  ;;  %vm636_vm3 = vweird.f32 %v585_v62 }
 0x1dc   : > { %v643_v7 = vor.u32 1.1754944e-38, %v642_v59  ;;  %vm641_vm5 = vcmp.eq.f32.partialorder %v640_v61, 8.507059e+37 }
 0x1e0   : > { %v2882_v34 = vpop.eup %2881 }
 0x1e1   : > { %v632_v54 = vmul.f32 %v2882_v34, %v585_v62  ;;  %vm637_vm2 = vweird.f32 %v2882_v34 }
 0x1e2   : > { %vm638_vm4 = vmor %vm636_vm3, %vm637_vm2 }
 0x1e3   : > { %v633_v58 = vsub.f32 1.0, %v632_v54 }
 0x1e5   : > { %v634_v56 = vmul.f32 %v2882_v34, %v633_v58 }
 0x1e7   : > { %v635_v55 = vadd.f32 %v2882_v34, %v634_v56 }
 0x1e9   : > { %v639_v57 = vsel %vm638_vm4, %v2882_v34, %v635_v55 }
 0x1ea   : > { %v644_v16 = vsel %vm641_vm5, %v643_v7, %v639_v57 }
 0x1eb   : > { %v645_v0 = vmul.f32 %v3517_v33, %v644_v16 }
 0x1ed   : > { %2669 = vmatpush.xpose.msk.msra.mxu0 %vm486_vm0, %v645_v0 }
 0x1f0   : > { %2670 = vmatmul.msk.f32.vlgmr.msra.gmra.mxu0 %vm486_vm0, %v485_v2 }
 0x26d   : > { %v939_v3 = vpop.f32.mrf.mxu0 }
 0x26e   : > { %v942_v12 = vsub.f32 0.0, %v939_v3 }
 0x270   : > { %v944_v35 = vmul.f32 %v943_v6, %v942_v12 }
 0x272   : > { %945 = vst [vmem:[%s3356_s10] sm:$0xff] %v944_v35 }
 0x273 PF: > { %v3854_v33 = vld [vmem:[%s3326_s6 + $0x8] sm:$0xf]  ;;  %v3857_v8 = vld [vmem:[%s3326_s6 + $0xc] sm:$0xf]  ;;  %v3862_v10 = vld [vmem:[%s3326_s6] sm:$0xf] }
 0x274   : > { %v965_v28 = vxor.u32 2147516416, %v3854_v33  ;;  %v966_v9 = vxor.u32 2147516416, %v3857_v8  ;;  %v3865_v11 = vld [vmem:[%s3326_s6 + $0x4] sm:$0xf]  ;;  %v963_v20 = vxor.u32 2147516416, %v3862_v10  ;;  %vm1818_vm0 = vcmask 130112  }
 0x275   : > { %v964_v14 = vxor.u32 2147516416, %v3865_v11  ;;  %v3870_v15 = vld [vmem:[%s3326_s6 + $0x18] sm:$0xf]  ;;  %v3873_v51 = vld [vmem:[%s3326_s6 + $0x1c] sm:$0xf]  ;;  %vm1822_vm6 = vcmask 195712  }
 0x276   : > { %v981_v27 = vunpack.c.l.bf16 %v965_v28  ;;  %v982_v17 = vunpack.c.l.bf16 %v966_v9  ;;  %v969_v29 = vxor.u32 2147516416, %v3870_v15  ;;  %v970_v23 = vxor.u32 2147516416, %v3873_v51  ;;  %v3878_v19 = vld [vmem:[%s3326_s6 + $0x28] sm:$0xf]  ;;  %v3881_v24 = vld [vmem:[%s3326_s6 + $0x2c] sm:$0xf] }
 0x277   : > { %v979_v1 = vunpack.c.l.bf16 %v963_v20  ;;  %v980_v22 = vunpack.c.l.bf16 %v964_v14  ;;  %v973_v25 = vxor.u32 2147516416, %v3878_v19  ;;  %v974_v26 = vxor.u32 2147516416, %v3881_v24  ;;  %v3886_v13 = vld [vmem:[%s3326_s6 + $0x10] sm:$0xf]  ;;  %v3889_v46 = vld [vmem:[%s3326_s6 + $0x14] sm:$0xf] }
 0x278   : > { %v999_v4 = vmul.f32 1.442695, %v981_v27  ;;  %v1001_v30 = vmul.f32 1.442695, %v982_v17  ;;  %v985_v21 = vunpack.c.l.bf16 %v969_v29  ;;  %v986_v48 = vunpack.c.l.bf16 %v970_v23  ;;  %v3894_v47 = vld [vmem:[%s3326_s6 + $0x30] sm:$0xf] }
 0x279   : > { %v995_v31 = vmul.f32 1.442695, %v979_v1  ;;  %v997_v38 = vmul.f32 1.442695, %v980_v22  ;;  %v989_v41 = vunpack.c.l.bf16 %v973_v25  ;;  %v990_v18 = vunpack.c.l.bf16 %v974_v26  ;;  %v3897_v40 = vld [vmem:[%s3326_s6 + $0x34] sm:$0xf] }
 0x27a   : > { %2886 = vpow2.f32 %v999_v4  ;;  %v1007_v42 = vmul.f32 1.442695, %v985_v21  ;;  %v1009_v63 = vmul.f32 1.442695, %v986_v48  ;;  %v967_v49 = vxor.u32 2147516416, %v3886_v13  ;;  %p2703_p10 = scmp.ne.s32.totalorder %s3132_s23, 1 }
 0x27b   : > { %2888 = vpow2.f32 %v1001_v30  ;;  %v1015_v43 = vmul.f32 1.442695, %v989_v41  ;;  %v968_v5 = vxor.u32 2147516416, %v3889_v46  ;;  %v1017_v60 = vmul.f32 1.442695, %v990_v18 }
 0x27c   : > { %2890 = vpow2.f32 %v995_v31  ;;  %v975_v50 = vxor.u32 2147516416, %v3894_v47  ;;  %v976_v39 = vxor.u32 2147516416, %v3897_v40  ;;  %v983_v32 = vunpack.c.l.bf16 %v967_v49 }
 0x27d   : > { %2892 = vpow2.f32 %v997_v38  ;;  %v984_v52 = vunpack.c.l.bf16 %v968_v5  ;;  %v3152_v38 = vmov 1065369472   ;;  %vm1826_vm7 = vcmask 261312  }
 0x27e   : > { %2894 = vpow2.f32 %v1007_v42  ;;  %v991_v45 = vunpack.c.l.bf16 %v975_v50  ;;  %v1003_v37 = vmul.f32 1.442695, %v983_v32  ;;  %v992_v36 = vunpack.c.l.bf16 %v976_v39 }
 0x27f   : > { %2896 = vpow2.f32 %v1009_v63  ;;  %v1005_v34 = vmul.f32 1.442695, %v984_v52  ;;  %v3901_v41 = vunpack.c.h.bf16 %v3152_v38  ;;  %v3905_v52 = vunpack.c.l.bf16 %v3152_v38 }
 0x280   : > { %v2887_v53 = vpop.eup %2886  ;;  %2898 = vpow2.f32 %v1015_v43  ;;  %v1019_v59 = vmul.f32 1.442695, %v991_v45  ;;  %v1021_v0 = vmul.f32 1.442695, %v992_v36  ;;  %vm1830_vm8 = vcmask 326912  }
 0x281   : > { %v2889_v44 = vpop.eup %2888  ;;  %v1029_v62 = vpack.c.bf16 %v2887_v53, %v2887_v53  ;;  %2900 = vpow2.f32 %v1017_v60  ;;  %vm1834_vm9 = vcmask 392512   ;;  %vm1838_vm10 = vcmask 458112  }
 0x282   : > { %v2891_v54 = vpop.eup %2890  ;;  %v1030_v58 = vpack.c.bf16 %v2889_v44, %v2889_v44  ;;  %2902 = vpow2.f32 %v1003_v37  ;;  %vm1842_vm11 = vcmask 523712   ;;  %vm1846_vm12 = vcmask 589312  }
 0x283   : > { %v2893_v56 = vpop.eup %2892  ;;  %v1045_v61 = vunpack.c.l.bf16 %v1029_v62  ;;  %v1027_v55 = vpack.c.bf16 %v2891_v54, %v2891_v54  ;;  %2904 = vpow2.f32 %v1005_v34  ;;  %vm1850_vm13 = vcmask 654912  }
 0x284   : > { %v2895_v7 = vpop.eup %2894  ;;  %v1046_v57 = vunpack.c.l.bf16 %v1030_v58  ;;  %v1028_v16 = vpack.c.bf16 %v2893_v56, %v2893_v56  ;;  %2906 = vpow2.f32 %v1019_v59  ;;  %vm1854_vm14 = vcmask 720512  }
 0x285   : > { %v2897_v2 = vpop.eup %2896  ;;  %v1061_v3 = vadd.f32 1.0, %v1045_v61  ;;  %v1043_v6 = vunpack.c.l.bf16 %v1027_v55  ;;  %v1033_v12 = vpack.c.bf16 %v2895_v7, %v2895_v7  ;;  %2908 = vpow2.f32 %v1021_v0 }
 0x286   : > { %v2899_v35 = vpop.eup %2898  ;;  %v1062_v28 = vadd.f32 1.0, %v1046_v57  ;;  %v1044_v9 = vunpack.c.l.bf16 %v1028_v16  ;;  %v1034_v20 = vpack.c.bf16 %v2897_v2, %v2897_v2  ;;  %vm1858_vm15 = vcmask 786112  }
 0x287   : > { %v2901_v14 = vpop.eup %2900  ;;  %v1077_v27 = vpack.c.bf16 %v1061_v3, %v1061_v3  ;;  %v1059_v17 = vadd.f32 1.0, %v1043_v6  ;;  %v1049_v29 = vunpack.c.l.bf16 %v1033_v12  ;;  %v1037_v23 = vpack.c.bf16 %v2899_v35, %v2899_v35 }
 0x288   : > { %v1078_v1 = vpack.c.bf16 %v1062_v28, %v1062_v28  ;;  %v1060_v22 = vadd.f32 1.0, %v1044_v9  ;;  %v1050_v25 = vunpack.c.l.bf16 %v1034_v20  ;;  %v1038_v26 = vpack.c.bf16 %v2901_v14, %v2901_v14  ;;  %v2903_v31 = vpop.eup %2902 }
 0x289   : > { %v1107_v4 = vunpack.c.h.bf16 %v1077_v27  ;;  %v1108_v30 = vunpack.c.l.bf16 %v1077_v27  ;;  %v1075_v21 = vpack.c.bf16 %v1059_v17, %v1059_v17  ;;  %v1065_v48 = vadd.f32 1.0, %v1049_v29  ;;  %v2905_v63 = vpop.eup %2904 }
 0x28a   : > { %v1114_v18 = vunpack.c.h.bf16 %v1078_v1  ;;  %v1115_v42 = vunpack.c.l.bf16 %v1078_v1  ;;  %v1076_v43 = vpack.c.bf16 %v1060_v22, %v1060_v22  ;;  %v3903_v60 = vpop.eup %2906  ;;  %v1066_v50 = vadd.f32 1.0, %v1050_v25 }
 0x28b   : > { %2910 = vrcp.f32 %v1107_v4  ;;  %v1093_v49 = vunpack.c.h.bf16 %v1075_v21  ;;  %v1094_v5 = vunpack.c.l.bf16 %v1075_v21  ;;  %v1081_v39 = vpack.c.bf16 %v1065_v48, %v1065_v48  ;;  %v3907_v58 = vpop.eup %2908 }
 0x28c   : > { %2912 = vrcp.f32 %v1108_v30  ;;  %v1053_v32 = vunpack.c.l.bf16 %v1037_v23  ;;  %v1100_v45 = vunpack.c.h.bf16 %v1076_v43  ;;  %v1054_v53 = vunpack.c.l.bf16 %v1038_v26 }
 0x28d   : > { %2914 = vrcp.f32 %v1114_v18  ;;  %v1101_v37 = vunpack.c.l.bf16 %v1076_v43  ;;  %v1082_v36 = vpack.c.bf16 %v1066_v50, %v1066_v50  ;;  %v1135_v44 = vunpack.c.h.bf16 %v1081_v39 }
 0x28e   : > { %2916 = vrcp.f32 %v1115_v42  ;;  %v1069_v62 = vadd.f32 1.0, %v1053_v32  ;;  %v1070_v34 = vadd.f32 1.0, %v1054_v53  ;;  %v1031_v54 = vpack.c.bf16 %v2903_v31, %v2903_v31 }
 0x28f   : > { %2918 = vrcp.f32 %v1093_v49  ;;  %v1136_v59 = vunpack.c.l.bf16 %v1081_v39  ;;  %v1142_v56 = vunpack.c.h.bf16 %v1082_v36  ;;  %v1143_v55 = vunpack.c.l.bf16 %v1082_v36 }
 0x290   : > { %2920 = vrcp.f32 %v1094_v5  ;;  %v1085_v7 = vpack.c.bf16 %v1069_v62, %v1069_v62  ;;  %v1086_v57 = vpack.c.bf16 %v1070_v34, %v1070_v34  ;;  %v1032_v2 = vpack.c.bf16 %v2905_v63, %v2905_v63 }
 0x291   : > { %v2911_v61 = vpop.eup %2910  ;;  %2922 = vrcp.f32 %v1100_v45  ;;  %v1047_v3 = vunpack.c.l.bf16 %v1031_v54  ;;  %v1319_v35 = vunpack.c.l.bf16 %v3854_v33  ;;  %v1320_v14 = vunpack.c.l.bf16 %v3857_v8 }
 0x292   : > { %v2913_v16 = vpop.eup %2912  ;;  %v1110_v0 = vmul.f32 %v2911_v61, %v3901_v41  ;;  %2924 = vrcp.f32 %v1101_v37  ;;  %v1163_v28 = vunpack.c.h.bf16 %v1085_v7  ;;  %v1164_v27 = vunpack.c.l.bf16 %v1085_v7 }
 0x293   : > { %v2915_v6 = vpop.eup %2914  ;;  %v1112_v12 = vmul.f32 %v2913_v16, %v3905_v52  ;;  %2926 = vrcp.f32 %v1135_v44  ;;  %v1170_v1 = vunpack.c.h.bf16 %v1086_v57  ;;  %v1048_v26 = vunpack.c.l.bf16 %v1032_v2 }
 0x294   : > { %v2917_v9 = vpop.eup %2916  ;;  %v1117_v20 = vmul.f32 %v2915_v6, %v3901_v41  ;;  %2928 = vrcp.f32 %v1136_v59  ;;  %v1063_v4 = vadd.f32 1.0, %v1047_v3  ;;  %v1171_v42 = vunpack.c.l.bf16 %v1086_v57 }
 0x295   : > { %v2919_v17 = vpop.eup %2918  ;;  %v3914_v29 = vpack.c.bf16 %v1110_v0, %v1112_v12  ;;  %v1119_v23 = vmul.f32 %v2917_v9, %v3905_v52  ;;  %2930 = vrcp.f32 %v1142_v56  ;;  %v1064_v53 = vadd.f32 1.0, %v1048_v26 }
 0x296   : > { %v2921_v22 = vpop.eup %2920  ;;  %v1096_v25 = vmul.f32 %v2919_v17, %v3901_v41  ;;  %2932 = vrcp.f32 %v1143_v55  ;;  %v1079_v63 = vpack.c.bf16 %v1063_v4, %v1063_v4  ;;  %vm1862_vm1 = vcmask 851712  }
 0x297   : > { %v2923_v30 = vpop.eup %2922  ;;  %v3918_v21 = vpack.c.bf16 %v1117_v20, %v1119_v23  ;;  %v1207_v48 = vunpack.c.l.bf16 %v3914_v29  ;;  %v1098_v31 = vmul.f32 %v2921_v22, %v3905_v52  ;;  %2934 = vrcp.f32 %v1163_v28 }
 0x298   : > { %v2925_v38 = vpop.eup %2924  ;;  %v1103_v18 = vmul.f32 %v2923_v30, %v3901_v41  ;;  %2936 = vrcp.f32 %v1164_v27  ;;  %v1121_v37 = vunpack.c.h.bf16 %v1079_v63  ;;  %v1122_v55 = vunpack.c.l.bf16 %v1079_v63 }
 0x299   : > { %v2927_v43 = vpop.eup %2926  ;;  %v1208_v49 = vunpack.c.l.bf16 %v3918_v21  ;;  %v1223_v5 = vmax.f32 %v1207_v48, 9.991702e-38  ;;  %v3926_v50 = vpack.c.bf16 %v1096_v25, %v1098_v31  ;;  %v1105_v39 = vmul.f32 %v2925_v38, %v3905_v52 }
 0x29a   : > { %v2929_v32 = vpop.eup %2928  ;;  %v1138_v45 = vmul.f32 %v2927_v43, %v3901_v41  ;;  %2938 = vrcp.f32 %v1170_v1  ;;  %v1317_v23 = vunpack.c.l.bf16 %v3862_v10  ;;  %v1080_v25 = vpack.c.bf16 %v1064_v53, %v1064_v53 }
 0x29b   : > { %v2931_v36 = vpop.eup %2930  ;;  %v1224_v44 = vmax.f32 %v1208_v49, 9.991702e-38  ;;  %v1239_v62 = vpack.c.bf16 %v1223_v5, %v1223_v5  ;;  %v3932_v34 = vpack.c.bf16 %v1103_v18, %v1105_v39  ;;  %v1205_v54 = vunpack.c.l.bf16 %v3926_v50 }
 0x29c   : > { %v2933_v59 = vpop.eup %2932  ;;  %v1140_v56 = vmul.f32 %v2929_v32, %v3905_v52  ;;  %v1145_v61 = vmul.f32 %v2931_v36, %v3901_v41  ;;  %2940 = vrcp.f32 %v1171_v42  ;;  %v1318_v32 = vunpack.c.l.bf16 %v3865_v11 }
 0x29d   : > { %v2935_v7 = vpop.eup %2934  ;;  %v1240_v57 = vpack.c.bf16 %v1224_v44, %v1224_v44  ;;  %v1255_v16 = vunpack.c.l.bf16 %v1239_v62  ;;  %v1206_v0 = vunpack.c.l.bf16 %v3932_v34  ;;  %v1221_v2 = vmax.f32 %v1205_v54, 9.991702e-38 }
 0x29e   : > { %v2937_v3 = vpop.eup %2936  ;;  %v3940_v6 = vpack.c.bf16 %v1138_v45, %v1140_v56  ;;  %v1147_v12 = vmul.f32 %v2933_v59, %v3905_v52  ;;  %v1166_v28 = vmul.f32 %v2935_v7, %v3901_v41  ;;  %2942 = vrcp.f32 %v1121_v37 }
 0x29f   : > { %v1256_v9 = vunpack.c.l.bf16 %v1240_v57  ;;  %2944 = vlog2.f32 %v1255_v16  ;;  %v1222_v20 = vmax.f32 %v1206_v0, 9.991702e-38  ;;  %v1237_v27 = vpack.c.bf16 %v1221_v2, %v1221_v2 }
 0x2a0   : > { %v2939_v17 = vpop.eup %2938  ;;  %v3947_v1 = vpack.c.bf16 %v1145_v61, %v1147_v12  ;;  %v1211_v22 = vunpack.c.l.bf16 %v3940_v6  ;;  %v1168_v30 = vmul.f32 %v2937_v3, %v3905_v52  ;;  %v1128_v37 = vunpack.c.h.bf16 %v1080_v25 }
 0x2a1   : > { %2946 = vlog2.f32 %v1256_v9  ;;  %v1238_v26 = vpack.c.bf16 %v1222_v20, %v1222_v20  ;;  %v1253_v4 = vunpack.c.l.bf16 %v1237_v27  ;;  %v1173_v42 = vmul.f32 %v2939_v17, %v3901_v41 }
 0x2a2   : > { %v2941_v31 = vpop.eup %2940  ;;  %v1212_v38 = vunpack.c.l.bf16 %v3947_v1  ;;  %v1227_v18 = vmax.f32 %v1211_v22, 9.991702e-38  ;;  %2948 = vrcp.f32 %v1122_v55  ;;  %v3955_v43 = vpack.c.bf16 %v1166_v28, %v1168_v30 }
 0x2a3   : > { %v1254_v63 = vunpack.c.l.bf16 %v1238_v26  ;;  %2950 = vlog2.f32 %v1253_v4  ;;  %v1175_v5 = vmul.f32 %v2941_v31, %v3905_v52  ;;  %v1129_v59 = vunpack.c.l.bf16 %v1080_v25 }
 0x2a4   : > { %v2943_v39 = vpop.eup %2942  ;;  %v1228_v45 = vmax.f32 %v1212_v38, 9.991702e-38  ;;  %v1243_v53 = vpack.c.bf16 %v1227_v18, %v1227_v18  ;;  %v1215_v62 = vunpack.c.l.bf16 %v3955_v43  ;;  %v1039_v7 = vpack.c.bf16 %v3903_v60, %v3903_v60 }
 0x2a5   : > { %v2945_v36 = vpop.eup %2944  ;;  %2952 = vlog2.f32 %v1254_v63  ;;  %v3961_v44 = vpack.c.bf16 %v1173_v42, %v1175_v5  ;;  %v1124_v3 = vmul.f32 %v2943_v39, %v3901_v41  ;;  %v1323_v18 = vunpack.c.l.bf16 %v3870_v15 }
 0x2a6   : > { %v1274_v56 = vmul.f32 0.6931472, %v2945_v36  ;;  %v1244_v61 = vpack.c.bf16 %v1228_v45, %v1228_v45  ;;  %v1259_v55 = vunpack.c.l.bf16 %v1243_v53  ;;  %v1231_v2 = vmax.f32 %v1215_v62, 9.991702e-38 }
 0x2a7   : > { %v2947_v57 = vpop.eup %2946  ;;  %v1216_v16 = vunpack.c.l.bf16 %v3961_v44  ;;  %2954 = vrcp.f32 %v1128_v37  ;;  %vm1866_vm2 = vcmask 917312   ;;  %vm1870_vm3 = vcmask 982912  }
 0x2a8   : > { %v2949_v12 = vpop.eup %2948  ;;  %v1276_v28 = vmul.f32 0.6931472, %v2947_v57  ;;  %v1303_v9 = vpack.c.bf16 %v1274_v56, %v1274_v56  ;;  %v1260_v20 = vunpack.c.l.bf16 %v1244_v61  ;;  %2956 = vlog2.f32 %v1259_v55 }
 0x2a9   : > { %v2951_v27 = vpop.eup %2950  ;;  %v1232_v17 = vmax.f32 %v1216_v16, 9.991702e-38  ;;  %v1247_v25 = vpack.c.bf16 %v1231_v2, %v1231_v2  ;;  %v1126_v60 = vmul.f32 %v2949_v12, %v3905_v52  ;;  %2958 = vrcp.f32 %v1129_v59 }
 0x2aa   : > { %v1304_v26 = vpack.c.bf16 %v1276_v28, %v1276_v28  ;;  %v1335_v4 = vunpack.c.l.bf16 %v1303_v9  ;;  %v1270_v30 = vmul.f32 0.6931472, %v2951_v27  ;;  %2960 = vlog2.f32 %v1260_v20 }
 0x2ab   : > { %v2953_v31 = vpop.eup %2952  ;;  %v1248_v42 = vpack.c.bf16 %v1232_v17, %v1232_v17  ;;  %v1263_v63 = vunpack.c.l.bf16 %v1247_v25  ;;  %v3974_v5 = vpack.c.bf16 %v1124_v3, %v1126_v60  ;;  %v1324_v59 = vunpack.c.l.bf16 %v3873_v51 }
 0x2ac   : > { %v1336_v39 = vunpack.c.l.bf16 %v1304_v26  ;;  %v1351_v45 = vsub.f32 %v1319_v35, %v1335_v4  ;;  %v1272_v53 = vmul.f32 0.6931472, %v2953_v31  ;;  %v1301_v37 = vpack.c.bf16 %v1270_v30, %v1270_v30 }
 0x2ad   : > { %v2955_v36 = vpop.eup %2954  ;;  %v1264_v56 = vunpack.c.l.bf16 %v1248_v42  ;;  %2962 = vlog2.f32 %v1263_v63  ;;  %v1209_v61 = vunpack.c.l.bf16 %v3974_v5  ;;  %v1040_v60 = vpack.c.bf16 %v3907_v58, %v3907_v58 }
 0x2ae   : > { %v2957_v55 = vpop.eup %2956  ;;  %v1352_v15 = vsub.f32 %v1320_v14, %v1336_v39  ;;  %v1399_v57 = vmax.f32 %v1351_v45, 0.0  ;;  %v1302_v2 = vpack.c.bf16 %v1272_v53, %v1272_v53  ;;  %v1333_v3 = vunpack.c.l.bf16 %v1301_v37 }
 0x2af   : > { %v2959_v12 = vpop.eup %2958  ;;  %v1282_v28 = vmul.f32 0.6931472, %v2957_v55  ;;  %2964 = vlog2.f32 %v1264_v56  ;;  %v1131_v33 = vmul.f32 %v2955_v36, %v3901_v41  ;;  %v1225_v35 = vmax.f32 %v1209_v61, 9.991702e-38 }
 0x2b0   : > { %v2961_v51 = vpop.eup %2960  ;;  %v1400_v9 = vmax.f32 %v1352_v15, 0.0  ;;  %v1334_v20 = vunpack.c.l.bf16 %v1302_v2  ;;  %v1349_v27 = vsub.f32 %v1317_v23, %v1333_v3  ;;  %v1133_v8 = vmul.f32 %v2959_v12, %v3905_v52 }
 0x2b1   : > { %v1284_v14 = vmul.f32 0.6931472, %v2961_v51  ;;  %v1307_v17 = vpack.c.bf16 %v1282_v28, %v1282_v28  ;;  %v1241_v25 = vpack.c.bf16 %v1225_v35, %v1225_v35  ;;  %v1055_v23 = vunpack.c.l.bf16 %v1039_v7 }
 0x2b2   : > { %v1414_v26 = vpack.c.bf16 %v1400_v9, %v1399_v57  ;;  %v1350_v4 = vsub.f32 %v1318_v32, %v1334_v20  ;;  %v1397_v30 = vmax.f32 %v1349_v27, 0.0  ;;  %v3992_v31 = vpack.c.bf16 %v1131_v33, %v1133_v8  ;;  %v4003_v9 = vld [vmem:[%s3326_s6 + $0x24] sm:$0xf] }
 0x2b3   : > { %v2963_v42 = vpop.eup %2962  ;;  %v1308_v63 = vpack.c.bf16 %v1284_v14, %v1284_v14  ;;  %v1339_v39 = vunpack.c.l.bf16 %v1307_v17  ;;  %v1257_v10 = vunpack.c.l.bf16 %v1241_v25  ;;  %v1327_v36 = vunpack.c.l.bf16 %v3878_v19  ;;  %v4000_v19 = vld [vmem:[%s3326_s6 + $0x20] sm:$0xf] }
 0x2b4   : > { %v1424_v45 = vunpack.c.l.bf16 %v1414_v26  ;;  %v1398_v53 = vmax.f32 %v1350_v4, 0.0  ;;  %v1290_v37 = vmul.f32 0.6931472, %v2963_v42  ;;  %v1210_v11 = vunpack.c.l.bf16 %v3992_v31 }
 0x2b5   : > { %v2965_v56 = vpop.eup %2964  ;;  %v1340_v58 = vunpack.c.l.bf16 %v1308_v63  ;;  %v1355_v55 = vsub.f32 %v1323_v18, %v1339_v39  ;;  %2966 = vlog2.f32 %v1257_v10  ;;  %v1056_v2 = vunpack.c.l.bf16 %v1040_v60 }
 0x2b6   : > { %1442 = vadd.xlane.f32.xlu1 %v1424_v45  ;;  %v1413_v32 = vpack.c.bf16 %v1398_v53, %v1397_v30  ;;  %v1292_v15 = vmul.f32 0.6931472, %v2965_v56  ;;  %v1311_v57 = vpack.c.bf16 %v1290_v37, %v1290_v37  ;;  %v1328_v7 = vunpack.c.l.bf16 %v3881_v24  ;;  %v4009_v37 = vld [vmem:[%s3326_s6 + $0x38] sm:$0xf] }
 0x2b7   : > { %v1356_v3 = vsub.f32 %v1324_v59, %v1340_v58  ;;  %v1226_v12 = vmax.f32 %v1210_v11, 9.991702e-38  ;;  %v1071_v28 = vadd.f32 1.0, %v1055_v23  ;;  %v1425_v18 = vunpack.c.h.bf16 %v1414_v26 }
 0x2b8   : > { %v1422_v33 = vunpack.c.l.bf16 %v1413_v32  ;;  %v1312_v35 = vpack.c.bf16 %v1292_v15, %v1292_v15  ;;  %v1343_v51 = vunpack.c.l.bf16 %v1311_v57  ;;  %v1403_v20 = vmax.f32 %v1355_v55, 0.0  ;;  %v4014_v55 = vld [vmem:[%s3326_s6 + $0x3c] sm:$0xf] }
 0x2b9   : > { %v1242_v27 = vpack.c.bf16 %v1226_v12, %v1226_v12  ;;  %v1072_v8 = vadd.f32 1.0, %v1056_v2  ;;  %v1087_v14 = vpack.c.bf16 %v1071_v28, %v1071_v28  ;;  %v1404_v59 = vmax.f32 %v1356_v3, 0.0 }
 0x2ba   : > { %1438 = vadd.xlane.f32.xlu0 %v1422_v33  ;;  %v1344_v24 = vunpack.c.l.bf16 %v1312_v35  ;;  %v1359_v17 = vsub.f32 %v1327_v36, %v1343_v51  ;;  %v971_v25 = vxor.u32 2147516416, %v4000_v19  ;;  %v972_v42 = vxor.u32 2147516416, %v4003_v9 }
 0x2bb   : > { %v2967_v60 = vpop.eup %2966  ;;  %v1258_v4 = vunpack.c.l.bf16 %v1242_v27  ;;  %v1088_v30 = vpack.c.bf16 %v1072_v8, %v1072_v8  ;;  %v1177_v26 = vunpack.c.h.bf16 %v1087_v14  ;;  %v1178_v10 = vunpack.c.l.bf16 %v1087_v14 }
 0x2bc   : > { %v1360_v63 = vsub.f32 %v1328_v7, %v1344_v24  ;;  %v1278_v39 = vmul.f32 0.6931472, %v2967_v60  ;;  %v1321_v23 = vunpack.c.l.bf16 %v3886_v13  ;;  %v1423_v36 = vunpack.c.h.bf16 %v1413_v32 }
 0x2bd   : > { %2968 = vlog2.f32 %v1258_v4  ;;  %v1184_v45 = vunpack.c.h.bf16 %v1088_v30  ;;  %v1185_v53 = vunpack.c.l.bf16 %v1088_v30  ;;  %v4011_v56 = vpack.c.bf16 %v1404_v59, %v1403_v20 }
 0x2be   : > { %1444 = vadd.xlane.f32.xlu1 %v1425_v18  ;;  %v1305_v58 = vpack.c.bf16 %v1278_v39, %v1278_v39  ;;  %2970 = vrcp.f32 %v1177_v26  ;;  %v1407_v15 = vmax.f32 %v1359_v17, 0.0  ;;  %v987_v57 = vunpack.c.l.bf16 %v971_v25 }
 0x2bf   : > { %2972 = vrcp.f32 %v1178_v10  ;;  %v988_v2 = vunpack.c.l.bf16 %v972_v42  ;;  %v1408_v3 = vmax.f32 %v1360_v63, 0.0  ;;  %v977_v13 = vxor.u32 2147516416, %v4009_v37 }
 0x2c0   : > { %v1337_v7 = vunpack.c.l.bf16 %v1305_v58  ;;  %2974 = vrcp.f32 %v1184_v45  ;;  %v1011_v12 = vmul.f32 1.442695, %v987_v57  ;;  %v978_v32 = vxor.u32 2147516416, %v4014_v55 }
 0x2c1   : > { %2976 = vrcp.f32 %v1185_v53  ;;  %v1013_v28 = vmul.f32 1.442695, %v988_v2  ;;  %v1429_v33 = vunpack.c.h.bf16 %v4011_v56  ;;  %v993_v18 = vunpack.c.l.bf16 %v977_v13 }
 0x2c2   : > { %1440 = vadd.xlane.f32.xlu0 %v1423_v36  ;;  %2978 = vpow2.f32 %v1011_v12  ;;  %v994_v51 = vunpack.c.l.bf16 %v978_v32  ;;  %v4019_v59 = vpack.c.bf16 %v1408_v3, %v1407_v15  ;;  %v1353_v24 = vsub.f32 %v1321_v23, %v1337_v7 }
 0x2c3   : > { %v2969_v35 = vpop.eup %2968  ;;  %2980 = vpow2.f32 %v1013_v28  ;;  %v1023_v8 = vmul.f32 1.442695, %v993_v18  ;;  %v1322_v30 = vunpack.c.l.bf16 %v3889_v46  ;;  %vm1874_vm4 = vcmask 1048512  }
 0x2c4   : > { %v2971_v20 = vpop.eup %2970  ;;  %v1280_v27 = vmul.f32 0.6931472, %v2969_v35  ;;  %v1025_v25 = vmul.f32 1.442695, %v994_v51  ;;  %v1432_v53 = vunpack.c.l.bf16 %v4019_v59  ;;  %v1401_v36 = vmax.f32 %v1353_v24, 0.0 }
 0x2c5   : > { %v2973_v14 = vpop.eup %2972  ;;  %v1180_v17 = vmul.f32 %v2971_v20, %v3901_v41  ;;  %2982 = vpow2.f32 %v1023_v8  ;;  %vm2294_vm5 = vcmask 7168  }
 0x2c6   : > { %v2975_v60 = vpop.eup %2974  ;;  %1452 = vadd.xlane.f32.xlu1 %v1429_v33  ;;  %v1306_v4 = vpack.c.bf16 %v1280_v27, %v1280_v27  ;;  %v1182_v26 = vmul.f32 %v2973_v14, %v3905_v52  ;;  %2984 = vpow2.f32 %v1025_v25 }
 0x2c7   : > { %v2977_v42 = vpop.eup %2976  ;;  %v1187_v63 = vmul.f32 %v2975_v60, %v3901_v41 }
 0x2c8   : > { %v1338_v39 = vunpack.c.l.bf16 %v1306_v4  ;;  %v4025_v10 = vpack.c.bf16 %v1180_v17, %v1182_v26  ;;  %v1189_v23 = vmul.f32 %v2977_v42, %v3905_v52  ;;  %v2979_v45 = vpop.eup %2978 }
 0x2c9   : > { %v2981_v58 = vpop.eup %2980  ;;  %v1035_v2 = vpack.c.bf16 %v2979_v45, %v2979_v45 }
 0x2ca   : > { %v1354_v15 = vsub.f32 %v1322_v30, %v1338_v39  ;;  %v4029_v57 = vpack.c.bf16 %v1187_v63, %v1189_v23  ;;  %v1217_v46 = vunpack.c.l.bf16 %v4025_v10  ;;  %v1036_v3 = vpack.c.bf16 %v2981_v58, %v2981_v58 }
 0x2cb   : > { %v2983_v7 = vpop.eup %2982  ;;  %v1051_v32 = vunpack.c.l.bf16 %v1035_v2 }
 0x2cc   : > { %v1402_v13 = vmax.f32 %v1354_v15, 0.0  ;;  %v1218_v12 = vunpack.c.l.bf16 %v4029_v57  ;;  %v1233_v28 = vmax.f32 %v1217_v46, 9.991702e-38  ;;  %v2985_v33 = vpop.eup %2984  ;;  %v1052_v18 = vunpack.c.l.bf16 %v1036_v3 }
 0x2cd   : > { %v1041_v35 = vpack.c.bf16 %v2983_v7, %v2983_v7  ;;  %v1067_v8 = vadd.f32 1.0, %v1051_v32  ;;  %v1042_v24 = vpack.c.bf16 %v2985_v33, %v2985_v33 }
 0x2ce   : > { %1458 = vadd.xlane.f32.xlu1 %v1432_v53  ;;  %v1415_v51 = vpack.c.bf16 %v1402_v13, %v1401_v36  ;;  %v1234_v20 = vmax.f32 %v1218_v12, 9.991702e-38  ;;  %v1249_v27 = vpack.c.bf16 %v1233_v28, %v1233_v28  ;;  %v1068_v14 = vadd.f32 1.0, %v1052_v18 }
 0x2cf   : > { %v1057_v17 = vunpack.c.l.bf16 %v1041_v35  ;;  %v1083_v30 = vpack.c.bf16 %v1067_v8, %v1067_v8  ;;  %v1058_v42 = vunpack.c.l.bf16 %v1042_v24  ;;  %v1428_v28 = vunpack.c.l.bf16 %v4011_v56 }
 0x2d0   : > { %v1426_v25 = vunpack.c.l.bf16 %v1415_v51  ;;  %v1250_v60 = vpack.c.bf16 %v1234_v20, %v1234_v20  ;;  %v1265_v4 = vunpack.c.l.bf16 %v1249_v27  ;;  %v1084_v26 = vpack.c.bf16 %v1068_v14, %v1068_v14 }
 0x2d1   : > { %v1073_v63 = vadd.f32 1.0, %v1057_v17  ;;  %v1149_v23 = vunpack.c.h.bf16 %v1083_v30  ;;  %v1150_v45 = vunpack.c.l.bf16 %v1083_v30  ;;  %v1074_v58 = vadd.f32 1.0, %v1058_v42  ;;  %1450 = vadd.xlane.f32.xlu0 %v1428_v28 }
 0x2d2   : > { %1446 = vadd.xlane.f32.xlu2 %v1426_v25  ;;  %v1266_v39 = vunpack.c.l.bf16 %v1250_v60  ;;  %2986 = vlog2.f32 %v1265_v4  ;;  %v1156_v53 = vunpack.c.h.bf16 %v1084_v26  ;;  %v1157_v36 = vunpack.c.l.bf16 %v1084_v26 }
 0x2d3   : > { %v1089_v15 = vpack.c.bf16 %v1073_v63, %v1073_v63  ;;  %v1427_v2 = vunpack.c.h.bf16 %v1415_v51  ;;  %v1090_v3 = vpack.c.bf16 %v1074_v58, %v1074_v58  ;;  %v1329_v14 = vunpack.c.l.bf16 %v3894_v47 }
 0x2d4   : > { %2988 = vlog2.f32 %v1266_v39  ;;  %v1330_v60 = vunpack.c.l.bf16 %v3897_v40 }
 0x2d5   : > { %2990 = vrcp.f32 %v1149_v23  ;;  %v1191_v7 = vunpack.c.h.bf16 %v1089_v15  ;;  %v1192_v13 = vunpack.c.l.bf16 %v1089_v15  ;;  %v1198_v33 = vunpack.c.h.bf16 %v1090_v3 }
 0x2d6   : > { %2992 = vrcp.f32 %v1150_v45  ;;  %v1199_v18 = vunpack.c.l.bf16 %v1090_v3 }
 0x2d7   : > { %2994 = vrcp.f32 %v1156_v53 }
 0x2d8   : > { %v2987_v32 = vpop.eup %2986  ;;  %2996 = vrcp.f32 %v1157_v36 }
 0x2d9   : > { %v1294_v35 = vmul.f32 0.6931472, %v2987_v32  ;;  %2998 = vrcp.f32 %v1191_v7 }
 0x2da   : > { %v2989_v20 = vpop.eup %2988  ;;  %1448 = vadd.xlane.f32.xlu2 %v1427_v2  ;;  %3000 = vrcp.f32 %v1192_v13 }
 0x2db   : > { %v2991_v27 = vpop.eup %2990  ;;  %v1296_v51 = vmul.f32 0.6931472, %v2989_v20  ;;  %v1313_v8 = vpack.c.bf16 %v1294_v35, %v1294_v35  ;;  %3002 = vrcp.f32 %v1198_v33 }
 0x2dc   : > { %v2993_v24 = vpop.eup %2992  ;;  %v1152_v56 = vmul.f32 %v2991_v27, %v3901_v41  ;;  %3004 = vrcp.f32 %v1199_v18 }
 0x2dd   : > { %v2995_v17 = vpop.eup %2994  ;;  %v1314_v25 = vpack.c.bf16 %v1296_v51, %v1296_v51  ;;  %v1345_v4 = vunpack.c.l.bf16 %v1313_v8  ;;  %v1154_v30 = vmul.f32 %v2993_v24, %v3905_v52 }
 0x2de   : > { %v2997_v26 = vpop.eup %2996  ;;  %v1159_v42 = vmul.f32 %v2995_v17, %v3901_v41 }
 0x2df   : > { %v2999_v63 = vpop.eup %2998  ;;  %v1346_v39 = vunpack.c.l.bf16 %v1314_v25  ;;  %v1361_v23 = vsub.f32 %v1329_v14, %v1345_v4  ;;  %v4043_v45 = vpack.c.bf16 %v1152_v56, %v1154_v30  ;;  %v1161_v47 = vmul.f32 %v2997_v26, %v3905_v52 }
 0x2e0   : > { %v3001_v53 = vpop.eup %3000  ;;  %v1194_v36 = vmul.f32 %v2999_v63, %v3901_v41 }
 0x2e1   : > { %v3003_v58 = vpop.eup %3002  ;;  %v1362_v15 = vsub.f32 %v1330_v60, %v1346_v39  ;;  %v1409_v2 = vmax.f32 %v1361_v23, 0.0  ;;  %v4047_v40 = vpack.c.bf16 %v1159_v42, %v1161_v47  ;;  %v1213_v3 = vunpack.c.l.bf16 %v4043_v45 }
 0x2e2   : > { %v3005_v7 = vpop.eup %3004  ;;  %v1196_v13 = vmul.f32 %v3001_v53, %v3905_v52  ;;  %v1201_v28 = vmul.f32 %v3003_v58, %v3901_v41  ;;  %v1325_v58 = vunpack.c.l.bf16 %v4000_v19  ;;  %v1331_v19 = vunpack.c.l.bf16 %v4009_v37 }
 0x2e3   : > { %v1410_v32 = vmax.f32 %v1362_v15, 0.0  ;;  %v1214_v33 = vunpack.c.l.bf16 %v4047_v40  ;;  %v1229_v18 = vmax.f32 %v1213_v3, 9.991702e-38  ;;  %v1203_v35 = vmul.f32 %v3005_v7, %v3905_v52 }
 0x2e4   : > { %v4056_v20 = vpack.c.bf16 %v1194_v36, %v1196_v13  ;;  %v1326_v7 = vunpack.c.l.bf16 %v4003_v9 }
 0x2e5   : > { %v1419_v27 = vpack.c.bf16 %v1410_v32, %v1409_v2  ;;  %v1230_v51 = vmax.f32 %v1214_v33, 9.991702e-38  ;;  %v1245_v8 = vpack.c.bf16 %v1229_v18, %v1229_v18  ;;  %v4060_v14 = vpack.c.bf16 %v1201_v28, %v1203_v35 }
 0x2e6   : > { %v1219_v24 = vunpack.c.l.bf16 %v4056_v20 }
 0x2e7   : > { %v1435_v41 = vunpack.c.h.bf16 %v1419_v27  ;;  %v1246_v56 = vpack.c.bf16 %v1230_v51, %v1230_v51  ;;  %v1261_v17 = vunpack.c.l.bf16 %v1245_v8  ;;  %v1220_v25 = vunpack.c.l.bf16 %v4060_v14 }
 0x2e8   : > { %v1235_v60 = vmax.f32 %v1219_v24, 9.991702e-38 }
 0x2e9   : > { %1464 = vadd.xlane.f32.xlu1 %v1435_v41  ;;  %v1262_v52 = vunpack.c.l.bf16 %v1246_v56  ;;  %3006 = vlog2.f32 %v1261_v17  ;;  %v1236_v4 = vmax.f32 %v1220_v25, 9.991702e-38 }
 0x2ea   : > { %v1251_v30 = vpack.c.bf16 %v1235_v60, %v1235_v60 }
 0x2eb   : > { %3008 = vlog2.f32 %v1262_v52  ;;  %v1252_v26 = vpack.c.bf16 %v1236_v4, %v1236_v4  ;;  %v1332_v52 = vunpack.c.l.bf16 %v4014_v55 }
 0x2ec   : > { %v1267_v42 = vunpack.c.l.bf16 %v1251_v30 }
 0x2ed   : > { %v1268_v63 = vunpack.c.l.bf16 %v1252_v26 }
 0x2ee   : > { %3010 = vlog2.f32 %v1267_v42 }
 0x2ef   : > { %v3007_v39 = vpop.eup %3006  ;;  %3012 = vlog2.f32 %v1268_v63 }
 0x2f0   : > { %v1286_v23 = vmul.f32 0.6931472, %v3007_v39  ;;  %v1434_v39 = vunpack.c.l.bf16 %v1419_v27 }
 0x2f1   : > { %v3009_v47 = vpop.eup %3008  ;;  %1882 = vadd.xlane.f32.xlu1 %v1206_v0 }
 0x2f2   : > { %v1288_v53 = vmul.f32 0.6931472, %v3009_v47  ;;  %v1309_v36 = vpack.c.bf16 %v1286_v23, %v1286_v23 }
 0x2f4   : > { %v3011_v15 = vpop.eup %3010  ;;  %v1310_v2 = vpack.c.bf16 %v1288_v53, %v1288_v53  ;;  %v1341_v13 = vunpack.c.l.bf16 %v1309_v36 }
 0x2f5   : > { %v3013_v28 = vpop.eup %3012  ;;  %v1298_v32 = vmul.f32 0.6931472, %v3011_v15 }
 0x2f6   : > { %v1342_v18 = vunpack.c.l.bf16 %v1310_v2  ;;  %v1357_v35 = vsub.f32 %v1325_v58, %v1341_v13  ;;  %v1300_v51 = vmul.f32 0.6931472, %v3013_v28 }
 0x2f7   : > { %v1315_v56 = vpack.c.bf16 %v1298_v32, %v1298_v32 }
 0x2f8   : > { %v1358_v8 = vsub.f32 %v1326_v7, %v1342_v18  ;;  %v1405_v41 = vmax.f32 %v1357_v35, 0.0  ;;  %v1316_v17 = vpack.c.bf16 %v1300_v51, %v1300_v51 }
 0x2f9   : > { %1886 = vadd.xlane.f32.xlu1 %v1208_v49  ;;  %v1347_v9 = vunpack.c.l.bf16 %v1315_v56  ;;  %v1433_v49 = vunpack.c.h.bf16 %v4019_v59 }
 0x2fa   : > { %v1406_v0 = vmax.f32 %v1358_v8, 0.0  ;;  %v1348_v4 = vunpack.c.l.bf16 %v1316_v17 }
 0x2fb   : > { %v1363_v42 = vsub.f32 %v1331_v19, %v1347_v9 }
 0x2fc   : > { %v1417_v60 = vpack.c.bf16 %v1406_v0, %v1405_v41  ;;  %v1364_v63 = vsub.f32 %v1332_v52, %v1348_v4 }
 0x2fd   : > { %v1411_v23 = vmax.f32 %v1363_v42, 0.0 }
 0x2fe   : > { %v1430_v30 = vunpack.c.l.bf16 %v1417_v60  ;;  %v1431_v26 = vunpack.c.h.bf16 %v1417_v60  ;;  %v1412_v47 = vmax.f32 %v1364_v63, 0.0 }
 0x300   : > { %1454 = vadd.xlane.f32.xlu2 %v1430_v30  ;;  %1456 = vadd.xlane.f32.xlu0 %v1431_v26  ;;  %v1420_v37 = vpack.c.bf16 %v1412_v47, %v1411_v23 }
 0x301   : > { %1890 = vadd.xlane.f32.xlu1 %v1210_v11 }
 0x302   : > { %v1437_v55 = vunpack.c.h.bf16 %v1420_v37  ;;  %v1436_v53 = vunpack.c.l.bf16 %v1420_v37 }
 0x308   : > { %1462 = vadd.xlane.f32.xlu0 %v1434_v39  ;;  %1460 = vadd.xlane.f32.xlu2 %v1433_v49 }
 0x309   : > { %1894 = vadd.xlane.f32.xlu1 %v1212_v38 }
 0x310   : > { %1468 = vadd.xlane.f32.xlu0 %v1437_v55  ;;  %1466 = vadd.xlane.f32.xlu2 %v1436_v53 }
 0x311   : > { %1898 = vadd.xlane.f32.xlu1 %v1214_v33 }
 0x318   : > { %1884 = vadd.xlane.f32.xlu0 %v1207_v48  ;;  %1880 = vadd.xlane.f32.xlu2 %v1205_v54  ;;  %v3153_v48 = vmov 0  }
 0x319   : > { %1904 = vadd.xlane.f32.xlu1 %v1217_v46  ;;  %2884 = vset.pattern.permute.xlu2 %v3153_v48 }
 0x31a   : > { %2883 = vset.pattern.permute.xlu1 %v3153_v48  ;;  %2885 = vset.pattern.permute.xlu0 %v3153_v48 }
 0x320   : > { %1888 = vadd.xlane.f32.xlu0 %v1209_v61  ;;  %1900 = vadd.xlane.f32.xlu2 %v1215_v62 }
 0x321   : > { %1906 = vadd.xlane.f32.xlu1 %v1218_v12 }
 0x328   : > { %1892 = vadd.xlane.f32.xlu0 %v1211_v22 }
 0x329   : > { %1908 = vadd.xlane.f32.xlu1 %v1219_v24  ;;  %v1443_v13 = vpop.xlane.xlu1 %1442 }
 0x32a   : > { %v1503_v28 = vperm.slane %v1443_v13, 1  ;;  %v1504_v32 = vperm.slane %v1443_v13, 2  ;;  %v1505_v35 = vperm.slane %v1443_v13, 3  ;;  %v1506_v51 = vperm.slane %v1443_v13, 4 }
 0x32b   : > { %v1507_v8 = vperm.slane %v1443_v13, 5  ;;  %v1508_v41 = vperm.slane %v1443_v13, 6  ;;  %v1509_v56 = vperm.slane %v1443_v13, 7 }
 0x32d   : > { %v1439_v54 = vpop.xlane.xlu0 %1438 }
 0x32e   : > { %v1486_v38 = vperm.slane %v1439_v54, 0  ;;  %v1487_v11 = vperm.slane %v1439_v54, 1  ;;  %v1488_v61 = vperm.slane %v1439_v54, 2  ;;  %v1489_v59 = vperm.slane %v1439_v54, 3 }
 0x32f   : > { %v1490_v62 = vperm.slane %v1439_v54, 4  ;;  %v1491_v22 = vperm.slane %v1439_v54, 5  ;;  %v1492_v46 = vperm.slane %v1439_v54, 6  ;;  %v1493_v12 = vperm.slane %v1439_v54, 7 }
 0x330   : > { %1896 = vadd.xlane.f32.xlu0 %v1213_v3  ;;  %1614 = vst [vmem:[#allocation1] ss:$9 sm:$0xff] %v1486_v38 }
 0x331   : > { %1910 = vadd.xlane.f32.xlu1 %v1220_v25  ;;  %1616 = vst [vmem:[#allocation1 + $0x1] ss:$9 sm:$0xff] %v1487_v11  ;;  %v1445_v17 = vpop.xlane.xlu1 %1444 }
 0x332   : > { %1618 = vst [vmem:[#allocation1 + $0x2] ss:$9 sm:$0xff] %v1488_v61  ;;  %v1510_v0 = vperm.slane %v1445_v17, 0  ;;  %v1511_v19 = vperm.slane %v1445_v17, 1  ;;  %v1512_v60 = vperm.slane %v1445_v17, 2  ;;  %v1513_v9 = vperm.slane %v1445_v17, 3 }
 0x333   : > { %1620 = vst [vmem:[#allocation1 + $0x3] ss:$9 sm:$0xff] %v1489_v59  ;;  %v1514_v4 = vperm.slane %v1445_v17, 4  ;;  %v1515_v30 = vperm.slane %v1445_v17, 5  ;;  %v1516_v26 = vperm.slane %v1445_v17, 6  ;;  %v1517_v42 = vperm.slane %v1445_v17, 7 }
 0x334   : > { %1622 = vst [vmem:[#allocation1 + $0x4] ss:$9 sm:$0xff] %v1490_v62 }
 0x335   : > { %1624 = vst [vmem:[#allocation1 + $0x5] ss:$9 sm:$0xff] %v1491_v22  ;;  %v1441_v33 = vpop.xlane.xlu0 %1440 }
 0x336   : > { %1626 = vst [vmem:[#allocation1 + $0x6] ss:$9 sm:$0xff] %v1492_v46  ;;  %v1494_v3 = vperm.slane %v1441_v33, 0  ;;  %v1495_v27 = vperm.slane %v1441_v33, 1  ;;  %v1496_v24 = vperm.slane %v1441_v33, 2  ;;  %v1497_v58 = vperm.slane %v1441_v33, 3 }
 0x337   : > { %1628 = vst [vmem:[#allocation1 + $0x7] ss:$9 sm:$0xff] %v1493_v12  ;;  %v1498_v25 = vperm.slane %v1441_v33, 4  ;;  %v1499_v15 = vperm.slane %v1441_v33, 5  ;;  %v1500_v2 = vperm.slane %v1441_v33, 6  ;;  %v1501_v7 = vperm.slane %v1441_v33, 7 }
 0x338   : > { %1902 = vadd.xlane.f32.xlu0 %v1216_v16  ;;  %v1502_v16 = vperm.slane %v1443_v13, 0 }
 0x33e   : > { %v1629_v36 = vld [vmem:[#allocation1] sm:$0xff] }
 0x33f   : > { %1630 = vst [vmem:[#allocation1] ss:$9 sm:$0xff] %v1494_v3 }
 0x340   : > { %1631 = vst [vmem:[#allocation1 + $0x1] ss:$9 sm:$0xff] %v1495_v27 }
 0x341   : > { %1632 = vst [vmem:[#allocation1 + $0x2] ss:$9 sm:$0xff] %v1496_v24 }
 0x342   : > { %1633 = vst [vmem:[#allocation1 + $0x3] ss:$9 sm:$0xff] %v1497_v58 }
 0x343   : > { %1634 = vst [vmem:[#allocation1 + $0x4] ss:$9 sm:$0xff] %v1498_v25 }
 0x344   : > { %1635 = vst [vmem:[#allocation1 + $0x5] ss:$9 sm:$0xff] %v1499_v15  ;;  %v1451_v27 = vpop.xlane.xlu0 %1450 }
 0x345   : > { %1636 = vst [vmem:[#allocation1 + $0x6] ss:$9 sm:$0xff] %v1500_v2  ;;  %v1447_v63 = vpop.xlane.xlu2 %1446  ;;  %v1534_v24 = vperm.slane %v1451_v27, 0  ;;  %v1536_v58 = vperm.slane %v1451_v27, 2  ;;  %v1537_v15 = vperm.slane %v1451_v27, 3  ;;  %v1538_v2 = vperm.slane %v1451_v27, 4 }
 0x346   : > { %1637 = vst [vmem:[#allocation1 + $0x7] ss:$9 sm:$0xff] %v1501_v7  ;;  %v1518_v39 = vperm.slane %v1447_v63, 0  ;;  %v1519_v49 = vperm.slane %v1447_v63, 1  ;;  %v1520_v23 = vperm.slane %v1447_v63, 2  ;;  %v1521_v37 = vperm.slane %v1447_v63, 3 }
 0x347   : > { %v1522_v55 = vperm.slane %v1447_v63, 4  ;;  %v1523_v53 = vperm.slane %v1447_v63, 5  ;;  %v1524_v48 = vperm.slane %v1447_v63, 6  ;;  %v1525_v54 = vperm.slane %v1447_v63, 7 }
 0x348   : > { %v1539_v7 = vperm.slane %v1451_v27, 5  ;;  %v1540_v13 = vperm.slane %v1451_v27, 6 }
 0x34a   : > { %1766 = vperm.xlu1 %2883, %v1629_v36   ;;  %v1535_v36 = vperm.slane %v1451_v27, 1 }
 0x34d   : > { %v1638_v18 = vld [vmem:[#allocation1] sm:$0xff]  ;;  %v1449_v38 = vpop.xlane.xlu2 %1448 }
 0x34e   : > { %1639 = vst [vmem:[#allocation1] ss:$9 sm:$0xff] %v1502_v16  ;;  %1769 = vperm.xlu2 %2884, %v1638_v18   ;;  %v1526_v11 = vperm.slane %v1449_v38, 0  ;;  %v1527_v61 = vperm.slane %v1449_v38, 1  ;;  %v1528_v59 = vperm.slane %v1449_v38, 2  ;;  %v1529_v22 = vperm.slane %v1449_v38, 3 }
 0x34f   : > { %1640 = vst [vmem:[#allocation1 + $0x1] ss:$9 sm:$0xff] %v1503_v28  ;;  %v1530_v46 = vperm.slane %v1449_v38, 4  ;;  %v1531_v12 = vperm.slane %v1449_v38, 5  ;;  %v1532_v33 = vperm.slane %v1449_v38, 6  ;;  %v1533_v3 = vperm.slane %v1449_v38, 7  ;;  %v1453_v28 = vpop.xlane.xlu1 %1452 }
 0x350   : > { %1641 = vst [vmem:[#allocation1 + $0x2] ss:$9 sm:$0xff] %v1504_v32  ;;  %v1541_v16 = vperm.slane %v1451_v27, 7  ;;  %v1542_v32 = vperm.slane %v1453_v28, 0  ;;  %v1543_v18 = vperm.slane %v1453_v28, 1  ;;  %v1548_v17 = vperm.slane %v1453_v28, 6 }
 0x351   : > { %1642 = vst [vmem:[#allocation1 + $0x3] ss:$9 sm:$0xff] %v1505_v35  ;;  %v1544_v35 = vperm.slane %v1453_v28, 2 }
 0x352   : > { %1643 = vst [vmem:[#allocation1 + $0x4] ss:$9 sm:$0xff] %v1506_v51  ;;  %v1545_v51 = vperm.slane %v1453_v28, 3 }
 0x353   : > { %1644 = vst [vmem:[#allocation1 + $0x5] ss:$9 sm:$0xff] %v1507_v8 }
 0x354   : > { %1645 = vst [vmem:[#allocation1 + $0x6] ss:$9 sm:$0xff] %v1508_v41  ;;  %v1546_v41 = vperm.slane %v1453_v28, 4 }
 0x355   : > { %1646 = vst [vmem:[#allocation1 + $0x7] ss:$9 sm:$0xff] %v1509_v56  ;;  %v1547_v56 = vperm.slane %v1453_v28, 5 }
 0x35c   : > { %v1647_v52 = vld [vmem:[#allocation1] sm:$0xff] }
 0x35d   : > { %1648 = vst [vmem:[#allocation1] ss:$9 sm:$0xff] %v1510_v0  ;;  %1772 = vperm.xlu0 %2885, %v1647_v52   ;;  %v1549_v0 = vperm.slane %v1453_v28, 7 }
 0x35e   : > { %1649 = vst [vmem:[#allocation1 + $0x1] ss:$9 sm:$0xff] %v1511_v19 }
 0x35f   : > { %1650 = vst [vmem:[#allocation1 + $0x2] ss:$9 sm:$0xff] %v1512_v60 }
 0x360   : > { %1651 = vst [vmem:[#allocation1 + $0x3] ss:$9 sm:$0xff] %v1513_v9 }
 0x361   : > { %1652 = vst [vmem:[#allocation1 + $0x4] ss:$9 sm:$0xff] %v1514_v4 }
 0x362   : > { %1653 = vst [vmem:[#allocation1 + $0x5] ss:$9 sm:$0xff] %v1515_v30 }
 0x363   : > { %1654 = vst [vmem:[#allocation1 + $0x6] ss:$9 sm:$0xff] %v1516_v26 }
 0x364   : > { %1655 = vst [vmem:[#allocation1 + $0x7] ss:$9 sm:$0xff] %v1517_v42 }
 0x36b   : > { %v1656_v47 = vld [vmem:[#allocation1] sm:$0xff] }
 0x36c   : > { %1657 = vst [vmem:[#allocation1] ss:$9 sm:$0xff] %v1518_v39  ;;  %1775 = vperm.xlu2 %2884, %v1656_v47  }
 0x36d   : > { %1658 = vst [vmem:[#allocation1 + $0x1] ss:$9 sm:$0xff] %v1519_v49 }
 0x36e   : > { %1659 = vst [vmem:[#allocation1 + $0x2] ss:$9 sm:$0xff] %v1520_v23 }
 0x36f   : > { %1660 = vst [vmem:[#allocation1 + $0x3] ss:$9 sm:$0xff] %v1521_v37 }
 0x370   : > { %1661 = vst [vmem:[#allocation1 + $0x4] ss:$9 sm:$0xff] %v1522_v55 }
 0x371   : > { %1662 = vst [vmem:[#allocation1 + $0x5] ss:$9 sm:$0xff] %v1523_v53 }
 0x372   : > { %1663 = vst [vmem:[#allocation1 + $0x6] ss:$9 sm:$0xff] %v1524_v48 }
 0x373   : > { %1664 = vst [vmem:[#allocation1 + $0x7] ss:$9 sm:$0xff] %v1525_v54  ;;  %v1455_v19 = vpop.xlane.xlu2 %1454  ;;  %v1457_v49 = vpop.xlane.xlu0 %1456 }
 0x374   : > { %v1550_v60 = vperm.slane %v1455_v19, 0  ;;  %v1551_v52 = vperm.slane %v1455_v19, 1  ;;  %v1552_v9 = vperm.slane %v1455_v19, 2  ;;  %v1553_v30 = vperm.slane %v1455_v19, 3 }
 0x375   : > { %v1554_v26 = vperm.slane %v1455_v19, 4  ;;  %v1555_v42 = vperm.slane %v1455_v19, 5  ;;  %v1556_v63 = vperm.slane %v1455_v19, 6  ;;  %v1557_v39 = vperm.slane %v1455_v19, 7 }
 0x376   : > { %v1558_v23 = vperm.slane %v1457_v49, 0  ;;  %v1559_v47 = vperm.slane %v1457_v49, 1  ;;  %v1560_v37 = vperm.slane %v1457_v49, 2  ;;  %v1561_v53 = vperm.slane %v1457_v49, 3 }
 0x377   : > { %v1562_v48 = vperm.slane %v1457_v49, 4  ;;  %v1563_v54 = vperm.slane %v1457_v49, 5  ;;  %v1564_v38 = vperm.slane %v1457_v49, 6 }
 0x37a   : > { %v1665_v62 = vld [vmem:[#allocation1] sm:$0xff] }
 0x37b   : > { %1666 = vst [vmem:[#allocation1] ss:$9 sm:$0xff] %v1526_v11  ;;  %1778 = vperm.xlu1 %2883, %v1665_v62   ;;  %v1565_v11 = vperm.slane %v1457_v49, 7 }
 0x37c   : > { %1667 = vst [vmem:[#allocation1 + $0x1] ss:$9 sm:$0xff] %v1527_v61  ;;  %v1459_v61 = vpop.xlane.xlu1 %1458 }
 0x37d   : > { %1668 = vst [vmem:[#allocation1 + $0x2] ss:$9 sm:$0xff] %v1528_v59  ;;  %v1566_v59 = vperm.slane %v1459_v61, 0  ;;  %v1567_v62 = vperm.slane %v1459_v61, 1  ;;  %v1572_v27 = vperm.slane %v1459_v61, 6 }
 0x37e   : > { %1669 = vst [vmem:[#allocation1 + $0x3] ss:$9 sm:$0xff] %v1529_v22  ;;  %v1568_v22 = vperm.slane %v1459_v61, 2 }
 0x37f   : > { %1670 = vst [vmem:[#allocation1 + $0x4] ss:$9 sm:$0xff] %v1530_v46  ;;  %v1569_v46 = vperm.slane %v1459_v61, 3 }
 0x380   : > { %1671 = vst [vmem:[#allocation1 + $0x5] ss:$9 sm:$0xff] %v1531_v12 }
 0x381   : > { %1672 = vst [vmem:[#allocation1 + $0x6] ss:$9 sm:$0xff] %v1532_v33  ;;  %v1570_v33 = vperm.slane %v1459_v61, 4 }
 0x382   : > { %1673 = vst [vmem:[#allocation1 + $0x7] ss:$9 sm:$0xff] %v1533_v3  ;;  %v1571_v3 = vperm.slane %v1459_v61, 5 }
 0x389   : > { %v1674_v25 = vld [vmem:[#allocation1] sm:$0xff] }
 0x38a   : > { %1675 = vst [vmem:[#allocation1] ss:$9 sm:$0xff] %v1534_v24  ;;  %1781 = vperm.xlu2 %2884, %v1674_v25   ;;  %v1573_v24 = vperm.slane %v1459_v61, 7 }
 0x38b   : > { %1676 = vst [vmem:[#allocation1 + $0x1] ss:$9 sm:$0xff] %v1535_v36  ;;  %v1461_v36 = vpop.xlane.xlu2 %1460 }
 0x38c   : > { %1677 = vst [vmem:[#allocation1 + $0x2] ss:$9 sm:$0xff] %v1536_v58  ;;  %v1574_v58 = vperm.slane %v1461_v36, 0  ;;  %v1575_v25 = vperm.slane %v1461_v36, 1  ;;  %v1580_v28 = vperm.slane %v1461_v36, 6 }
 0x38d   : > { %1678 = vst [vmem:[#allocation1 + $0x3] ss:$9 sm:$0xff] %v1537_v15  ;;  %v1576_v15 = vperm.slane %v1461_v36, 2 }
 0x38e   : > { %1679 = vst [vmem:[#allocation1 + $0x4] ss:$9 sm:$0xff] %v1538_v2 }
 0x38f   : > { %1680 = vst [vmem:[#allocation1 + $0x5] ss:$9 sm:$0xff] %v1539_v7  ;;  %v1577_v7 = vperm.slane %v1461_v36, 3 }
 0x390   : > { %1681 = vst [vmem:[#allocation1 + $0x6] ss:$9 sm:$0xff] %v1540_v13  ;;  %v1578_v13 = vperm.slane %v1461_v36, 4 }
 0x391   : > { %1682 = vst [vmem:[#allocation1 + $0x7] ss:$9 sm:$0xff] %v1541_v16  ;;  %v1579_v16 = vperm.slane %v1461_v36, 5 }
 0x398   : > { %v1683_v8 = vld [vmem:[#allocation1] sm:$0xff] }
 0x399   : > { %1684 = vst [vmem:[#allocation1] ss:$9 sm:$0xff] %v1542_v32  ;;  %1784 = vperm.xlu1 %2883, %v1683_v8   ;;  %v1581_v32 = vperm.slane %v1461_v36, 7 }
 0x39a   : > { %1685 = vst [vmem:[#allocation1 + $0x1] ss:$9 sm:$0xff] %v1543_v18  ;;  %v1463_v18 = vpop.xlane.xlu0 %1462 }
 0x39b   : > { %1686 = vst [vmem:[#allocation1 + $0x2] ss:$9 sm:$0xff] %v1544_v35  ;;  %v1582_v35 = vperm.slane %v1463_v18, 0  ;;  %v1584_v8 = vperm.slane %v1463_v18, 2  ;;  %v1588_v19 = vperm.slane %v1463_v18, 6 }
 0x39c   : > { %1687 = vst [vmem:[#allocation1 + $0x3] ss:$9 sm:$0xff] %v1545_v51  ;;  %v1583_v51 = vperm.slane %v1463_v18, 1 }
 0x39d   : > { %1688 = vst [vmem:[#allocation1 + $0x4] ss:$9 sm:$0xff] %v1546_v41 }
 0x39e   : > { %1689 = vst [vmem:[#allocation1 + $0x5] ss:$9 sm:$0xff] %v1547_v56  ;;  %v1585_v56 = vperm.slane %v1463_v18, 3 }
 0x39f   : > { %1690 = vst [vmem:[#allocation1 + $0x6] ss:$9 sm:$0xff] %v1548_v17  ;;  %v1586_v17 = vperm.slane %v1463_v18, 4 }
 0x3a0   : > { %1691 = vst [vmem:[#allocation1 + $0x7] ss:$9 sm:$0xff] %v1549_v0  ;;  %v1587_v0 = vperm.slane %v1463_v18, 5 }
 0x3a7   : > { %v1692_v4 = vld [vmem:[#allocation1] sm:$0xff] }
 0x3a8   : > { %1693 = vst [vmem:[#allocation1] ss:$9 sm:$0xff] %v1550_v60  ;;  %1787 = vperm.xlu2 %2884, %v1692_v4   ;;  %v1589_v60 = vperm.slane %v1463_v18, 7 }
 0x3a9   : > { %1694 = vst [vmem:[#allocation1 + $0x1] ss:$9 sm:$0xff] %v1551_v52  ;;  %v1465_v52 = vpop.xlane.xlu1 %1464 }
 0x3aa   : > { %1695 = vst [vmem:[#allocation1 + $0x2] ss:$9 sm:$0xff] %v1552_v9  ;;  %v1590_v9 = vperm.slane %v1465_v52, 0  ;;  %v1591_v4 = vperm.slane %v1465_v52, 1  ;;  %v1596_v49 = vperm.slane %v1465_v52, 6 }
 0x3ab   : > { %1696 = vst [vmem:[#allocation1 + $0x3] ss:$9 sm:$0xff] %v1553_v30  ;;  %v1592_v30 = vperm.slane %v1465_v52, 2 }
 0x3ac   : > { %1697 = vst [vmem:[#allocation1 + $0x4] ss:$9 sm:$0xff] %v1554_v26  ;;  %v1593_v26 = vperm.slane %v1465_v52, 3 }
 0x3ad   : > { %1698 = vst [vmem:[#allocation1 + $0x5] ss:$9 sm:$0xff] %v1555_v42 }
 0x3ae   : > { %1699 = vst [vmem:[#allocation1 + $0x6] ss:$9 sm:$0xff] %v1556_v63  ;;  %v1594_v63 = vperm.slane %v1465_v52, 4 }
 0x3af   : > { %1700 = vst [vmem:[#allocation1 + $0x7] ss:$9 sm:$0xff] %v1557_v39  ;;  %v1595_v39 = vperm.slane %v1465_v52, 5 }
 0x3b6   : > { %v1701_v55 = vld [vmem:[#allocation1] sm:$0xff] }
 0x3b7   : > { %1702 = vst [vmem:[#allocation1] ss:$9 sm:$0xff] %v1558_v23  ;;  %1790 = vperm.xlu1 %2883, %v1701_v55   ;;  %v1597_v23 = vperm.slane %v1465_v52, 7 }
 0x3b8   : > { %1703 = vst [vmem:[#allocation1 + $0x1] ss:$9 sm:$0xff] %v1559_v47  ;;  %v1467_v47 = vpop.xlane.xlu2 %1466 }
 0x3b9   : > { %1704 = vst [vmem:[#allocation1 + $0x2] ss:$9 sm:$0xff] %v1560_v37  ;;  %v1598_v37 = vperm.slane %v1467_v47, 0  ;;  %v1599_v55 = vperm.slane %v1467_v47, 1  ;;  %v1604_v61 = vperm.slane %v1467_v47, 6 }
 0x3ba   : > { %1705 = vst [vmem:[#allocation1 + $0x3] ss:$9 sm:$0xff] %v1561_v53  ;;  %v1600_v53 = vperm.slane %v1467_v47, 2 }
 0x3bb   : > { %1706 = vst [vmem:[#allocation1 + $0x4] ss:$9 sm:$0xff] %v1562_v48  ;;  %v1601_v48 = vperm.slane %v1467_v47, 3 }
 0x3bc   : > { %1707 = vst [vmem:[#allocation1 + $0x5] ss:$9 sm:$0xff] %v1563_v54 }
 0x3bd   : > { %1708 = vst [vmem:[#allocation1 + $0x6] ss:$9 sm:$0xff] %v1564_v38  ;;  %v1602_v38 = vperm.slane %v1467_v47, 4 }
 0x3be   : > { %1709 = vst [vmem:[#allocation1 + $0x7] ss:$9 sm:$0xff] %v1565_v11  ;;  %v1603_v11 = vperm.slane %v1467_v47, 5 }
 0x3c5   : > { %v1710_v12 = vld [vmem:[#allocation1] sm:$0xff] }
 0x3c6   : > { %1711 = vst [vmem:[#allocation1] ss:$9 sm:$0xff] %v1566_v59  ;;  %1793 = vperm.xlu0 %2885, %v1710_v12   ;;  %v1605_v59 = vperm.slane %v1467_v47, 7 }
 0x3c7   : > { %1712 = vst [vmem:[#allocation1 + $0x1] ss:$9 sm:$0xff] %v1567_v62  ;;  %v1469_v62 = vpop.xlane.xlu0 %1468 }
 0x3c8   : > { %1713 = vst [vmem:[#allocation1 + $0x2] ss:$9 sm:$0xff] %v1568_v22  ;;  %v1606_v22 = vperm.slane %v1469_v62, 0  ;;  %v1608_v12 = vperm.slane %v1469_v62, 2  ;;  %v1612_v36 = vperm.slane %v1469_v62, 6 }
 0x3c9   : > { %1714 = vst [vmem:[#allocation1 + $0x3] ss:$9 sm:$0xff] %v1569_v46  ;;  %v1607_v46 = vperm.slane %v1469_v62, 1 }
 0x3ca   : > { %1715 = vst [vmem:[#allocation1 + $0x4] ss:$9 sm:$0xff] %v1570_v33 }
 0x3cb   : > { %1716 = vst [vmem:[#allocation1 + $0x5] ss:$9 sm:$0xff] %v1571_v3  ;;  %v1609_v3 = vperm.slane %v1469_v62, 3 }
 0x3cc   : > { %1717 = vst [vmem:[#allocation1 + $0x6] ss:$9 sm:$0xff] %v1572_v27  ;;  %v1610_v27 = vperm.slane %v1469_v62, 4 }
 0x3cd   : > { %1718 = vst [vmem:[#allocation1 + $0x7] ss:$9 sm:$0xff] %v1573_v24  ;;  %v1611_v24 = vperm.slane %v1469_v62, 5 }
 0x3d4   : > { %v1719_v2 = vld [vmem:[#allocation1] sm:$0xff] }
 0x3d5   : > { %1720 = vst [vmem:[#allocation1] ss:$9 sm:$0xff] %v1574_v58  ;;  %1796 = vperm.xlu2 %2884, %v1719_v2   ;;  %v1613_v58 = vperm.slane %v1469_v62, 7 }
 0x3d6   : > { %1721 = vst [vmem:[#allocation1 + $0x1] ss:$9 sm:$0xff] %v1575_v25  ;;  %v1881_v25 = vpop.xlane.xlu2 %1880 }
 0x3d7   : > { %1722 = vst [vmem:[#allocation1 + $0x2] ss:$9 sm:$0xff] %v1576_v15  ;;  %v1928_v15 = vperm.slane %v1881_v25, 0  ;;  %v1929_v2 = vperm.slane %v1881_v25, 1  ;;  %v1934_v18 = vperm.slane %v1881_v25, 6 }
 0x3d8   : > { %1723 = vst [vmem:[#allocation1 + $0x3] ss:$9 sm:$0xff] %v1577_v7  ;;  %v1930_v7 = vperm.slane %v1881_v25, 2 }
 0x3d9   : > { %1724 = vst [vmem:[#allocation1 + $0x4] ss:$9 sm:$0xff] %v1578_v13  ;;  %v1931_v13 = vperm.slane %v1881_v25, 3 }
 0x3da   : > { %1725 = vst [vmem:[#allocation1 + $0x5] ss:$9 sm:$0xff] %v1579_v16 }
 0x3db   : > { %1726 = vst [vmem:[#allocation1 + $0x6] ss:$9 sm:$0xff] %v1580_v28  ;;  %v1932_v28 = vperm.slane %v1881_v25, 4 }
 0x3dc   : > { %1727 = vst [vmem:[#allocation1 + $0x7] ss:$9 sm:$0xff] %v1581_v32  ;;  %v1933_v32 = vperm.slane %v1881_v25, 5 }
 0x3e3   : > { %v1728_v41 = vld [vmem:[#allocation1] sm:$0xff] }
 0x3e4   : > { %1729 = vst [vmem:[#allocation1] ss:$9 sm:$0xff] %v1582_v35  ;;  %1799 = vperm.xlu2 %2884, %v1728_v41   ;;  %v1935_v35 = vperm.slane %v1881_v25, 7 }
 0x3e5   : > { %1730 = vst [vmem:[#allocation1 + $0x1] ss:$9 sm:$0xff] %v1583_v51  ;;  %v1883_v51 = vpop.xlane.xlu1 %1882 }
 0x3e6   : > { %1731 = vst [vmem:[#allocation1 + $0x2] ss:$9 sm:$0xff] %v1584_v8  ;;  %v1936_v8 = vperm.slane %v1883_v51, 0  ;;  %v1937_v41 = vperm.slane %v1883_v51, 1  ;;  %v1942_v52 = vperm.slane %v1883_v51, 6 }
 0x3e7   : > { %1732 = vst [vmem:[#allocation1 + $0x3] ss:$9 sm:$0xff] %v1585_v56  ;;  %v1938_v56 = vperm.slane %v1883_v51, 2 }
 0x3e8   : > { %1733 = vst [vmem:[#allocation1 + $0x4] ss:$9 sm:$0xff] %v1586_v17  ;;  %v1939_v17 = vperm.slane %v1883_v51, 3 }
 0x3e9   : > { %1734 = vst [vmem:[#allocation1 + $0x5] ss:$9 sm:$0xff] %v1587_v0 }
 0x3ea   : > { %1735 = vst [vmem:[#allocation1 + $0x6] ss:$9 sm:$0xff] %v1588_v19  ;;  %v1940_v19 = vperm.slane %v1883_v51, 4 }
 0x3eb   : > { %1736 = vst [vmem:[#allocation1 + $0x7] ss:$9 sm:$0xff] %v1589_v60  ;;  %v1941_v60 = vperm.slane %v1883_v51, 5 }
 0x3f2   : > { %v1737_v42 = vld [vmem:[#allocation1] sm:$0xff] }
 0x3f3   : > { %1738 = vst [vmem:[#allocation1] ss:$9 sm:$0xff] %v1590_v9  ;;  %1802 = vperm.xlu0 %2885, %v1737_v42   ;;  %v1943_v9 = vperm.slane %v1883_v51, 7 }
 0x3f4   : > { %1739 = vst [vmem:[#allocation1 + $0x1] ss:$9 sm:$0xff] %v1591_v4  ;;  %v1885_v4 = vpop.xlane.xlu0 %1884 }
 0x3f5   : > { %1740 = vst [vmem:[#allocation1 + $0x2] ss:$9 sm:$0xff] %v1592_v30  ;;  %v1944_v30 = vperm.slane %v1885_v4, 0  ;;  %v1946_v42 = vperm.slane %v1885_v4, 2  ;;  %v1950_v47 = vperm.slane %v1885_v4, 6 }
 0x3f6   : > { %1741 = vst [vmem:[#allocation1 + $0x3] ss:$9 sm:$0xff] %v1593_v26  ;;  %v1945_v26 = vperm.slane %v1885_v4, 1 }
 0x3f7   : > { %1742 = vst [vmem:[#allocation1 + $0x4] ss:$9 sm:$0xff] %v1594_v63 }
 0x3f8   : > { %1743 = vst [vmem:[#allocation1 + $0x5] ss:$9 sm:$0xff] %v1595_v39  ;;  %v1947_v39 = vperm.slane %v1885_v4, 3 }
 0x3f9   : > { %1744 = vst [vmem:[#allocation1 + $0x6] ss:$9 sm:$0xff] %v1596_v49  ;;  %v1948_v49 = vperm.slane %v1885_v4, 4 }
 0x3fa   : > { %1745 = vst [vmem:[#allocation1 + $0x7] ss:$9 sm:$0xff] %v1597_v23  ;;  %v1949_v23 = vperm.slane %v1885_v4, 5 }
 0x401   : > { %v1746_v54 = vld [vmem:[#allocation1] sm:$0xff] }
 0x402   : > { %1747 = vst [vmem:[#allocation1] ss:$9 sm:$0xff] %v1598_v37  ;;  %1805 = vperm.xlu0 %2885, %v1746_v54   ;;  %v1951_v37 = vperm.slane %v1885_v4, 7 }
 0x403   : > { %1748 = vst [vmem:[#allocation1 + $0x1] ss:$9 sm:$0xff] %v1599_v55  ;;  %v1887_v55 = vpop.xlane.xlu1 %1886 }
 0x404   : > { %1749 = vst [vmem:[#allocation1 + $0x2] ss:$9 sm:$0xff] %v1600_v53  ;;  %v1952_v53 = vperm.slane %v1887_v55, 0  ;;  %v1954_v54 = vperm.slane %v1887_v55, 2  ;;  %v1958_v62 = vperm.slane %v1887_v55, 6 }
 0x405   : > { %1750 = vst [vmem:[#allocation1 + $0x3] ss:$9 sm:$0xff] %v1601_v48  ;;  %v1953_v48 = vperm.slane %v1887_v55, 1 }
 0x406   : > { %1751 = vst [vmem:[#allocation1 + $0x4] ss:$9 sm:$0xff] %v1602_v38  ;;  %v1955_v38 = vperm.slane %v1887_v55, 3 }
 0x407   : > { %1752 = vst [vmem:[#allocation1 + $0x5] ss:$9 sm:$0xff] %v1603_v11 }
 0x408   : > { %1753 = vst [vmem:[#allocation1 + $0x6] ss:$9 sm:$0xff] %v1604_v61  ;;  %v1956_v61 = vperm.slane %v1887_v55, 4 }
 0x409   : > { %1754 = vst [vmem:[#allocation1 + $0x7] ss:$9 sm:$0xff] %v1605_v59  ;;  %v1957_v59 = vperm.slane %v1887_v55, 5 }
 0x410   : > { %v1755_v33 = vld [vmem:[#allocation1] sm:$0xff] }
 0x411   : > { %1756 = vst [vmem:[#allocation1] ss:$9 sm:$0xff] %v1606_v22  ;;  %1808 = vperm.xlu1 %2883, %v1755_v33   ;;  %v1959_v22 = vperm.slane %v1887_v55, 7 }
 0x412   : > { %1757 = vst [vmem:[#allocation1 + $0x1] ss:$9 sm:$0xff] %v1607_v46  ;;  %v1889_v46 = vpop.xlane.xlu0 %1888 }
 0x413   : > { %1758 = vst [vmem:[#allocation1 + $0x2] ss:$9 sm:$0xff] %v1608_v12  ;;  %v1960_v12 = vperm.slane %v1889_v46, 0  ;;  %v1961_v33 = vperm.slane %v1889_v46, 1  ;;  %v1966_v25 = vperm.slane %v1889_v46, 6 }
 0x414   : > { %1759 = vst [vmem:[#allocation1 + $0x3] ss:$9 sm:$0xff] %v1609_v3  ;;  %v1962_v3 = vperm.slane %v1889_v46, 2 }
 0x415   : > { %1760 = vst [vmem:[#allocation1 + $0x4] ss:$9 sm:$0xff] %v1610_v27 }
 0x416   : > { %1761 = vst [vmem:[#allocation1 + $0x5] ss:$9 sm:$0xff] %v1611_v24  ;;  %v1963_v24 = vperm.slane %v1889_v46, 3 }
 0x417   : > { %1762 = vst [vmem:[#allocation1 + $0x6] ss:$9 sm:$0xff] %v1612_v36  ;;  %v1964_v36 = vperm.slane %v1889_v46, 4 }
 0x418   : > { %1763 = vst [vmem:[#allocation1 + $0x7] ss:$9 sm:$0xff] %v1613_v58  ;;  %v1965_v58 = vperm.slane %v1889_v46, 5 }
 0x41f   : > { %v1764_v16 = vld [vmem:[#allocation1] sm:$0xff] }
 0x420   : > { %2056 = vst [vmem:[#allocation1] ss:$9 sm:$0xff] %v1928_v15  ;;  %1811 = vperm.xlu0 %2885, %v1764_v16   ;;  %v1967_v15 = vperm.slane %v1889_v46, 7 }
 0x421   : > { %2058 = vst [vmem:[#allocation1 + $0x1] ss:$9 sm:$0xff] %v1929_v2  ;;  %v1891_v2 = vpop.xlane.xlu1 %1890 }
 0x422   : > { %2060 = vst [vmem:[#allocation1 + $0x2] ss:$9 sm:$0xff] %v1930_v7  ;;  %v1968_v7 = vperm.slane %v1891_v2, 0  ;;  %v1970_v16 = vperm.slane %v1891_v2, 2  ;;  %v1974_v51 = vperm.slane %v1891_v2, 6 }
 0x423   : > { %2062 = vst [vmem:[#allocation1 + $0x3] ss:$9 sm:$0xff] %v1931_v13  ;;  %v1969_v13 = vperm.slane %v1891_v2, 1 }
 0x424   : > { %2064 = vst [vmem:[#allocation1 + $0x4] ss:$9 sm:$0xff] %v1932_v28  ;;  %v1971_v28 = vperm.slane %v1891_v2, 3 }
 0x425   : > { %2066 = vst [vmem:[#allocation1 + $0x5] ss:$9 sm:$0xff] %v1933_v32 }
 0x426   : > { %2068 = vst [vmem:[#allocation1 + $0x6] ss:$9 sm:$0xff] %v1934_v18  ;;  %v1972_v18 = vperm.slane %v1891_v2, 4 }
 0x427   : > { %2070 = vst [vmem:[#allocation1 + $0x7] ss:$9 sm:$0xff] %v1935_v35  ;;  %v1973_v35 = vperm.slane %v1891_v2, 5 }
 0x42e   : > { %v2071_v0 = vld [vmem:[#allocation1] sm:$0xff] }
 0x42f   : > { %2072 = vst [vmem:[#allocation1] ss:$9 sm:$0xff] %v1936_v8  ;;  %2208 = vperm.xlu2 %2884, %v2071_v0   ;;  %v1975_v8 = vperm.slane %v1891_v2, 7 }
 0x430   : > { %2073 = vst [vmem:[#allocation1 + $0x1] ss:$9 sm:$0xff] %v1937_v41  ;;  %v1893_v41 = vpop.xlane.xlu0 %1892 }
 0x431   : > { %2074 = vst [vmem:[#allocation1 + $0x2] ss:$9 sm:$0xff] %v1938_v56  ;;  %v1895_v56 = vpop.xlane.xlu1 %1894  ;;  %v1977_v0 = vperm.slane %v1893_v41, 1  ;;  %v1981_v4 = vperm.slane %v1893_v41, 5 }
 0x432   : > { %2075 = vst [vmem:[#allocation1 + $0x3] ss:$9 sm:$0xff] %v1939_v17  ;;  %v1976_v17 = vperm.slane %v1893_v41, 0  ;;  %v1989_v55 = vperm.slane %v1895_v56, 5 }
 0x433   : > { %2076 = vst [vmem:[#allocation1 + $0x4] ss:$9 sm:$0xff] %v1940_v19  ;;  %v1978_v19 = vperm.slane %v1893_v41, 2 }
 0x434   : > { %2077 = vst [vmem:[#allocation1 + $0x5] ss:$9 sm:$0xff] %v1941_v60 }
 0x435   : > { %2078 = vst [vmem:[#allocation1 + $0x6] ss:$9 sm:$0xff] %v1942_v52  ;;  %v1979_v52 = vperm.slane %v1893_v41, 3 }
 0x436   : > { %2079 = vst [vmem:[#allocation1 + $0x7] ss:$9 sm:$0xff] %v1943_v9  ;;  %v1980_v9 = vperm.slane %v1893_v41, 4 }
 0x43d   : > { %v2080_v63 = vld [vmem:[#allocation1] sm:$0xff] }
 0x43e   : > { %2081 = vst [vmem:[#allocation1] ss:$9 sm:$0xff] %v1944_v30  ;;  %2211 = vperm.xlu0 %2885, %v2080_v63   ;;  %v1982_v30 = vperm.slane %v1893_v41, 6  ;;  %v1984_v63 = vperm.slane %v1895_v56, 0 }
 0x43f   : > { %2082 = vst [vmem:[#allocation1 + $0x1] ss:$9 sm:$0xff] %v1945_v26  ;;  %v1983_v26 = vperm.slane %v1893_v41, 7 }
 0x440   : > { %2083 = vst [vmem:[#allocation1 + $0x2] ss:$9 sm:$0xff] %v1946_v42  ;;  %v4105_v42 = vpop.xlane.xlu1 %1898 }
 0x441   : > { %2084 = vst [vmem:[#allocation1 + $0x3] ss:$9 sm:$0xff] %v1947_v39  ;;  %v1985_v39 = vperm.slane %v1895_v56, 1  ;;  %v2004_v41 = vperm.slane %v4105_v42, 4 }
 0x442   : > { %2085 = vst [vmem:[#allocation1 + $0x4] ss:$9 sm:$0xff] %v1948_v49  ;;  %v1986_v49 = vperm.slane %v1895_v56, 2 }
 0x443   : > { %2086 = vst [vmem:[#allocation1 + $0x5] ss:$9 sm:$0xff] %v1949_v23  ;;  %v1987_v23 = vperm.slane %v1895_v56, 3 }
 0x444   : > { %2087 = vst [vmem:[#allocation1 + $0x6] ss:$9 sm:$0xff] %v1950_v47 }
 0x445   : > { %2088 = vst [vmem:[#allocation1 + $0x7] ss:$9 sm:$0xff] %v1951_v37  ;;  %v1988_v37 = vperm.slane %v1895_v56, 4 }
 0x44c   : > { %v2089_v11 = vld [vmem:[#allocation1] sm:$0xff] }
 0x44d   : > { %2090 = vst [vmem:[#allocation1] ss:$9 sm:$0xff] %v1952_v53  ;;  %2214 = vperm.xlu0 %2885, %v2089_v11   ;;  %v4107_v53 = vpop.xlane.xlu1 %1904  ;;  %v2392_v11 = vunpack.c.l.b16 %v4060_v14 }
 0x44e   : > { %2091 = vst [vmem:[#allocation1 + $0x1] ss:$9 sm:$0xff] %v1953_v48  ;;  %v1990_v48 = vperm.slane %v1895_v56, 6 }
 0x44f   : > { %2092 = vst [vmem:[#allocation1 + $0x2] ss:$9 sm:$0xff] %v1954_v54  ;;  %v1991_v54 = vperm.slane %v1895_v56, 7  ;;  %v2006_v56 = vperm.slane %v4105_v42, 6 }
 0x450   : > { %2093 = vst [vmem:[#allocation1 + $0x3] ss:$9 sm:$0xff] %v1955_v38  ;;  %v2391_v38 = vunpack.c.l.b16 %v4056_v20 }
 0x451   : > { %2094 = vst [vmem:[#allocation1 + $0x4] ss:$9 sm:$0xff] %v1956_v61  ;;  %v2716_v61 = vld [vmem:[%s3326_s6 + $0x38] sm:$0xff] }
 0x452   : > { %2095 = vst [vmem:[#allocation1 + $0x5] ss:$9 sm:$0xff] %v1957_v59  ;;  %v2400_v59 = vpack.c.b16 %v2392_v11, %v2391_v38  ;;  %2345 = vmatpush.bf16.xpose.msra.mxu0 %v2716_v61  ;;  %v2712_v61 = vld [vmem:[%s3326_s6 + $0x18] sm:$0xff] }
 0x453   : > { %2096 = vst [vmem:[#allocation1 + $0x6] ss:$9 sm:$0xff] %v1958_v62  ;;  %v1897_v62 = vpop.xlane.xlu0 %1896 }
 0x454   : > { %2097 = vst [vmem:[#allocation1 + $0x7] ss:$9 sm:$0xff] %v1959_v22  ;;  %2409 = vmatpush.bf16.xpose.msra.mxu1 %v2400_v59  ;;  %v1992_v46 = vperm.slane %v1897_v62, 0  ;;  %v1994_v20 = vperm.slane %v1897_v62, 2  ;;  %v1995_v14 = vperm.slane %v1897_v62, 3  ;;  %v1999_v2 = vperm.slane %v1897_v62, 7 }
 0x455   : > { %v4112_v22 = vpop.xlane.xlu1 %1906  ;;  %v2383_v59 = vunpack.c.l.b16 %v3940_v6 }
 0x45b   : > { %v2098_v27 = vld [vmem:[#allocation1] sm:$0xff] }
 0x45c   : > { %2099 = vst [vmem:[#allocation1] ss:$9 sm:$0xff] %v1960_v12  ;;  %2217 = vperm.xlu1 %2883, %v2098_v27   ;;  %v1993_v12 = vperm.slane %v1897_v62, 1 }
 0x45d   : > { %2100 = vst [vmem:[#allocation1 + $0x1] ss:$9 sm:$0xff] %v1961_v33  ;;  %v2389_v33 = vunpack.c.l.b16 %v4025_v10  ;;  %v4117_v10 = vpop.xlane.xlu1 %1908 }
 0x45e   : > { %2101 = vst [vmem:[#allocation1 + $0x2] ss:$9 sm:$0xff] %v1962_v3  ;;  %v2390_v3 = vunpack.c.l.b16 %v4029_v57  ;;  %v1901_v57 = vpop.xlane.xlu2 %1900 }
 0x45f   : > { %2102 = vst [vmem:[#allocation1 + $0x3] ss:$9 sm:$0xff] %v1963_v24  ;;  %v2715_v24 = vld [vmem:[%s3326_s6 + $0x30] sm:$0xff] }
 0x460   : > { %2103 = vst [vmem:[#allocation1 + $0x4] ss:$9 sm:$0xff] %v1964_v36  ;;  %v2399_v36 = vpack.c.b16 %v2390_v3, %v2389_v33  ;;  %2346 = vmatpush.bf16.xpose.msra.mxu0 %v2715_v24 }
 0x461   : > { %2104 = vst [vmem:[#allocation1 + $0x5] ss:$9 sm:$0xff] %v1965_v58  ;;  %v1996_v58 = vperm.slane %v1897_v62, 4 }
 0x462   : > { %2105 = vst [vmem:[#allocation1 + $0x6] ss:$9 sm:$0xff] %v1966_v25  ;;  %v1997_v25 = vperm.slane %v1897_v62, 5  ;;  %2410 = vmatpush.bf16.xpose.msra.mxu1 %v2399_v36 }
 0x463   : > { %2106 = vst [vmem:[#allocation1 + $0x7] ss:$9 sm:$0xff] %v1967_v15  ;;  %v1998_v15 = vperm.slane %v1897_v62, 6  ;;  %v2384_v62 = vunpack.c.l.b16 %v3947_v1 }
 0x46a   : > { %v2107_v32 = vld [vmem:[#allocation1] sm:$0xff] }
 0x46b   : > { %2108 = vst [vmem:[#allocation1] ss:$9 sm:$0xff] %v1968_v7  ;;  %2220 = vperm.xlu0 %2885, %v2107_v32   ;;  %v2714_v7 = vld [vmem:[%s3326_s6 + $0x28] sm:$0xff]  ;;  %v2000_v32 = vperm.slane %v4105_v42, 0 }
 0x46c   : > { %2109 = vst [vmem:[#allocation1 + $0x1] ss:$9 sm:$0xff] %v1969_v13  ;;  %v2387_v13 = vunpack.c.l.b16 %v3955_v43  ;;  %2347 = vmatpush.bf16.xpose.msra.mxu0 %v2714_v7  ;;  %v2005_v43 = vperm.slane %v4105_v42, 5 }
 0x46d   : > { %2110 = vst [vmem:[#allocation1 + $0x2] ss:$9 sm:$0xff] %v1970_v16  ;;  %v2388_v16 = vunpack.c.l.b16 %v3961_v44  ;;  %v4128_v44 = vpop.xlane.xlu1 %1910 }
 0x46e   : > { %2111 = vst [vmem:[#allocation1 + $0x3] ss:$9 sm:$0xff] %v1971_v28 }
 0x46f   : > { %2112 = vst [vmem:[#allocation1 + $0x4] ss:$9 sm:$0xff] %v1972_v18  ;;  %v2398_v28 = vpack.c.b16 %v2388_v16, %v2387_v13  ;;  %v2001_v18 = vperm.slane %v4105_v42, 1 }
 0x470   : > { %2113 = vst [vmem:[#allocation1 + $0x5] ss:$9 sm:$0xff] %v1973_v35  ;;  %v2002_v35 = vperm.slane %v4105_v42, 2 }
 0x471   : > { %2114 = vst [vmem:[#allocation1 + $0x6] ss:$9 sm:$0xff] %v1974_v51  ;;  %2411 = vmatpush.bf16.xpose.msra.mxu1 %v2398_v28  ;;  %v2003_v51 = vperm.slane %v4105_v42, 3 }
 0x472   : > { %2115 = vst [vmem:[#allocation1 + $0x7] ss:$9 sm:$0xff] %v1975_v8 }
 0x479   : > { %v2116_v60 = vld [vmem:[#allocation1] sm:$0xff] }
 0x47a   : > { %2117 = vst [vmem:[#allocation1] ss:$9 sm:$0xff] %v1976_v17  ;;  %2223 = vperm.xlu2 %2884, %v2116_v60   ;;  %v4131_v17 = vpop.permute.xlu2 %1769  ;;  %v2385_v60 = vunpack.c.l.b16 %v4043_v45  ;;  %v1813_v45 = vlaneseq }
 0x47b   : > { %2118 = vst [vmem:[#allocation1 + $0x1] ss:$9 sm:$0xff] %v1977_v0  ;;  %v2007_v0 = vperm.slane %v4105_v42, 7  ;;  %v2009_v42 = vperm.slane %v1901_v57, 1 }
 0x47c   : > { %2119 = vst [vmem:[#allocation1 + $0x2] ss:$9 sm:$0xff] %v1978_v19  ;;  %v2713_v19 = vld [vmem:[%s3326_s6 + $0x20] sm:$0xff]  ;;  %v4143_v38 = vand.u32 127, %v1813_v45 }
 0x47d   : > { %2120 = vst [vmem:[#allocation1 + $0x3] ss:$9 sm:$0xff] %v1979_v52  ;;  %v2386_v52 = vunpack.c.l.b16 %v4047_v40  ;;  %2348 = vmatpush.bf16.xpose.msra.mxu0 %v2713_v19  ;;  %v2013_v40 = vperm.slane %v1901_v57, 5 }
 0x47e   : > { %2121 = vst [vmem:[#allocation1 + $0x4] ss:$9 sm:$0xff] %v1980_v9  ;;  %v4137_v9 = vpop.xlane.xlu0 %1902  ;;  %v4152_v33 = vadd.s32 4294967288, %v4143_v38  ;;  %v4165_v36 = vadd.s32 4294967272, %v4143_v38  ;;  %v4172_v7 = vadd.s32 4294967256, %v4143_v38 }
 0x47f   : > { %2122 = vst [vmem:[#allocation1 + $0x5] ss:$9 sm:$0xff] %v1981_v4  ;;  %v2397_v4 = vpack.c.b16 %v2386_v52, %v2385_v60  ;;  %v2016_v6 = vperm.slane %v4137_v9, 0  ;;  %v2020_v16 = vperm.slane %v4137_v9, 4 }
 0x480   : > { %2123 = vst [vmem:[#allocation1 + $0x6] ss:$9 sm:$0xff] %v1982_v30  ;;  %v1817_v24 = vperm.slane %v4131_v17, %v4152_v33 }
 0x481   : > { %2124 = vst [vmem:[#allocation1 + $0x7] ss:$9 sm:$0xff] %v1983_v26  ;;  %2412 = vmatpush.bf16.xpose.msra.mxu1 %v2397_v4  ;;  %v2008_v26 = vperm.slane %v1901_v57, 0  ;;  %v4196_v4 = vadd.s32 4294967232, %v4143_v38 }
 0x482   : > { %v4139_v30 = vpop.permute.xlu2 %1775 }
 0x485   : > { %2349 = vmatpush.bf16.xpose.msra.mxu0 %v2712_v61  ;;  %v4219_v61 = vadd.s32 4294967208, %v4143_v38 }
 0x488   : > { %v2125_v47 = vld [vmem:[#allocation1] sm:$0xff] }
 0x489   : > { %2126 = vst [vmem:[#allocation1] ss:$9 sm:$0xff] %v1984_v63  ;;  %2226 = vperm.xlu1 %2883, %v2125_v47   ;;  %v1767_v63 = vpop.permute.xlu1 %1766  ;;  %v2012_v47 = vperm.slane %v1901_v57, 4 }
 0x48a   : > { %2127 = vst [vmem:[#allocation1 + $0x1] ss:$9 sm:$0xff] %v1985_v39  ;;  %v2010_v39 = vperm.slane %v1901_v57, 2 }
 0x48b   : > { %2128 = vst [vmem:[#allocation1 + $0x2] ss:$9 sm:$0xff] %v1986_v49  ;;  %v2011_v49 = vperm.slane %v1901_v57, 3 }
 0x48c   : > { %2129 = vst [vmem:[#allocation1 + $0x3] ss:$9 sm:$0xff] %v1987_v23 }
 0x48d   : > { %2130 = vst [vmem:[#allocation1 + $0x4] ss:$9 sm:$0xff] %v1988_v37  ;;  %v1773_v37 = vpop.permute.xlu0 %1772 }
 0x48e   : > { %2131 = vst [vmem:[#allocation1 + $0x5] ss:$9 sm:$0xff] %v1989_v55  ;;  %v2014_v55 = vperm.slane %v1901_v57, 6 }
 0x48f   : > { %2132 = vst [vmem:[#allocation1 + $0x6] ss:$9 sm:$0xff] %v1990_v48  ;;  %v2015_v48 = vperm.slane %v1901_v57, 7  ;;  %v2019_v57 = vperm.slane %v4137_v9, 3 }
 0x490   : > { %2133 = vst [vmem:[#allocation1 + $0x7] ss:$9 sm:$0xff] %v1991_v54  ;;  %v4141_v54 = vpop.permute.xlu2 %1781 }
 0x491   : > { %v1779_v11 = vpop.permute.xlu1 %1778 }
 0x495   : > { %v4154_v3 = vpop.permute.xlu0 %1793 }
 0x497   : > { %v2134_v27 = vld [vmem:[#allocation1] sm:$0xff] }
 0x498   : > { %2135 = vst [vmem:[#allocation1] ss:$9 sm:$0xff] %v1992_v46  ;;  %2229 = vperm.xlu0 %2885, %v2134_v27   ;;  %v4149_v46 = vadd.s32 4294967280, %v4143_v38  ;;  %v4160_v27 = vadd.s32 4294967264, %v4143_v38 }
 0x499   : > { %2136 = vst [vmem:[#allocation1 + $0x1] ss:$9 sm:$0xff] %v1993_v12  ;;  %v2396_v12 = vpack.c.b16 %v2384_v62, %v2383_v59  ;;  %v4223_v62 = vadd.s32 4294967200, %v4143_v38 }
 0x49a   : > { %2137 = vst [vmem:[#allocation1 + $0x2] ss:$9 sm:$0xff] %v1994_v20  ;;  %v1815_v20 = vperm.slane %v1767_v63, %v4143_v38  ;;  %v1821_v1 = vperm.slane %v1773_v37, %v4149_v46  ;;  %v2381_v63 = vunpack.c.l.b16 %v3974_v5  ;;  %v4211_v5 = vadd.s32 4294967216, %v4143_v38 }
 0x49b   : > { %2138 = vst [vmem:[#allocation1 + $0x3] ss:$9 sm:$0xff] %v1995_v14  ;;  %2413 = vmatpush.bf16.xpose.msra.mxu1 %v2396_v12  ;;  %v1788_v14 = vpop.permute.xlu2 %1787  ;;  %v2027_v12 = vperm.slane %v4107_v53, 3 }
 0x49c   : > { %2139 = vst [vmem:[#allocation1 + $0x4] ss:$9 sm:$0xff] %v1996_v58  ;;  %v2017_v58 = vperm.slane %v4137_v9, 1 }
 0x49d   : > { %2140 = vst [vmem:[#allocation1 + $0x5] ss:$9 sm:$0xff] %v1997_v25  ;;  %v1785_v25 = vpop.permute.xlu1 %1784 }
 0x49e   : > { %2141 = vst [vmem:[#allocation1 + $0x6] ss:$9 sm:$0xff] %v1998_v15  ;;  %v2018_v15 = vperm.slane %v4137_v9, 2 }
 0x49f   : > { %2142 = vst [vmem:[#allocation1 + $0x7] ss:$9 sm:$0xff] %v1999_v2  ;;  %v1819_v2 = vsel %vm1818_vm0, %v1817_v24, %v1815_v20  ;;  %v4232_v24 = vadd.s32 4294967184, %v4143_v38 }
 0x4a0   : > { %v1823_v28 = vsel %vm1822_vm6, %v1821_v1, %v1819_v2  ;;  %v4228_v1 = vadd.s32 4294967192, %v4143_v38  ;;  %v2030_v2 = vperm.slane %v4107_v53, 6 }
 0x4a3   : > { %v1797_v52 = vpop.permute.xlu2 %1796 }
 0x4a6   : > { %v2143_v8 = vld [vmem:[#allocation1] sm:$0xff] }
 0x4a7   : > { %2144 = vst [vmem:[#allocation1] ss:$9 sm:$0xff] %v2000_v32  ;;  %2232 = vperm.xlu2 %2884, %v2143_v8   ;;  %v1829_v32 = vperm.slane %v1779_v11, %v4160_v27  ;;  %v2022_v8 = vperm.slane %v4137_v9, 6 }
 0x4a8   : > { %2145 = vst [vmem:[#allocation1 + $0x1] ss:$9 sm:$0xff] %v2001_v18  ;;  %v4178_v18 = vadd.s32 4294967248, %v4143_v38 }
 0x4a9   : > { %2146 = vst [vmem:[#allocation1 + $0x2] ss:$9 sm:$0xff] %v2002_v35  ;;  %v1825_v35 = vperm.slane %v4139_v30, %v4165_v36  ;;  %v4199_v30 = vadd.s32 4294967224, %v4143_v38 }
 0x4aa   : > { %2147 = vst [vmem:[#allocation1 + $0x3] ss:$9 sm:$0xff] %v2003_v51  ;;  %v2021_v51 = vperm.slane %v4137_v9, 5  ;;  %v1837_v60 = vperm.slane %v1785_v25, %v4178_v18 }
 0x4ab   : > { %2148 = vst [vmem:[#allocation1 + $0x4] ss:$9 sm:$0xff] %v2004_v41  ;;  %v4184_v41 = vpop.permute.xlu0 %1802  ;;  %v1827_v17 = vsel %vm1826_vm7, %v1825_v35, %v1823_v28  ;;  %v1800_v20 = vpop.permute.xlu2 %1799 }
 0x4ac   : > { %2149 = vst [vmem:[#allocation1 + $0x5] ss:$9 sm:$0xff] %v2005_v43  ;;  %v2023_v43 = vperm.slane %v4137_v9, 7  ;;  %v1831_v19 = vsel %vm1830_vm8, %v1829_v32, %v1827_v17  ;;  %v1791_v9 = vpop.permute.xlu1 %1790 }
 0x4ad   : > { %2150 = vst [vmem:[#allocation1 + $0x6] ss:$9 sm:$0xff] %v2006_v56  ;;  %v1833_v56 = vperm.slane %v4141_v54, %v4172_v7 }
 0x4ae   : > { %2151 = vst [vmem:[#allocation1 + $0x7] ss:$9 sm:$0xff] %v2007_v0  ;;  %v4191_v0 = vadd.s32 4294967240, %v4143_v38 }
 0x4b0   : > { %v1841_v45 = vperm.slane %v1788_v14, %v4191_v0  ;;  %v2028_v14 = vperm.slane %v4107_v53, 4 }
 0x4b3   : > { %v1806_v11 = vpop.permute.xlu0 %1805 }
 0x4b4   : > { %v1865_v28 = vperm.slane %v1806_v11, %v4228_v1  ;;  %v2041_v11 = vperm.slane %v4117_v10, 1 }
 0x4b5   : > { %v2152_v23 = vld [vmem:[#allocation1] sm:$0xff] }
 0x4b6   : > { %2153 = vst [vmem:[#allocation1] ss:$9 sm:$0xff] %v2008_v26  ;;  %2235 = vperm.xlu1 %2883, %v2152_v23   ;;  %v2711_v26 = vld [vmem:[%s3326_s6 + $0x10] sm:$0xff] }
 0x4b7   : > { %2154 = vst [vmem:[#allocation1 + $0x1] ss:$9 sm:$0xff] %v2009_v42  ;;  %v2382_v42 = vunpack.c.l.b16 %v3992_v31  ;;  %2350 = vmatpush.bf16.xpose.msra.mxu0 %v2711_v26  ;;  %v2024_v31 = vperm.slane %v4107_v53, 0 }
 0x4b8   : > { %2155 = vst [vmem:[#allocation1 + $0x2] ss:$9 sm:$0xff] %v2010_v39  ;;  %v1835_v39 = vsel %vm1834_vm9, %v1833_v56, %v1831_v19  ;;  %v2710_v56 = vld [vmem:[%s3326_s6 + $0x8] sm:$0xff]  ;;  %v1421_v19 = vld [vmem:[#allocation4] sm:$0x1] }
 0x4b9   : > { %2156 = vst [vmem:[#allocation1 + $0x3] ss:$9 sm:$0xff] %v2011_v49  ;;  %v2395_v49 = vpack.c.b16 %v2382_v42, %v2381_v63  ;;  %v1839_v23 = vsel %vm1838_vm10, %v1837_v60, %v1835_v39  ;;  %v2033_v63 = vperm.slane %v4112_v22, 1  ;;  %v2034_v42 = vperm.slane %v4112_v22, 2 }
 0x4ba   : > { %2157 = vst [vmem:[#allocation1 + $0x4] ss:$9 sm:$0xff] %v2012_v47  ;;  %v1845_v47 = vperm.slane %v1791_v9, %v4196_v4  ;;  %v1843_v37 = vsel %vm1842_vm11, %v1841_v45, %v1839_v23  ;;  %v2035_v39 = vperm.slane %v4112_v22, 3  ;;  %v2036_v23 = vperm.slane %v4112_v22, 4 }
 0x4bb   : > { %2158 = vst [vmem:[#allocation1 + $0x5] ss:$9 sm:$0xff] %v2013_v40  ;;  %v1849_v40 = vperm.slane %v4154_v3, %v4199_v30  ;;  %2414 = vmatpush.bf16.xpose.msra.mxu1 %v2395_v49  ;;  %v1853_v3 = vperm.slane %v1797_v52, %v4211_v5  ;;  %v2038_v45 = vperm.slane %v4112_v22, 6 }
 0x4bc   : > { %2159 = vst [vmem:[#allocation1 + $0x6] ss:$9 sm:$0xff] %v2014_v55  ;;  %v2025_v55 = vperm.slane %v4107_v53, 1  ;;  %v1847_v54 = vsel %vm1846_vm12, %v1845_v47, %v1843_v37  ;;  %v2037_v47 = vperm.slane %v4112_v22, 5  ;;  %v2377_v37 = vunpack.c.l.b16 %v3926_v50 }
 0x4bd   : > { %2160 = vst [vmem:[#allocation1 + $0x7] ss:$9 sm:$0xff] %v2015_v48  ;;  %v2026_v48 = vperm.slane %v4107_v53, 2  ;;  %v1851_v59 = vsel %vm1850_vm13, %v1849_v40, %v1847_v54  ;;  %v2039_v40 = vperm.slane %v4112_v22, 7  ;;  %v2040_v54 = vperm.slane %v4117_v10, 0 }
 0x4be   : > { %v1855_v25 = vsel %vm1854_vm14, %v1853_v3, %v1851_v59  ;;  %v2042_v59 = vperm.slane %v4117_v10, 2  ;;  %v2044_v50 = vperm.slane %v4117_v10, 4 }
 0x4bf   : > { %2351 = vmatpush.bf16.xpose.msra.mxu0 %v2710_v56 }
 0x4c4   : > { %v2161_v13 = vld [vmem:[#allocation1] sm:$0xff] }
 0x4c5   : > { %2238 = vperm.xlu0 %2885, %v2161_v13   ;;  %2162 = vst [vmem:[#allocation1] ss:$9 sm:$0xff] %v2016_v6  ;;  %v1861_v13 = vperm.slane %v4184_v41, %v4223_v62  ;;  %v2379_v41 = vunpack.c.l.b16 %v3914_v29 }
 0x4c6   : > { %2163 = vst [vmem:[#allocation1 + $0x1] ss:$9 sm:$0xff] %v2017_v58  ;;  %v2029_v58 = vperm.slane %v4107_v53, 5 }
 0x4c7   : > { %2164 = vst [vmem:[#allocation1 + $0x2] ss:$9 sm:$0xff] %v2018_v15  ;;  %v1809_v15 = vpop.permute.xlu1 %1808 }
 0x4c8   : > { %2165 = vst [vmem:[#allocation1 + $0x3] ss:$9 sm:$0xff] %v2019_v57  ;;  %v1857_v57 = vperm.slane %v1800_v20, %v4219_v61  ;;  %v1869_v35 = vperm.slane %v1809_v15, %v4232_v24  ;;  %v2046_v20 = vperm.slane %v4117_v10, 6  ;;  %v2051_v15 = vperm.slane %v4128_v44, 3 }
 0x4c9   : > { %2166 = vst [vmem:[#allocation1 + $0x4] ss:$9 sm:$0xff] %v2020_v16  ;;  %v2031_v16 = vperm.slane %v4107_v53, 7  ;;  %v2380_v53 = vunpack.c.l.b16 %v3918_v21  ;;  %v2032_v21 = vperm.slane %v4112_v22, 0  ;;  %v962_v22 = vld [vmem:[%s3345_s25] sm:$0xf] }
 0x4ca   : > { %2167 = vst [vmem:[#allocation1 + $0x5] ss:$9 sm:$0xff] %v2021_v51  ;;  %v1859_v32 = vsel %vm1858_vm15, %v1857_v57, %v1855_v25  ;;  %v4245_v51 = vadd.s32 4294967176, %v4143_v38  ;;  %v2050_v25 = vperm.slane %v4128_v44, 2  ;;  %v2052_v57 = vperm.slane %v4128_v44, 4 }
 0x4cb   : > { %2168 = vst [vmem:[#allocation1 + $0x6] ss:$9 sm:$0xff] %v2022_v8  ;;  %v1812_v8 = vpop.permute.xlu0 %1811  ;;  %v2394_v52 = vpack.c.b16 %v2380_v53, %v2379_v41  ;;  %v2209_v41 = vpop.permute.xlu2 %2208 }
 0x4cc   : > { %2169 = vst [vmem:[#allocation1 + $0x7] ss:$9 sm:$0xff] %v2023_v43  ;;  %v1863_v43 = vsel %vm1862_vm1, %v1861_v13, %v1859_v32  ;;  %v1873_v60 = vperm.slane %v1812_v8, %v4245_v51  ;;  %v2054_v13 = vperm.slane %v4128_v44, 6  ;;  %v2290_v32 = vunpack.c.l.bf16 %v962_v22 }
 0x4cd   : > { %v1867_v17 = vsel %vm1866_vm2, %v1865_v28, %v1863_v43  ;;  %2415 = vmatpush.bf16.xpose.msra.mxu1 %v2394_v52  ;;  %v2296_v52 = vld [vmem:[#allocation2] sm:$0xff] }
 0x4ce   : > { %v1871_v9 = vsel %vm1870_vm3, %v1869_v35, %v1867_v17 }
 0x4cf   : > { %v1875_v26 = vsel %vm1874_vm4, %v1873_v60, %v1871_v9  ;;  %v2218_v53 = vpop.permute.xlu1 %2217  ;;  %v2255_v9 = vperm.slane %v2209_v41, %v4143_v38 }
 0x4d0   : > { %v1877_v29 = vadd.f32 %v1875_v26, %v1421_v19  ;;  %v2260_v26 = vperm.slane %v2218_v53, %v4165_v36 }
 0x4d2   : > { %1878 = vst [vmem:[#allocation4] sm:$0x1] %v1877_v29 }
 0x4d3   : > { %v2170_v6 = vld [vmem:[#allocation1] sm:$0xff]  ;;  %v2212_v35 = vpop.permute.xlu0 %2211 }
 0x4d4   : > { %2241 = vperm.xlu2 %2884, %v2170_v6   ;;  %2171 = vst [vmem:[#allocation1] ss:$9 sm:$0xff] %v2024_v31  ;;  %v2709_v31 = vld [vmem:[%s3326_s6] sm:$0xff]  ;;  %v2047_v6 = vperm.slane %v4117_v10, 7  ;;  %v2224_v56 = vpop.permute.xlu2 %2223  ;;  %v2256_v60 = vperm.slane %v2212_v35, %v4152_v33 }
 0x4d5   : > { %2172 = vst [vmem:[#allocation1 + $0x1] ss:$9 sm:$0xff] %v2025_v55  ;;  %v2378_v55 = vunpack.c.l.b16 %v3932_v34  ;;  %2352 = vmatpush.bf16.xpose.msra.mxu0 %v2709_v31  ;;  %v2045_v34 = vperm.slane %v4117_v10, 5 }
 0x4d6   : > { %2173 = vst [vmem:[#allocation1 + $0x2] ss:$9 sm:$0xff] %v2026_v48 }
 0x4d7   : > { %2174 = vst [vmem:[#allocation1 + $0x3] ss:$9 sm:$0xff] %v2027_v12  ;;  %v2393_v48 = vpack.c.b16 %v2378_v55, %v2377_v37  ;;  %v2043_v12 = vperm.slane %v4117_v10, 3  ;;  %v2053_v10 = vperm.slane %v4128_v44, 5 }
 0x4d8   : > { %2175 = vst [vmem:[#allocation1 + $0x4] ss:$9 sm:$0xff] %v2028_v14  ;;  %v2048_v14 = vperm.slane %v4128_v44, 0 }
 0x4d9   : > { %2176 = vst [vmem:[#allocation1 + $0x5] ss:$9 sm:$0xff] %v2029_v58  ;;  %2416 = vmatpush.bf16.xpose.msra.mxu1 %v2393_v48  ;;  %v2049_v58 = vperm.slane %v4128_v44, 1 }
 0x4da   : > { %2177 = vst [vmem:[#allocation1 + $0x6] ss:$9 sm:$0xff] %v2030_v2 }
 0x4db   : > { %2178 = vst [vmem:[#allocation1 + $0x7] ss:$9 sm:$0xff] %v2031_v16  ;;  %v2055_v16 = vperm.slane %v4128_v44, 7  ;;  %v2215_v8 = vpop.permute.xlu0 %2214 }
 0x4dc   : > { %2353 = vmatmul.bf16.vlgmr.msra.gmra.mxu0 %v962_v22  ;;  %v2258_v44 = vperm.slane %v2215_v8, %v4149_v46 }
 0x4e0   : > { %2417 = vmatmul.bf16.vlgmr.msra.gmra.mxu1 %v962_v22 }
 0x4e2   : > { %v2179_v49 = vld [vmem:[#allocation1] sm:$0xff] }
 0x4e3   : > { %2244 = vperm.xlu1 %2883, %v2179_v49   ;;  %2180 = vst [vmem:[#allocation1] ss:$9 sm:$0xff] %v2032_v21  ;;  %v2221_v43 = vpop.permute.xlu0 %2220 }
 0x4e4   : > { %2181 = vst [vmem:[#allocation1 + $0x1] ss:$9 sm:$0xff] %v2033_v63  ;;  %v2262_v29 = vperm.slane %v2221_v43, %v4160_v27  ;;  %v2360_v63 = vld [vmem:[#allocation3] sm:$0xff]  ;;  %v2264_v27 = vperm.slane %v2224_v56, %v4172_v7 }
 0x4e5   : > { %2182 = vst [vmem:[#allocation1 + $0x2] ss:$9 sm:$0xff] %v2034_v42  ;;  %v2257_v42 = vsel %vm1818_vm0, %v2256_v60, %v2255_v9 }
 0x4e6   : > { %2183 = vst [vmem:[#allocation1 + $0x3] ss:$9 sm:$0xff] %v2035_v39 }
 0x4e7   : > { %2184 = vst [vmem:[#allocation1 + $0x4] ss:$9 sm:$0xff] %v2036_v23  ;;  %v2259_v23 = vsel %vm1822_vm6, %v2258_v44, %v2257_v42 }
 0x4e8   : > { %2185 = vst [vmem:[#allocation1 + $0x5] ss:$9 sm:$0xff] %v2037_v47  ;;  %v2261_v33 = vsel %vm1826_vm7, %v2260_v26, %v2259_v23 }
 0x4e9   : > { %2186 = vst [vmem:[#allocation1 + $0x6] ss:$9 sm:$0xff] %v2038_v45  ;;  %v2263_v38 = vsel %vm1830_vm8, %v2262_v29, %v2261_v33 }
 0x4ea   : > { %2187 = vst [vmem:[#allocation1 + $0x7] ss:$9 sm:$0xff] %v2039_v40  ;;  %v2265_v37 = vsel %vm1834_vm9, %v2264_v27, %v2263_v38 }
 0x4f1   : > { %v2188_v3 = vld [vmem:[#allocation1] sm:$0xff] }
 0x4f2   : > { %2247 = vperm.xlu0 %2885, %v2188_v3   ;;  %2189 = vst [vmem:[#allocation1] ss:$9 sm:$0xff] %v2040_v54 }
 0x4f3   : > { %2190 = vst [vmem:[#allocation1 + $0x1] ss:$9 sm:$0xff] %v2041_v11 }
 0x4f4   : > { %2191 = vst [vmem:[#allocation1 + $0x2] ss:$9 sm:$0xff] %v2042_v59 }
 0x4f5   : > { %2192 = vst [vmem:[#allocation1 + $0x3] ss:$9 sm:$0xff] %v2043_v12 }
 0x4f6   : > { %2193 = vst [vmem:[#allocation1 + $0x4] ss:$9 sm:$0xff] %v2044_v50 }
 0x4f7   : > { %2194 = vst [vmem:[#allocation1 + $0x5] ss:$9 sm:$0xff] %v2045_v34 }
 0x4f8   : > { %2195 = vst [vmem:[#allocation1 + $0x6] ss:$9 sm:$0xff] %v2046_v20 }
 0x4f9   : > { %2196 = vst [vmem:[#allocation1 + $0x7] ss:$9 sm:$0xff] %v2047_v6 }
 0x4fb   : > { %v2227_v17 = vpop.permute.xlu1 %2226 }
 0x4fc   : > { %v2266_v36 = vperm.slane %v2227_v17, %v4178_v18 }
 0x4fe   : > { %v2267_v55 = vsel %vm1838_vm10, %v2266_v36, %v2265_v37 }
 0x500   : > { %v2197_v2 = vld [vmem:[#allocation1] sm:$0xff] }
 0x501   : > { %2250 = vperm.xlu2 %2884, %v2197_v2   ;;  %2198 = vst [vmem:[#allocation1] ss:$9 sm:$0xff] %v2048_v14  ;;  %v2233_v39 = vpop.permute.xlu2 %2232  ;;  %v1879_v2 = vld [vmem:[#allocation5] sm:$0x1] }
 0x502   : > { %2199 = vst [vmem:[#allocation1 + $0x1] ss:$9 sm:$0xff] %v2049_v58  ;;  %v2270_v22 = vperm.slane %v2233_v39, %v4196_v4 }
 0x503   : > { %2200 = vst [vmem:[#allocation1 + $0x2] ss:$9 sm:$0xff] %v2050_v25 }
 0x504   : > { %2201 = vst [vmem:[#allocation1 + $0x3] ss:$9 sm:$0xff] %v2051_v15 }
 0x505   : > { %2202 = vst [vmem:[#allocation1 + $0x4] ss:$9 sm:$0xff] %v2052_v57 }
 0x506   : > { %2203 = vst [vmem:[#allocation1 + $0x5] ss:$9 sm:$0xff] %v2053_v10 }
 0x507   : > { %2204 = vst [vmem:[#allocation1 + $0x6] ss:$9 sm:$0xff] %v2054_v13 }
 0x508   : > { %2205 = vst [vmem:[#allocation1 + $0x7] ss:$9 sm:$0xff] %v2055_v16 }
 0x50a   : > { %v2230_v19 = vpop.permute.xlu0 %2229 }
 0x50b   : > { %v2268_v31 = vperm.slane %v2230_v19, %v4191_v0 }
 0x50d   : > { %v2269_v54 = vsel %vm1842_vm11, %v2268_v31, %v2267_v55 }
 0x50e   : > { %v2271_v7 = vsel %vm1846_vm12, %v2270_v22, %v2269_v54 }
 0x50f   : > { %v2206_v28 = vld [vmem:[#allocation1] sm:$0xff] }
 0x510   : > { %2253 = vperm.xlu1 %2883, %v2206_v28  }
 0x51c   : > { %2291 = vadd.xlane.f32.xlu0 %v2290_v32 }
 0x528   : > { %v2236_v45 = vpop.permute.xlu1 %2235 }
 0x529   : > { %v2272_v59 = vperm.slane %v2236_v45, %v4199_v30 }
 0x52b   : > { %v2273_v50 = vsel %vm1850_vm13, %v2272_v59, %v2271_v7 }
 0x52e   : > { %v2242_v11 = vpop.permute.xlu2 %2241 }
 0x52f   : > { %v2276_v6 = vperm.slane %v2242_v11, %v4219_v61 }
 0x537   : > { %v2239_v40 = vpop.permute.xlu0 %2238 }
 0x538   : > { %v2274_v18 = vperm.slane %v2239_v40, %v4211_v5 }
 0x53a   : > { %v2275_v34 = vsel %vm1854_vm14, %v2274_v18, %v2273_v50 }
 0x53b   : > { %v2277_v4 = vsel %vm1858_vm15, %v2276_v6, %v2275_v34 }
 0x555   : > { %v2245_v3 = vpop.permute.xlu1 %2244 }
 0x556   : > { %v2278_v20 = vperm.slane %v2245_v3, %v4223_v62 }
 0x558   : > { %v2279_v5 = vsel %vm1862_vm1, %v2278_v20, %v2277_v4 }
 0x559   : > { %v2354_v21 = vpop.f32.mrf.mxu0 }
 0x55a   : > { %v2358_v49 = vadd.f32 %v2354_v21, %v2296_v52 }
 0x55b   : > { %v2251_v30 = vpop.permute.xlu2 %2250 }
 0x55c   : > { %2359 = vst [vmem:[#allocation2] sm:$0xff] %v2358_v49  ;;  %v2282_v25 = vperm.slane %v2251_v30, %v4232_v24 }
 0x55d   : > { %v2418_v47 = vpop.f32.mrf.mxu1 }
 0x55e   : > { %v2422_v46 = vadd.f32 %v2418_v47, %v2360_v63 }
 0x560   : > { %2423 = vst [vmem:[#allocation3] sm:$0xff] %v2422_v46 }
 0x561   : > { %v2356_v48 = vpop.f32.mrf.mxu0 }
 0x564   : > { %v2248_v0 = vpop.permute.xlu0 %2247 }
 0x565   : > { %v2420_v12 = vpop.f32.mrf.mxu1  ;;  %v2280_v14 = vperm.slane %v2248_v0, %v4228_v1  ;;  %v2289_v1 = vld [vmem:[#allocation6] sm:$0xff] }
 0x567   : > { %v2281_v58 = vsel %vm1866_vm2, %v2280_v14, %v2279_v5 }
 0x568   : > { %v2283_v10 = vsel %vm1870_vm3, %v2282_v25, %v2281_v58 }
 0x582   : > { %v2254_v15 = vpop.permute.xlu1 %2253 }
 0x583   : > { %v2284_v57 = vperm.slane %v2254_v15, %v4245_v51 }
 0x585   : > { %v2285_v62 = vsel %vm1874_vm4, %v2284_v57, %v2283_v10 }
 0x586   : > { %v2287_v61 = vadd.f32 %v2285_v62, %v1879_v2 }
 0x588   : > { %2288 = vst [vmem:[#allocation5] sm:$0x1] %v2287_v61 }
 0x58e   : > { %2427 = sbr.rel (%p2703_p10) target bundleno = 1581 (0x62d), region = 93 }
 0x58f   : > { %v2292_v13 = vpop.xlane.xlu0 %2291 }
 0x590   : > { %v2293_v16 = vadd.f32 %v2292_v13, %v2289_v1 }
 0x592   : > { %2295 = vst.msk [vmem:[#allocation6] sm:$0xff] %vm2294_vm5, %v2293_v16 }
 0x593   : > { %v3154_v24 = vmov 0   ;;  %v3016_v32 = vld [vmem:[#allocation5] ss:$0 sm:$0xff]  ;;  %v2446_v53 = vld [vmem:[#allocation3] sm:$0xff]  ;;  %v3015_v60 = vld [vmem:[#allocation4] ss:$0 sm:$0xff]  ;;  %v2466_v39 = vstv %s3352_s20  ;;  %v2468_v47 = vstv %s3354_s14 }
 0x594   : > { %3014 = vset.pattern.permute.xlu0 %v3154_v24  ;;  %v2447_v56 = vmul.f32 2.0, %v2446_v53  ;;  %v2429_v9 = vld [vmem:[#allocation2] sm:$0xff] }
 0x595   : > { %v2433_v63 = vsub.f32 %v3015_v60, %v2429_v9  ;;  %v2465_v38 = vld [vmem:[%s3356_s10] sm:$0xff] }
 0x596   : > { %v2448_v26 = vadd.f32 1.0, %v2447_v56 }
 0x597   : > { %v2467_v45 = vmul.f32 %v2466_v39, %v2433_v63 }
 0x599   : > { %v2435_v28 = vld [vmem:[#allocation6] sm:$0xff] }
 0x59a   : > { %2441 = vperm.xlu0 %3014, %v2435_v28  }
 0x60c   : > { %v2442_v51 = vpop.permute.xlu0 %2441 }
 0x60d   : > { %v2444_v35 = vadd.f32 %v3016_v32, %v2442_v51 }
 0x60f   : > { %v2445_v8 = vadd.f32 1.0, %v2444_v35 }
 0x611   : > { %3017 = vrcp.f32 %v2445_v8  ;;  %v2460_v19 = vand.u32 2147483648, %v2445_v8  ;;  %v2458_v52 = vand.u32 2147483647, %v2445_v8  ;;  %vm2454_vm6 = vweird.f32 %v2445_v8 }
 0x613   : > { %v2461_v21 = vor.u32 1.1754944e-38, %v2460_v19  ;;  %vm2459_vm8 = vcmp.eq.f32.partialorder %v2458_v52, 8.507059e+37 }
 0x617   : > { %v3018_v41 = vpop.eup %3017 }
 0x618   : > { %v2450_v43 = vmul.f32 %v3018_v41, %v2445_v8  ;;  %vm2455_vm0 = vweird.f32 %v3018_v41 }
 0x619   : > { %vm2456_vm7 = vmor %vm2454_vm6, %vm2455_vm0 }
 0x61a   : > { %v2451_v17 = vsub.f32 1.0, %v2450_v43 }
 0x61c   : > { %v2452_v44 = vmul.f32 %v3018_v41, %v2451_v17 }
 0x61e   : > { %v2453_v29 = vadd.f32 %v3018_v41, %v2452_v44 }
 0x620   : > { %v2457_v42 = vsel %vm2456_vm7, %v3018_v41, %v2453_v29 }
 0x621   : > { %v2462_v49 = vsel %vm2459_vm8, %v2461_v21, %v2457_v42 }
 0x622   : > { %v2463_v23 = vmul.f32 %v2462_v49, %v2448_v26 }
 0x624   : > { %v2464_v33 = vsub.f32 1.0, %v2463_v23 }
 0x626   : > { %v2469_v46 = vmul.f32 %v2468_v47, %v2464_v33 }
 0x628   : > { %v2470_v36 = vadd.f32 %v2469_v46, %v2467_v45 }
 0x62a   : > { %v2471_v40 = vadd.f32 %v2470_v36, %v2465_v38 }
 0x62c   : > { %2472 = vst [vmem:[%s3356_s10] sm:$0xff] %v2471_v40 }
 0x62d PF: > { %s2705_s2 = sshll.u32 %s3136_s24, 3  ;;  %s2487_s25 = sshll.u32 %s3356_s10, 4  ;;  %s2488_s25 = int_to_ptr.vmem [resolvable:$true] %s2487_s25 }
 0x62e   : > { %s2485_s20 = scalar_lea.hbm %s4375_s5, %s2705_s2  ;;  %s4436_s14 = sand.u32 1, %s3116_s19  }
 0x62f   : > { %s2489_s26 = sshll.u32 %s2485_s20, 4  ;;  %s2474_s15 = scalar_lea.sflag [#allocation8], %s4436_s14  ;;  %s2490_s26 = int_to_ptr.hbm [resolvable:$true] %s2489_s26 }
 0x630   : > { %s3048_s6 = sshra.s32 %s2490_s26, 4  ;;  %s3054_s24 = scalar_lea.hbm %s4375_s5, 16  ;;  %s3049_s6 = int_to_ptr.hbm [resolvable:$true] %s3048_s6 }
 0x631   : > { %s3050_s16 = scalar_lea.hbm %s3049_s6, 8  ;;  %p3055_p1 = scmp.lt.s32.totalorder %s3049_s6, %s4375_s5 }
 0x632   : > { %p3051_p11 = scmp.ne.s32.totalorder %s3049_s6, %s3050_s16  ;;  %p3056_p2 = scmp.lt.s32.totalorder %s3054_s24, %s3050_s16 }
 0x634   : > { %p3052_p13 = pnand %p3051_p11, %p3257_p7  ;;  %p3057_p4 = por %p3056_p2, %p3055_p1 }
 0x636   : > { %p3053_p0 = pneg %p3052_p13 }
 0x638   : > { %p3058_p5 = pnand %p3057_p4, %p3053_p0 }
 0x63a   : > { %3061 = shalt.err (!%p3058_p5)
}
 0x63b   : > { %2721 = dma.vmem_to_hbm [thread:$0]  (%p3257_p7), %s2488_s25, 128, %s2490_s26, %s2474_s15  }
 0x63c PF: > { %p2733_p6 = scmp.ge.s32.totalorder %s3148_s27, 2  ;;  %s2501_s28 = sand.u32 1, %s3112_s18  }
 0x63d   : > { %s2502_s8 = scalar_lea.sflag [#allocation8], %s2501_s28 }
 0x63e   : > { %p2728_p3 = pnand %p2733_p6, %p3265_p12 }
 0x640   : > { %p2729_p8 = pneg %p2728_p3 }
 0x642   : > { %3107 = dma.done.wait (%p2729_p8), %s2502_s8, 128  }
 0x643   : > { %3109 = vsyncadd (%p2729_p8), %s2502_s8, 4294967168  ;;  %s19_s27 = sadd.s32 1, %s3148_s27   ;;  %s4438_s12 = sld [smem:[#allocation14_spill]] }
 0x644   : > { %p16_p9 = scmp.ge.s32.totalorder %s19_s27, 6   ;;  %s4439_s20 = sld [smem:[#allocation21_spill]] }
 0x645   : > { %s4440_s21 = sld [smem:[#allocation15_spill]]  ;;  %s4446_s18 = smov %s3116_s19 }
 0x646   : > { %s4441_s22 = sld [smem:[#allocation22_spill]]  ;;  %18 = sbr.rel (!%p16_p9) target bundleno = 10 (0xa), region = 157 }
 0x647   : > { %s4442_s23 = sld [smem:[#allocation16_spill]] }
 0x648   : > { %s4443_s24 = sld [smem:[#allocation17_spill]] }
 0x649   : > { %s4444_s25 = sld [smem:[#allocation18_spill]]  ;;  %s4447_s19 = smov %s4438_s12 }
 0x64a   : > { %s4445_s26 = sld [smem:[#allocation19_spill]] }
 0x64b   :  { %2508 = vsyncpa [#allocation8], 1 }
 0x64c   :  { %2510 = vsyncpa [#allocation8 + $0x1], 1 }
 0x64d   :  { %2511 = vsyncpa [#allocation9], 1 }
 0x64e   :  { %2513 = vsyncpa [#allocation9 + $0x1], 1 }

</bundles_post_ra>
